<compile_context>
chip_gen: v7x
topology: tpu7x:2x2x1
jax: 0.10.0
libtpu: 0.0.40
codegen_flags: <defaults>
</compile_context>

<pallas_src>
import jax
import jax.numpy as jnp
from jax import lax
from jax.experimental import pallas as pl
from jax.experimental.pallas import tpu as pltpu  # noqa: F401  (TPU backend)

# ----------------------- model dimensions (small, synthetic) -----------------
B, S = 2, 8            # batch, sequence
D = 128                # hidden size
H, DH = 4, 32          # heads, head dim (H * DH == D)
F = 256                # MLP intermediate (SwiGLU)
V = 256                # vocab size
N_LAYERS = 2
EPS = 1e-6


# ------------------------- fused forward Pallas kernel -----------------------
def _fused_forward_kernel(x0_ref, cos_ref, sin_ref,
                          ln1_ref, wqkv_ref, wo_ref,
                          ln2_ref, wgu_ref, wd_ref,
                          lnf_ref, lmh_ref,
                          o_ref):
    """Whole transformer forward on VMEM-resident [B*S, D] activations."""
    x = x0_ref[...]                      # [M, D]  f32
    cosv = cos_ref[...]                  # [S, DH] f32
    sinv = sin_ref[...]                  # [S, DH] f32
    scale = 1.0 / (DH ** 0.5)

    def rms(v, w):
        # v: [M, D] f32, w: [1, D] f32 — all math in f32 (EUP rsqrt).
        var = jnp.mean(v * v, axis=-1, keepdims=True)
        return v * lax.rsqrt(var + EPS) * w

    def rope(t):
        # t: [S, DH] f32 — rotate-half RoPE.
        t1 = t[:, : DH // 2]
        t2 = t[:, DH // 2:]
        rot = jnp.concatenate([-t2, t1], axis=-1)
        return t * cosv + rot * sinv

    row = lax.broadcasted_iota(jnp.int32, (S, S), 0)
    col = lax.broadcasted_iota(jnp.int32, (S, S), 1)
    causal = col <= row

    for li in range(N_LAYERS):
        ln1 = ln1_ref[li]                # [1, D]   f32
        wqkv = wqkv_ref[li]              # [D, 3D]  bf16
        wo = wo_ref[li]                  # [D, D]   bf16
        ln2 = ln2_ref[li]                # [1, D]   f32
        wgu = wgu_ref[li]                # [D, 2F]  bf16
        wd = wd_ref[li]                  # [F, D]   bf16

        # ---------------- self-attention block ----------------
        xn = rms(x, ln1)
        qkv = jnp.dot(xn.astype(jnp.bfloat16), wqkv,
                      preferred_element_type=jnp.float32)       # [M, 3D]
        q = qkv[:, :D]
        k = qkv[:, D:2 * D]
        v = qkv[:, 2 * D:]

        batch_outs = []
        for bi in range(B):
            r0 = bi * S
            head_outs = []
            for hi in range(H):
                c0 = hi * DH
                qh = rope(q[r0:r0 + S, c0:c0 + DH]) * scale      # [S, DH]
                kh = rope(k[r0:r0 + S, c0:c0 + DH])              # [S, DH]
                vh = v[r0:r0 + S, c0:c0 + DH]                    # [S, DH]
                # scores = qh @ kh.T  (contract on last dims, no transpose op)
                s = lax.dot_general(
                    qh.astype(jnp.bfloat16), kh.astype(jnp.bfloat16),
                    (((1,), (1,)), ((), ())),
                    preferred_element_type=jnp.float32)          # [S, S]
                s = jnp.where(causal, s, -1e30)
                m = jnp.max(s, axis=-1, keepdims=True)
                p = jnp.exp(s - m)
                denom = jnp.sum(p, axis=-1, keepdims=True)
                p = p * pl.reciprocal(denom, approx=True)
                oh = jnp.dot(p.astype(jnp.bfloat16), vh.astype(jnp.bfloat16),
                             preferred_element_type=jnp.float32)  # [S, DH]
                head_outs.append(oh)
            batch_outs.append(jnp.concatenate(head_outs, axis=-1))  # [S, D]
        attn = jnp.concatenate(batch_outs, axis=0)                  # [M, D]

        x = x + jnp.dot(attn.astype(jnp.bfloat16), wo,
                        preferred_element_type=jnp.float32)

        # ---------------- SwiGLU MLP block ----------------
        xn = rms(x, ln2)
        gu = jnp.dot(xn.astype(jnp.bfloat16), wgu,
                     preferred_element_type=jnp.float32)            # [M, 2F]
        g = gu[:, :F]
        u = gu[:, F:]
        hmlp = (g * jax.nn.sigmoid(g)) * u                          # f32 SiLU
        x = x + jnp.dot(hmlp.astype(jnp.bfloat16), wd,
                        preferred_element_type=jnp.float32)

    # ---------------- final norm + lm_head ----------------
    xn = rms(x, lnf_ref[...])
    o_ref[...] = jnp.dot(xn.astype(jnp.bfloat16), lmh_ref[...],
                         preferred_element_type=jnp.float32)        # [M, V]


def fused_forward(x0, cos, sin, ln1, wqkv, wo, ln2, wgu, wd, ln_f, lm_head):
    """One pallas_call for the whole forward; everything fits in VMEM."""
    m = x0.shape[0]
    return pl.pallas_call(
        _fused_forward_kernel,
        out_shape=jax.ShapeDtypeStruct((m, V), jnp.float32),
    )(x0, cos, sin, ln1, wqkv, wo, ln2, wgu, wd, ln_f, lm_head)


# ------------------------------ JAX glue --------------------------------------
def make_rope(seq, dh):
    half = dh // 2
    inv_freq = 1.0 / (10000.0 ** (jnp.arange(half, dtype=jnp.float32) / half))
    pos = jnp.arange(seq, dtype=jnp.float32)
    freqs = pos[:, None] * inv_freq[None, :]                 # [S, half]
    emb = jnp.concatenate([freqs, freqs], axis=-1)           # [S, Dh]
    return jnp.cos(emb), jnp.sin(emb)                        # each [S, Dh]


def init_params(key):
    def dense(k, shape, scale=0.02):
        return scale * jax.random.normal(k, shape, dtype=jnp.float32)

    keys = jax.random.split(key, 4 + N_LAYERS)
    wqkv, wo, wgu, wd, ln1, ln2 = [], [], [], [], [], []
    for li in range(N_LAYERS):
        lk = jax.random.split(keys[4 + li], 7)
        wq = dense(lk[0], (D, D))
        wk = dense(lk[1], (D, D))
        wv = dense(lk[2], (D, D))
        wqkv.append(jnp.concatenate([wq, wk, wv], axis=-1))          # [D, 3D]
        wo.append(dense(lk[3], (D, D)))
        wgu.append(jnp.concatenate([dense(lk[4], (D, F)),
                                    dense(lk[5], (D, F))], axis=-1))  # [D, 2F]
        wd.append(dense(lk[6], (F, D)))
        ln1.append(jnp.ones((1, D), jnp.float32))
        ln2.append(jnp.ones((1, D), jnp.float32))

    # Projection weights are bf16 MXU operands; norm weights / embed stay f32.
    return {
        "embed": dense(keys[0], (V, D)),                              # f32
        "ln_f": jnp.ones((1, D), jnp.float32),
        "lm_head": dense(keys[1], (D, V)).astype(jnp.bfloat16),
        "ln1": jnp.stack(ln1),                                        # [L,1,D]
        "ln2": jnp.stack(ln2),                                        # [L,1,D]
        "wqkv": jnp.stack(wqkv).astype(jnp.bfloat16),                 # [L,D,3D]
        "wo": jnp.stack(wo).astype(jnp.bfloat16),                     # [L,D,D]
        "wgu": jnp.stack(wgu).astype(jnp.bfloat16),                   # [L,D,2F]
        "wd": jnp.stack(wd).astype(jnp.bfloat16),                     # [L,F,D]
    }


def deepseek_wrapper_forward(params, input_ids, max_new_tokens=200):
    """Equivalent of DeepSeekWrapper.forward: returns logits [B, S, V]."""
    del max_new_tokens  # see TODO(synk) at top of file
    b, seq = input_ids.shape
    cos, sin = make_rope(seq, DH)
    x0 = params["embed"][input_ids].reshape(b * seq, D)   # embedding gather
    logits = fused_forward(
        x0, cos, sin,
        params["ln1"], params["wqkv"], params["wo"],
        params["ln2"], params["wgu"], params["wd"],
        params["ln_f"], params["lm_head"],
    )
    return logits.reshape(b, seq, V)


if __name__ == "__main__":
    key = jax.random.PRNGKey(0)
    pkey, ikey = jax.random.split(key)
    params = init_params(pkey)
    input_ids = jax.random.randint(ikey, (B, S), minval=0, maxval=V, dtype=jnp.int32)

    logits = deepseek_wrapper_forward(params, input_ids, max_new_tokens=200)
    logits = jax.block_until_ready(logits)

    assert logits.shape == (B, S, V), logits.shape
    assert logits.dtype == jnp.float32
    assert bool(jnp.all(jnp.isfinite(logits)))
    print("KERNEL_OK")
</pallas_src>

<mosaic_0001>
module attributes {stable_mosaic.version = 11 : i64} {
  func.func @_fused_forward_kernel(%arg0: memref<16x128xf32, #tpu.memory_space<vmem>>, %arg1: memref<8x32xf32, #tpu.memory_space<vmem>>, %arg2: memref<8x32xf32, #tpu.memory_space<vmem>>, %arg3: memref<2x1x128xf32, #tpu.memory_space<vmem>>, %arg4: memref<2x128x384xbf16, #tpu.memory_space<vmem>>, %arg5: memref<2x128x128xbf16, #tpu.memory_space<vmem>>, %arg6: memref<2x1x128xf32, #tpu.memory_space<vmem>>, %arg7: memref<2x128x512xbf16, #tpu.memory_space<vmem>>, %arg8: memref<2x256x128xbf16, #tpu.memory_space<vmem>>, %arg9: memref<1x128xf32, #tpu.memory_space<vmem>>, %arg10: memref<128x256xbf16, #tpu.memory_space<vmem>>, %arg11: memref<16x256xf32, #tpu.memory_space<vmem>>) attributes {dimension_semantics = [], scalar_prefetch = 0 : i64, scratch_operands = 0 : i64, tpu.core_type = #tpu.core_type<tc>} {
    %c0 = arith.constant 0 : index
    %c0_0 = arith.constant 0 : index
    %0 = vector.load %arg0[%c0, %c0_0] : memref<16x128xf32, #tpu.memory_space<vmem>>, vector<16x128xf32>
    %c0_1 = arith.constant 0 : index
    %c0_2 = arith.constant 0 : index
    %1 = vector.load %arg1[%c0_1, %c0_2] : memref<8x32xf32, #tpu.memory_space<vmem>>, vector<8x32xf32>
    %c0_3 = arith.constant 0 : index
    %c0_4 = arith.constant 0 : index
    %2 = vector.load %arg2[%c0_3, %c0_4] : memref<8x32xf32, #tpu.memory_space<vmem>>, vector<8x32xf32>
    %3 = tpu.iota {dimensions = array<i32: 0>} : vector<8x8xi32>
    %4 = tpu.iota {dimensions = array<i32: 1>} : vector<8x8xi32>
    %5 = arith.cmpi sle, %4, %3 : vector<8x8xi32>
    %c0_5 = arith.constant 0 : index
    %c0_6 = arith.constant 0 : index
    %c0_7 = arith.constant 0 : index
    %6 = vector.load %arg3[%c0_5, %c0_6, %c0_7] : memref<2x1x128xf32, #tpu.memory_space<vmem>>, vector<1x1x128xf32>
    %7 = vector.shape_cast %6 : vector<1x1x128xf32> to vector<1x128xf32>
    %c0_8 = arith.constant 0 : index
    %c0_9 = arith.constant 0 : index
    %c0_10 = arith.constant 0 : index
    %8 = vector.load %arg4[%c0_8, %c0_9, %c0_10] : memref<2x128x384xbf16, #tpu.memory_space<vmem>>, vector<1x128x384xbf16>
    %9 = vector.shape_cast %8 : vector<1x128x384xbf16> to vector<128x384xbf16>
    %c0_11 = arith.constant 0 : index
    %c0_12 = arith.constant 0 : index
    %c0_13 = arith.constant 0 : index
    %10 = vector.load %arg5[%c0_11, %c0_12, %c0_13] : memref<2x128x128xbf16, #tpu.memory_space<vmem>>, vector<1x128x128xbf16>
    %11 = vector.shape_cast %10 : vector<1x128x128xbf16> to vector<128x128xbf16>
    %c0_14 = arith.constant 0 : index
    %c0_15 = arith.constant 0 : index
    %c0_16 = arith.constant 0 : index
    %12 = vector.load %arg6[%c0_14, %c0_15, %c0_16] : memref<2x1x128xf32, #tpu.memory_space<vmem>>, vector<1x1x128xf32>
    %13 = vector.shape_cast %12 : vector<1x1x128xf32> to vector<1x128xf32>
    %c0_17 = arith.constant 0 : index
    %c0_18 = arith.constant 0 : index
    %c0_19 = arith.constant 0 : index
    %14 = vector.load %arg7[%c0_17, %c0_18, %c0_19] : memref<2x128x512xbf16, #tpu.memory_space<vmem>>, vector<1x128x512xbf16>
    %15 = vector.shape_cast %14 : vector<1x128x512xbf16> to vector<128x512xbf16>
    %c0_20 = arith.constant 0 : index
    %c0_21 = arith.constant 0 : index
    %c0_22 = arith.constant 0 : index
    %16 = vector.load %arg8[%c0_20, %c0_21, %c0_22] : memref<2x256x128xbf16, #tpu.memory_space<vmem>>, vector<1x256x128xbf16>
    %17 = vector.shape_cast %16 : vector<1x256x128xbf16> to vector<256x128xbf16>
    %18 = arith.mulf %0, %0 : vector<16x128xf32>
    %cst = arith.constant dense<0.000000e+00> : vector<16xf32>
    %19 = vector.multi_reduction <add>, %18, %cst [1] : vector<16x128xf32> to vector<16xf32>
    %20 = vector.shape_cast %19 : vector<16xf32> to vector<16x1xf32>
    %cst_23 = arith.constant 1.280000e+02 : f32
    %21 = vector.broadcast %cst_23 : f32 to vector<16x1xf32>
    %22 = arith.divf %20, %21 : vector<16x1xf32>
    %cst_24 = arith.constant 9.99999997E-7 : f32
    %23 = vector.broadcast %cst_24 : f32 to vector<16x1xf32>
    %24 = arith.addf %22, %23 : vector<16x1xf32>
    %25 = math.rsqrt %24 : vector<16x1xf32>
    %26 = vector.broadcast %25 : vector<16x1xf32> to vector<16x128xf32>
    %27 = arith.mulf %0, %26 : vector<16x128xf32>
    %28 = vector.broadcast %7 : vector<1x128xf32> to vector<16x128xf32>
    %29 = arith.mulf %27, %28 : vector<16x128xf32>
    %30 = arith.truncf %29 : vector<16x128xf32> to vector<16x128xbf16>
    %cst_25 = arith.constant dense<0.000000e+00> : vector<16x384xf32>
    %31 = tpu.matmul %30, %9, %cst_25 {dimension_numbers = #tpu.dot_dimension_numbers<[1], [0], [0], [1], [0, 0, 1, 1], [], []>} : vector<16x128xbf16>, vector<128x384xbf16>, vector<16x384xf32> -> vector<16x384xf32>
    %32 = vector.extract_strided_slice %31 {offsets = [0, 0], sizes = [16, 128], strides = [1, 1]} : vector<16x384xf32> to vector<16x128xf32>
    %33 = vector.extract_strided_slice %31 {offsets = [0, 128], sizes = [16, 128], strides = [1, 1]} : vector<16x384xf32> to vector<16x128xf32>
    %34 = vector.extract_strided_slice %31 {offsets = [0, 256], sizes = [16, 128], strides = [1, 1]} : vector<16x384xf32> to vector<16x128xf32>
    %35 = vector.extract_strided_slice %32 {offsets = [0, 0], sizes = [8, 32], strides = [1, 1]} : vector<16x128xf32> to vector<8x32xf32>
    %36 = vector.extract_strided_slice %35 {offsets = [0, 0], sizes = [8, 16], strides = [1, 1]} : vector<8x32xf32> to vector<8x16xf32>
    %37 = vector.extract_strided_slice %35 {offsets = [0, 16], sizes = [8, 16], strides = [1, 1]} : vector<8x32xf32> to vector<8x16xf32>
    %cst_26 = arith.constant 0.000000e+00 : f32
    %38 = vector.broadcast %cst_26 : f32 to vector<8x16xf32>
    %39 = arith.subf %38, %37 : vector<8x16xf32>
    %40 = tpu.concatenate %39, %36 in 1 : vector<8x16xf32>, vector<8x16xf32> -> vector<8x32xf32>
    %41 = arith.mulf %35, %1 : vector<8x32xf32>
    %42 = arith.mulf %40, %2 : vector<8x32xf32>
    %43 = arith.addf %41, %42 : vector<8x32xf32>
    %cst_27 = arith.constant 0.176776692 : f32
    %44 = vector.broadcast %cst_27 : f32 to vector<8x32xf32>
    %45 = arith.mulf %43, %44 : vector<8x32xf32>
    %46 = vector.extract_strided_slice %33 {offsets = [0, 0], sizes = [8, 32], strides = [1, 1]} : vector<16x128xf32> to vector<8x32xf32>
    %47 = vector.extract_strided_slice %46 {offsets = [0, 0], sizes = [8, 16], strides = [1, 1]} : vector<8x32xf32> to vector<8x16xf32>
    %48 = vector.extract_strided_slice %46 {offsets = [0, 16], sizes = [8, 16], strides = [1, 1]} : vector<8x32xf32> to vector<8x16xf32>
    %cst_28 = arith.constant 0.000000e+00 : f32
    %49 = vector.broadcast %cst_28 : f32 to vector<8x16xf32>
    %50 = arith.subf %49, %48 : vector<8x16xf32>
    %51 = tpu.concatenate %50, %47 in 1 : vector<8x16xf32>, vector<8x16xf32> -> vector<8x32xf32>
    %52 = arith.mulf %46, %1 : vector<8x32xf32>
    %53 = arith.mulf %51, %2 : vector<8x32xf32>
    %54 = arith.addf %52, %53 : vector<8x32xf32>
    %55 = vector.extract_strided_slice %34 {offsets = [0, 0], sizes = [8, 32], strides = [1, 1]} : vector<16x128xf32> to vector<8x32xf32>
    %56 = arith.truncf %45 : vector<8x32xf32> to vector<8x32xbf16>
    %57 = arith.truncf %54 : vector<8x32xf32> to vector<8x32xbf16>
    %cst_29 = arith.constant dense<0.000000e+00> : vector<8x8xf32>
    %58 = tpu.matmul %56, %57, %cst_29 {dimension_numbers = #tpu.dot_dimension_numbers<[1], [1], [0], [0], [0, 0, 1, 0], [], []>} : vector<8x32xbf16>, vector<8x32xbf16>, vector<8x8xf32> -> vector<8x8xf32>
    %cst_30 = arith.constant -1.000000e+30 : f32
    %59 = vector.broadcast %cst_30 : f32 to vector<8x8xf32>
    %60 = arith.select %5, %58, %59 : vector<8x8xi1>, vector<8x8xf32>
    %cst_31 = arith.constant dense<0xFF800000> : vector<8xf32>
    %61 = vector.multi_reduction <maximumf>, %60, %cst_31 [1] : vector<8x8xf32> to vector<8xf32>
    %62 = vector.shape_cast %61 : vector<8xf32> to vector<8x1xf32>
    %63 = vector.broadcast %62 : vector<8x1xf32> to vector<8x8xf32>
    %64 = arith.subf %60, %63 : vector<8x8xf32>
    %65 = math.exp %64 : vector<8x8xf32>
    %cst_32 = arith.constant dense<0.000000e+00> : vector<8xf32>
    %66 = vector.multi_reduction <add>, %65, %cst_32 [1] : vector<8x8xf32> to vector<8xf32>
    %67 = vector.shape_cast %66 : vector<8xf32> to vector<8x1xf32>
    %68 = tpu.reciprocal %67 {approx = true} : vector<8x1xf32> -> vector<8x1xf32>
    %69 = vector.broadcast %68 : vector<8x1xf32> to vector<8x8xf32>
    %70 = arith.mulf %65, %69 : vector<8x8xf32>
    %71 = arith.truncf %70 : vector<8x8xf32> to vector<8x8xbf16>
    %72 = arith.truncf %55 : vector<8x32xf32> to vector<8x32xbf16>
    %cst_33 = arith.constant dense<0.000000e+00> : vector<8x32xf32>
    %73 = tpu.matmul %71, %72, %cst_33 {dimension_numbers = #tpu.dot_dimension_numbers<[1], [0], [0], [1], [0, 0, 1, 1], [], []>} : vector<8x8xbf16>, vector<8x32xbf16>, vector<8x32xf32> -> vector<8x32xf32>
    %74 = vector.extract_strided_slice %32 {offsets = [0, 32], sizes = [8, 32], strides = [1, 1]} : vector<16x128xf32> to vector<8x32xf32>
    %75 = vector.extract_strided_slice %74 {offsets = [0, 0], sizes = [8, 16], strides = [1, 1]} : vector<8x32xf32> to vector<8x16xf32>
    %76 = vector.extract_strided_slice %74 {offsets = [0, 16], sizes = [8, 16], strides = [1, 1]} : vector<8x32xf32> to vector<8x16xf32>
    %cst_34 = arith.constant 0.000000e+00 : f32
    %77 = vector.broadcast %cst_34 : f32 to vector<8x16xf32>
    %78 = arith.subf %77, %76 : vector<8x16xf32>
    %79 = tpu.concatenate %78, %75 in 1 : vector<8x16xf32>, vector<8x16xf32> -> vector<8x32xf32>
    %80 = arith.mulf %74, %1 : vector<8x32xf32>
    %81 = arith.mulf %79, %2 : vector<8x32xf32>
    %82 = arith.addf %80, %81 : vector<8x32xf32>
    %cst_35 = arith.constant 0.176776692 : f32
    %83 = vector.broadcast %cst_35 : f32 to vector<8x32xf32>
    %84 = arith.mulf %82, %83 : vector<8x32xf32>
    %85 = vector.extract_strided_slice %33 {offsets = [0, 32], sizes = [8, 32], strides = [1, 1]} : vector<16x128xf32> to vector<8x32xf32>
    %86 = vector.extract_strided_slice %85 {offsets = [0, 0], sizes = [8, 16], strides = [1, 1]} : vector<8x32xf32> to vector<8x16xf32>
    %87 = vector.extract_strided_slice %85 {offsets = [0, 16], sizes = [8, 16], strides = [1, 1]} : vector<8x32xf32> to vector<8x16xf32>
    %cst_36 = arith.constant 0.000000e+00 : f32
    %88 = vector.broadcast %cst_36 : f32 to vector<8x16xf32>
    %89 = arith.subf %88, %87 : vector<8x16xf32>
    %90 = tpu.concatenate %89, %86 in 1 : vector<8x16xf32>, vector<8x16xf32> -> vector<8x32xf32>
    %91 = arith.mulf %85, %1 : vector<8x32xf32>
    %92 = arith.mulf %90, %2 : vector<8x32xf32>
    %93 = arith.addf %91, %92 : vector<8x32xf32>
    %94 = vector.extract_strided_slice %34 {offsets = [0, 32], sizes = [8, 32], strides = [1, 1]} : vector<16x128xf32> to vector<8x32xf32>
    %95 = arith.truncf %84 : vector<8x32xf32> to vector<8x32xbf16>
    %96 = arith.truncf %93 : vector<8x32xf32> to vector<8x32xbf16>
    %cst_37 = arith.constant dense<0.000000e+00> : vector<8x8xf32>
    %97 = tpu.matmul %95, %96, %cst_37 {dimension_numbers = #tpu.dot_dimension_numbers<[1], [1], [0], [0], [0, 0, 1, 0], [], []>} : vector<8x32xbf16>, vector<8x32xbf16>, vector<8x8xf32> -> vector<8x8xf32>
    %cst_38 = arith.constant -1.000000e+30 : f32
    %98 = vector.broadcast %cst_38 : f32 to vector<8x8xf32>
    %99 = arith.select %5, %97, %98 : vector<8x8xi1>, vector<8x8xf32>
    %cst_39 = arith.constant dense<0xFF800000> : vector<8xf32>
    %100 = vector.multi_reduction <maximumf>, %99, %cst_39 [1] : vector<8x8xf32> to vector<8xf32>
    %101 = vector.shape_cast %100 : vector<8xf32> to vector<8x1xf32>
    %102 = vector.broadcast %101 : vector<8x1xf32> to vector<8x8xf32>
    %103 = arith.subf %99, %102 : vector<8x8xf32>
    %104 = math.exp %103 : vector<8x8xf32>
    %cst_40 = arith.constant dense<0.000000e+00> : vector<8xf32>
    %105 = vector.multi_reduction <add>, %104, %cst_40 [1] : vector<8x8xf32> to vector<8xf32>
    %106 = vector.shape_cast %105 : vector<8xf32> to vector<8x1xf32>
    %107 = tpu.reciprocal %106 {approx = true} : vector<8x1xf32> -> vector<8x1xf32>
    %108 = vector.broadcast %107 : vector<8x1xf32> to vector<8x8xf32>
    %109 = arith.mulf %104, %108 : vector<8x8xf32>
    %110 = arith.truncf %109 : vector<8x8xf32> to vector<8x8xbf16>
    %111 = arith.truncf %94 : vector<8x32xf32> to vector<8x32xbf16>
    %cst_41 = arith.constant dense<0.000000e+00> : vector<8x32xf32>
    %112 = tpu.matmul %110, %111, %cst_41 {dimension_numbers = #tpu.dot_dimension_numbers<[1], [0], [0], [1], [0, 0, 1, 1], [], []>} : vector<8x8xbf16>, vector<8x32xbf16>, vector<8x32xf32> -> vector<8x32xf32>
    %113 = vector.extract_strided_slice %32 {offsets = [0, 64], sizes = [8, 32], strides = [1, 1]} : vector<16x128xf32> to vector<8x32xf32>
    %114 = vector.extract_strided_slice %113 {offsets = [0, 0], sizes = [8, 16], strides = [1, 1]} : vector<8x32xf32> to vector<8x16xf32>
    %115 = vector.extract_strided_slice %113 {offsets = [0, 16], sizes = [8, 16], strides = [1, 1]} : vector<8x32xf32> to vector<8x16xf32>
    %cst_42 = arith.constant 0.000000e+00 : f32
    %116 = vector.broadcast %cst_42 : f32 to vector<8x16xf32>
    %117 = arith.subf %116, %115 : vector<8x16xf32>
    %118 = tpu.concatenate %117, %114 in 1 : vector<8x16xf32>, vector<8x16xf32> -> vector<8x32xf32>
    %119 = arith.mulf %113, %1 : vector<8x32xf32>
    %120 = arith.mulf %118, %2 : vector<8x32xf32>
    %121 = arith.addf %119, %120 : vector<8x32xf32>
    %cst_43 = arith.constant 0.176776692 : f32
    %122 = vector.broadcast %cst_43 : f32 to vector<8x32xf32>
    %123 = arith.mulf %121, %122 : vector<8x32xf32>
    %124 = vector.extract_strided_slice %33 {offsets = [0, 64], sizes = [8, 32], strides = [1, 1]} : vector<16x128xf32> to vector<8x32xf32>
    %125 = vector.extract_strided_slice %124 {offsets = [0, 0], sizes = [8, 16], strides = [1, 1]} : vector<8x32xf32> to vector<8x16xf32>
    %126 = vector.extract_strided_slice %124 {offsets = [0, 16], sizes = [8, 16], strides = [1, 1]} : vector<8x32xf32> to vector<8x16xf32>
    %cst_44 = arith.constant 0.000000e+00 : f32
    %127 = vector.broadcast %cst_44 : f32 to vector<8x16xf32>
    %128 = arith.subf %127, %126 : vector<8x16xf32>
    %129 = tpu.concatenate %128, %125 in 1 : vector<8x16xf32>, vector<8x16xf32> -> vector<8x32xf32>
    %130 = arith.mulf %124, %1 : vector<8x32xf32>
    %131 = arith.mulf %129, %2 : vector<8x32xf32>
    %132 = arith.addf %130, %131 : vector<8x32xf32>
    %133 = vector.extract_strided_slice %34 {offsets = [0, 64], sizes = [8, 32], strides = [1, 1]} : vector<16x128xf32> to vector<8x32xf32>
    %134 = arith.truncf %123 : vector<8x32xf32> to vector<8x32xbf16>
    %135 = arith.truncf %132 : vector<8x32xf32> to vector<8x32xbf16>
    %cst_45 = arith.constant dense<0.000000e+00> : vector<8x8xf32>
    %136 = tpu.matmul %134, %135, %cst_45 {dimension_numbers = #tpu.dot_dimension_numbers<[1], [1], [0], [0], [0, 0, 1, 0], [], []>} : vector<8x32xbf16>, vector<8x32xbf16>, vector<8x8xf32> -> vector<8x8xf32>
    %cst_46 = arith.constant -1.000000e+30 : f32
    %137 = vector.broadcast %cst_46 : f32 to vector<8x8xf32>
    %138 = arith.select %5, %136, %137 : vector<8x8xi1>, vector<8x8xf32>
    %cst_47 = arith.constant dense<0xFF800000> : vector<8xf32>
    %139 = vector.multi_reduction <maximumf>, %138, %cst_47 [1] : vector<8x8xf32> to vector<8xf32>
    %140 = vector.shape_cast %139 : vector<8xf32> to vector<8x1xf32>
    %141 = vector.broadcast %140 : vector<8x1xf32> to vector<8x8xf32>
    %142 = arith.subf %138, %141 : vector<8x8xf32>
    %143 = math.exp %142 : vector<8x8xf32>
    %cst_48 = arith.constant dense<0.000000e+00> : vector<8xf32>
    %144 = vector.multi_reduction <add>, %143, %cst_48 [1] : vector<8x8xf32> to vector<8xf32>
    %145 = vector.shape_cast %144 : vector<8xf32> to vector<8x1xf32>
    %146 = tpu.reciprocal %145 {approx = true} : vector<8x1xf32> -> vector<8x1xf32>
    %147 = vector.broadcast %146 : vector<8x1xf32> to vector<8x8xf32>
    %148 = arith.mulf %143, %147 : vector<8x8xf32>
    %149 = arith.truncf %148 : vector<8x8xf32> to vector<8x8xbf16>
    %150 = arith.truncf %133 : vector<8x32xf32> to vector<8x32xbf16>
    %cst_49 = arith.constant dense<0.000000e+00> : vector<8x32xf32>
    %151 = tpu.matmul %149, %150, %cst_49 {dimension_numbers = #tpu.dot_dimension_numbers<[1], [0], [0], [1], [0, 0, 1, 1], [], []>} : vector<8x8xbf16>, vector<8x32xbf16>, vector<8x32xf32> -> vector<8x32xf32>
    %152 = vector.extract_strided_slice %32 {offsets = [0, 96], sizes = [8, 32], strides = [1, 1]} : vector<16x128xf32> to vector<8x32xf32>
    %153 = vector.extract_strided_slice %152 {offsets = [0, 0], sizes = [8, 16], strides = [1, 1]} : vector<8x32xf32> to vector<8x16xf32>
    %154 = vector.extract_strided_slice %152 {offsets = [0, 16], sizes = [8, 16], strides = [1, 1]} : vector<8x32xf32> to vector<8x16xf32>
    %cst_50 = arith.constant 0.000000e+00 : f32
    %155 = vector.broadcast %cst_50 : f32 to vector<8x16xf32>
    %156 = arith.subf %155, %154 : vector<8x16xf32>
    %157 = tpu.concatenate %156, %153 in 1 : vector<8x16xf32>, vector<8x16xf32> -> vector<8x32xf32>
    %158 = arith.mulf %152, %1 : vector<8x32xf32>
    %159 = arith.mulf %157, %2 : vector<8x32xf32>
    %160 = arith.addf %158, %159 : vector<8x32xf32>
    %cst_51 = arith.constant 0.176776692 : f32
    %161 = vector.broadcast %cst_51 : f32 to vector<8x32xf32>
    %162 = arith.mulf %160, %161 : vector<8x32xf32>
    %163 = vector.extract_strided_slice %33 {offsets = [0, 96], sizes = [8, 32], strides = [1, 1]} : vector<16x128xf32> to vector<8x32xf32>
    %164 = vector.extract_strided_slice %163 {offsets = [0, 0], sizes = [8, 16], strides = [1, 1]} : vector<8x32xf32> to vector<8x16xf32>
    %165 = vector.extract_strided_slice %163 {offsets = [0, 16], sizes = [8, 16], strides = [1, 1]} : vector<8x32xf32> to vector<8x16xf32>
    %cst_52 = arith.constant 0.000000e+00 : f32
    %166 = vector.broadcast %cst_52 : f32 to vector<8x16xf32>
    %167 = arith.subf %166, %165 : vector<8x16xf32>
    %168 = tpu.concatenate %167, %164 in 1 : vector<8x16xf32>, vector<8x16xf32> -> vector<8x32xf32>
    %169 = arith.mulf %163, %1 : vector<8x32xf32>
    %170 = arith.mulf %168, %2 : vector<8x32xf32>
    %171 = arith.addf %169, %170 : vector<8x32xf32>
    %172 = vector.extract_strided_slice %34 {offsets = [0, 96], sizes = [8, 32], strides = [1, 1]} : vector<16x128xf32> to vector<8x32xf32>
    %173 = arith.truncf %162 : vector<8x32xf32> to vector<8x32xbf16>
    %174 = arith.truncf %171 : vector<8x32xf32> to vector<8x32xbf16>
    %cst_53 = arith.constant dense<0.000000e+00> : vector<8x8xf32>
    %175 = tpu.matmul %173, %174, %cst_53 {dimension_numbers = #tpu.dot_dimension_numbers<[1], [1], [0], [0], [0, 0, 1, 0], [], []>} : vector<8x32xbf16>, vector<8x32xbf16>, vector<8x8xf32> -> vector<8x8xf32>
    %cst_54 = arith.constant -1.000000e+30 : f32
    %176 = vector.broadcast %cst_54 : f32 to vector<8x8xf32>
    %177 = arith.select %5, %175, %176 : vector<8x8xi1>, vector<8x8xf32>
    %cst_55 = arith.constant dense<0xFF800000> : vector<8xf32>
    %178 = vector.multi_reduction <maximumf>, %177, %cst_55 [1] : vector<8x8xf32> to vector<8xf32>
    %179 = vector.shape_cast %178 : vector<8xf32> to vector<8x1xf32>
    %180 = vector.broadcast %179 : vector<8x1xf32> to vector<8x8xf32>
    %181 = arith.subf %177, %180 : vector<8x8xf32>
    %182 = math.exp %181 : vector<8x8xf32>
    %cst_56 = arith.constant dense<0.000000e+00> : vector<8xf32>
    %183 = vector.multi_reduction <add>, %182, %cst_56 [1] : vector<8x8xf32> to vector<8xf32>
    %184 = vector.shape_cast %183 : vector<8xf32> to vector<8x1xf32>
    %185 = tpu.reciprocal %184 {approx = true} : vector<8x1xf32> -> vector<8x1xf32>
    %186 = vector.broadcast %185 : vector<8x1xf32> to vector<8x8xf32>
    %187 = arith.mulf %182, %186 : vector<8x8xf32>
    %188 = arith.truncf %187 : vector<8x8xf32> to vector<8x8xbf16>
    %189 = arith.truncf %172 : vector<8x32xf32> to vector<8x32xbf16>
    %cst_57 = arith.constant dense<0.000000e+00> : vector<8x32xf32>
    %190 = tpu.matmul %188, %189, %cst_57 {dimension_numbers = #tpu.dot_dimension_numbers<[1], [0], [0], [1], [0, 0, 1, 1], [], []>} : vector<8x8xbf16>, vector<8x32xbf16>, vector<8x32xf32> -> vector<8x32xf32>
    %191 = tpu.concatenate %73, %112, %151, %190 in 1 : vector<8x32xf32>, vector<8x32xf32>, vector<8x32xf32>, vector<8x32xf32> -> vector<8x128xf32>
    %192 = vector.extract_strided_slice %32 {offsets = [8, 0], sizes = [8, 32], strides = [1, 1]} : vector<16x128xf32> to vector<8x32xf32>
    %193 = vector.extract_strided_slice %192 {offsets = [0, 0], sizes = [8, 16], strides = [1, 1]} : vector<8x32xf32> to vector<8x16xf32>
    %194 = vector.extract_strided_slice %192 {offsets = [0, 16], sizes = [8, 16], strides = [1, 1]} : vector<8x32xf32> to vector<8x16xf32>
    %cst_58 = arith.constant 0.000000e+00 : f32
    %195 = vector.broadcast %cst_58 : f32 to vector<8x16xf32>
    %196 = arith.subf %195, %194 : vector<8x16xf32>
    %197 = tpu.concatenate %196, %193 in 1 : vector<8x16xf32>, vector<8x16xf32> -> vector<8x32xf32>
    %198 = arith.mulf %192, %1 : vector<8x32xf32>
    %199 = arith.mulf %197, %2 : vector<8x32xf32>
    %200 = arith.addf %198, %199 : vector<8x32xf32>
    %cst_59 = arith.constant 0.176776692 : f32
    %201 = vector.broadcast %cst_59 : f32 to vector<8x32xf32>
    %202 = arith.mulf %200, %201 : vector<8x32xf32>
    %203 = vector.extract_strided_slice %33 {offsets = [8, 0], sizes = [8, 32], strides = [1, 1]} : vector<16x128xf32> to vector<8x32xf32>
    %204 = vector.extract_strided_slice %203 {offsets = [0, 0], sizes = [8, 16], strides = [1, 1]} : vector<8x32xf32> to vector<8x16xf32>
    %205 = vector.extract_strided_slice %203 {offsets = [0, 16], sizes = [8, 16], strides = [1, 1]} : vector<8x32xf32> to vector<8x16xf32>
    %cst_60 = arith.constant 0.000000e+00 : f32
    %206 = vector.broadcast %cst_60 : f32 to vector<8x16xf32>
    %207 = arith.subf %206, %205 : vector<8x16xf32>
    %208 = tpu.concatenate %207, %204 in 1 : vector<8x16xf32>, vector<8x16xf32> -> vector<8x32xf32>
    %209 = arith.mulf %203, %1 : vector<8x32xf32>
    %210 = arith.mulf %208, %2 : vector<8x32xf32>
    %211 = arith.addf %209, %210 : vector<8x32xf32>
    %212 = vector.extract_strided_slice %34 {offsets = [8, 0], sizes = [8, 32], strides = [1, 1]} : vector<16x128xf32> to vector<8x32xf32>
    %213 = arith.truncf %202 : vector<8x32xf32> to vector<8x32xbf16>
    %214 = arith.truncf %211 : vector<8x32xf32> to vector<8x32xbf16>
    %cst_61 = arith.constant dense<0.000000e+00> : vector<8x8xf32>
    %215 = tpu.matmul %213, %214, %cst_61 {dimension_numbers = #tpu.dot_dimension_numbers<[1], [1], [0], [0], [0, 0, 1, 0], [], []>} : vector<8x32xbf16>, vector<8x32xbf16>, vector<8x8xf32> -> vector<8x8xf32>
    %cst_62 = arith.constant -1.000000e+30 : f32
    %216 = vector.broadcast %cst_62 : f32 to vector<8x8xf32>
    %217 = arith.select %5, %215, %216 : vector<8x8xi1>, vector<8x8xf32>
    %cst_63 = arith.constant dense<0xFF800000> : vector<8xf32>
    %218 = vector.multi_reduction <maximumf>, %217, %cst_63 [1] : vector<8x8xf32> to vector<8xf32>
    %219 = vector.shape_cast %218 : vector<8xf32> to vector<8x1xf32>
    %220 = vector.broadcast %219 : vector<8x1xf32> to vector<8x8xf32>
    %221 = arith.subf %217, %220 : vector<8x8xf32>
    %222 = math.exp %221 : vector<8x8xf32>
    %cst_64 = arith.constant dense<0.000000e+00> : vector<8xf32>
    %223 = vector.multi_reduction <add>, %222, %cst_64 [1] : vector<8x8xf32> to vector<8xf32>
    %224 = vector.shape_cast %223 : vector<8xf32> to vector<8x1xf32>
    %225 = tpu.reciprocal %224 {approx = true} : vector<8x1xf32> -> vector<8x1xf32>
    %226 = vector.broadcast %225 : vector<8x1xf32> to vector<8x8xf32>
    %227 = arith.mulf %222, %226 : vector<8x8xf32>
    %228 = arith.truncf %227 : vector<8x8xf32> to vector<8x8xbf16>
    %229 = arith.truncf %212 : vector<8x32xf32> to vector<8x32xbf16>
    %cst_65 = arith.constant dense<0.000000e+00> : vector<8x32xf32>
    %230 = tpu.matmul %228, %229, %cst_65 {dimension_numbers = #tpu.dot_dimension_numbers<[1], [0], [0], [1], [0, 0, 1, 1], [], []>} : vector<8x8xbf16>, vector<8x32xbf16>, vector<8x32xf32> -> vector<8x32xf32>
    %231 = vector.extract_strided_slice %32 {offsets = [8, 32], sizes = [8, 32], strides = [1, 1]} : vector<16x128xf32> to vector<8x32xf32>
    %232 = vector.extract_strided_slice %231 {offsets = [0, 0], sizes = [8, 16], strides = [1, 1]} : vector<8x32xf32> to vector<8x16xf32>
    %233 = vector.extract_strided_slice %231 {offsets = [0, 16], sizes = [8, 16], strides = [1, 1]} : vector<8x32xf32> to vector<8x16xf32>
    %cst_66 = arith.constant 0.000000e+00 : f32
    %234 = vector.broadcast %cst_66 : f32 to vector<8x16xf32>
    %235 = arith.subf %234, %233 : vector<8x16xf32>
    %236 = tpu.concatenate %235, %232 in 1 : vector<8x16xf32>, vector<8x16xf32> -> vector<8x32xf32>
    %237 = arith.mulf %231, %1 : vector<8x32xf32>
    %238 = arith.mulf %236, %2 : vector<8x32xf32>
    %239 = arith.addf %237, %238 : vector<8x32xf32>
    %cst_67 = arith.constant 0.176776692 : f32
    %240 = vector.broadcast %cst_67 : f32 to vector<8x32xf32>
    %241 = arith.mulf %239, %240 : vector<8x32xf32>
    %242 = vector.extract_strided_slice %33 {offsets = [8, 32], sizes = [8, 32], strides = [1, 1]} : vector<16x128xf32> to vector<8x32xf32>
    %243 = vector.extract_strided_slice %242 {offsets = [0, 0], sizes = [8, 16], strides = [1, 1]} : vector<8x32xf32> to vector<8x16xf32>
    %244 = vector.extract_strided_slice %242 {offsets = [0, 16], sizes = [8, 16], strides = [1, 1]} : vector<8x32xf32> to vector<8x16xf32>
    %cst_68 = arith.constant 0.000000e+00 : f32
    %245 = vector.broadcast %cst_68 : f32 to vector<8x16xf32>
    %246 = arith.subf %245, %244 : vector<8x16xf32>
    %247 = tpu.concatenate %246, %243 in 1 : vector<8x16xf32>, vector<8x16xf32> -> vector<8x32xf32>
    %248 = arith.mulf %242, %1 : vector<8x32xf32>
    %249 = arith.mulf %247, %2 : vector<8x32xf32>
    %250 = arith.addf %248, %249 : vector<8x32xf32>
    %251 = vector.extract_strided_slice %34 {offsets = [8, 32], sizes = [8, 32], strides = [1, 1]} : vector<16x128xf32> to vector<8x32xf32>
    %252 = arith.truncf %241 : vector<8x32xf32> to vector<8x32xbf16>
    %253 = arith.truncf %250 : vector<8x32xf32> to vector<8x32xbf16>
    %cst_69 = arith.constant dense<0.000000e+00> : vector<8x8xf32>
    %254 = tpu.matmul %252, %253, %cst_69 {dimension_numbers = #tpu.dot_dimension_numbers<[1], [1], [0], [0], [0, 0, 1, 0], [], []>} : vector<8x32xbf16>, vector<8x32xbf16>, vector<8x8xf32> -> vector<8x8xf32>
    %cst_70 = arith.constant -1.000000e+30 : f32
    %255 = vector.broadcast %cst_70 : f32 to vector<8x8xf32>
    %256 = arith.select %5, %254, %255 : vector<8x8xi1>, vector<8x8xf32>
    %cst_71 = arith.constant dense<0xFF800000> : vector<8xf32>
    %257 = vector.multi_reduction <maximumf>, %256, %cst_71 [1] : vector<8x8xf32> to vector<8xf32>
    %258 = vector.shape_cast %257 : vector<8xf32> to vector<8x1xf32>
    %259 = vector.broadcast %258 : vector<8x1xf32> to vector<8x8xf32>
    %260 = arith.subf %256, %259 : vector<8x8xf32>
    %261 = math.exp %260 : vector<8x8xf32>
    %cst_72 = arith.constant dense<0.000000e+00> : vector<8xf32>
    %262 = vector.multi_reduction <add>, %261, %cst_72 [1] : vector<8x8xf32> to vector<8xf32>
    %263 = vector.shape_cast %262 : vector<8xf32> to vector<8x1xf32>
    %264 = tpu.reciprocal %263 {approx = true} : vector<8x1xf32> -> vector<8x1xf32>
    %265 = vector.broadcast %264 : vector<8x1xf32> to vector<8x8xf32>
    %266 = arith.mulf %261, %265 : vector<8x8xf32>
    %267 = arith.truncf %266 : vector<8x8xf32> to vector<8x8xbf16>
    %268 = arith.truncf %251 : vector<8x32xf32> to vector<8x32xbf16>
    %cst_73 = arith.constant dense<0.000000e+00> : vector<8x32xf32>
    %269 = tpu.matmul %267, %268, %cst_73 {dimension_numbers = #tpu.dot_dimension_numbers<[1], [0], [0], [1], [0, 0, 1, 1], [], []>} : vector<8x8xbf16>, vector<8x32xbf16>, vector<8x32xf32> -> vector<8x32xf32>
    %270 = vector.extract_strided_slice %32 {offsets = [8, 64], sizes = [8, 32], strides = [1, 1]} : vector<16x128xf32> to vector<8x32xf32>
    %271 = vector.extract_strided_slice %270 {offsets = [0, 0], sizes = [8, 16], strides = [1, 1]} : vector<8x32xf32> to vector<8x16xf32>
    %272 = vector.extract_strided_slice %270 {offsets = [0, 16], sizes = [8, 16], strides = [1, 1]} : vector<8x32xf32> to vector<8x16xf32>
    %cst_74 = arith.constant 0.000000e+00 : f32
    %273 = vector.broadcast %cst_74 : f32 to vector<8x16xf32>
    %274 = arith.subf %273, %272 : vector<8x16xf32>
    %275 = tpu.concatenate %274, %271 in 1 : vector<8x16xf32>, vector<8x16xf32> -> vector<8x32xf32>
    %276 = arith.mulf %270, %1 : vector<8x32xf32>
    %277 = arith.mulf %275, %2 : vector<8x32xf32>
    %278 = arith.addf %276, %277 : vector<8x32xf32>
    %cst_75 = arith.constant 0.176776692 : f32
    %279 = vector.broadcast %cst_75 : f32 to vector<8x32xf32>
    %280 = arith.mulf %278, %279 : vector<8x32xf32>
    %281 = vector.extract_strided_slice %33 {offsets = [8, 64], sizes = [8, 32], strides = [1, 1]} : vector<16x128xf32> to vector<8x32xf32>
    %282 = vector.extract_strided_slice %281 {offsets = [0, 0], sizes = [8, 16], strides = [1, 1]} : vector<8x32xf32> to vector<8x16xf32>
    %283 = vector.extract_strided_slice %281 {offsets = [0, 16], sizes = [8, 16], strides = [1, 1]} : vector<8x32xf32> to vector<8x16xf32>
    %cst_76 = arith.constant 0.000000e+00 : f32
    %284 = vector.broadcast %cst_76 : f32 to vector<8x16xf32>
    %285 = arith.subf %284, %283 : vector<8x16xf32>
    %286 = tpu.concatenate %285, %282 in 1 : vector<8x16xf32>, vector<8x16xf32> -> vector<8x32xf32>
    %287 = arith.mulf %281, %1 : vector<8x32xf32>
    %288 = arith.mulf %286, %2 : vector<8x32xf32>
    %289 = arith.addf %287, %288 : vector<8x32xf32>
    %290 = vector.extract_strided_slice %34 {offsets = [8, 64], sizes = [8, 32], strides = [1, 1]} : vector<16x128xf32> to vector<8x32xf32>
    %291 = arith.truncf %280 : vector<8x32xf32> to vector<8x32xbf16>
    %292 = arith.truncf %289 : vector<8x32xf32> to vector<8x32xbf16>
    %cst_77 = arith.constant dense<0.000000e+00> : vector<8x8xf32>
    %293 = tpu.matmul %291, %292, %cst_77 {dimension_numbers = #tpu.dot_dimension_numbers<[1], [1], [0], [0], [0, 0, 1, 0], [], []>} : vector<8x32xbf16>, vector<8x32xbf16>, vector<8x8xf32> -> vector<8x8xf32>
    %cst_78 = arith.constant -1.000000e+30 : f32
    %294 = vector.broadcast %cst_78 : f32 to vector<8x8xf32>
    %295 = arith.select %5, %293, %294 : vector<8x8xi1>, vector<8x8xf32>
    %cst_79 = arith.constant dense<0xFF800000> : vector<8xf32>
    %296 = vector.multi_reduction <maximumf>, %295, %cst_79 [1] : vector<8x8xf32> to vector<8xf32>
    %297 = vector.shape_cast %296 : vector<8xf32> to vector<8x1xf32>
    %298 = vector.broadcast %297 : vector<8x1xf32> to vector<8x8xf32>
    %299 = arith.subf %295, %298 : vector<8x8xf32>
    %300 = math.exp %299 : vector<8x8xf32>
    %cst_80 = arith.constant dense<0.000000e+00> : vector<8xf32>
    %301 = vector.multi_reduction <add>, %300, %cst_80 [1] : vector<8x8xf32> to vector<8xf32>
    %302 = vector.shape_cast %301 : vector<8xf32> to vector<8x1xf32>
    %303 = tpu.reciprocal %302 {approx = true} : vector<8x1xf32> -> vector<8x1xf32>
    %304 = vector.broadcast %303 : vector<8x1xf32> to vector<8x8xf32>
    %305 = arith.mulf %300, %304 : vector<8x8xf32>
    %306 = arith.truncf %305 : vector<8x8xf32> to vector<8x8xbf16>
    %307 = arith.truncf %290 : vector<8x32xf32> to vector<8x32xbf16>
    %cst_81 = arith.constant dense<0.000000e+00> : vector<8x32xf32>
    %308 = tpu.matmul %306, %307, %cst_81 {dimension_numbers = #tpu.dot_dimension_numbers<[1], [0], [0], [1], [0, 0, 1, 1], [], []>} : vector<8x8xbf16>, vector<8x32xbf16>, vector<8x32xf32> -> vector<8x32xf32>
    %309 = vector.extract_strided_slice %32 {offsets = [8, 96], sizes = [8, 32], strides = [1, 1]} : vector<16x128xf32> to vector<8x32xf32>
    %310 = vector.extract_strided_slice %309 {offsets = [0, 0], sizes = [8, 16], strides = [1, 1]} : vector<8x32xf32> to vector<8x16xf32>
    %311 = vector.extract_strided_slice %309 {offsets = [0, 16], sizes = [8, 16], strides = [1, 1]} : vector<8x32xf32> to vector<8x16xf32>
    %cst_82 = arith.constant 0.000000e+00 : f32
    %312 = vector.broadcast %cst_82 : f32 to vector<8x16xf32>
    %313 = arith.subf %312, %311 : vector<8x16xf32>
    %314 = tpu.concatenate %313, %310 in 1 : vector<8x16xf32>, vector<8x16xf32> -> vector<8x32xf32>
    %315 = arith.mulf %309, %1 : vector<8x32xf32>
    %316 = arith.mulf %314, %2 : vector<8x32xf32>
    %317 = arith.addf %315, %316 : vector<8x32xf32>
    %cst_83 = arith.constant 0.176776692 : f32
    %318 = vector.broadcast %cst_83 : f32 to vector<8x32xf32>
    %319 = arith.mulf %317, %318 : vector<8x32xf32>
    %320 = vector.extract_strided_slice %33 {offsets = [8, 96], sizes = [8, 32], strides = [1, 1]} : vector<16x128xf32> to vector<8x32xf32>
    %321 = vector.extract_strided_slice %320 {offsets = [0, 0], sizes = [8, 16], strides = [1, 1]} : vector<8x32xf32> to vector<8x16xf32>
    %322 = vector.extract_strided_slice %320 {offsets = [0, 16], sizes = [8, 16], strides = [1, 1]} : vector<8x32xf32> to vector<8x16xf32>
    %cst_84 = arith.constant 0.000000e+00 : f32
    %323 = vector.broadcast %cst_84 : f32 to vector<8x16xf32>
    %324 = arith.subf %323, %322 : vector<8x16xf32>
    %325 = tpu.concatenate %324, %321 in 1 : vector<8x16xf32>, vector<8x16xf32> -> vector<8x32xf32>
    %326 = arith.mulf %320, %1 : vector<8x32xf32>
    %327 = arith.mulf %325, %2 : vector<8x32xf32>
    %328 = arith.addf %326, %327 : vector<8x32xf32>
    %329 = vector.extract_strided_slice %34 {offsets = [8, 96], sizes = [8, 32], strides = [1, 1]} : vector<16x128xf32> to vector<8x32xf32>
    %330 = arith.truncf %319 : vector<8x32xf32> to vector<8x32xbf16>
    %331 = arith.truncf %328 : vector<8x32xf32> to vector<8x32xbf16>
    %cst_85 = arith.constant dense<0.000000e+00> : vector<8x8xf32>
    %332 = tpu.matmul %330, %331, %cst_85 {dimension_numbers = #tpu.dot_dimension_numbers<[1], [1], [0], [0], [0, 0, 1, 0], [], []>} : vector<8x32xbf16>, vector<8x32xbf16>, vector<8x8xf32> -> vector<8x8xf32>
    %cst_86 = arith.constant -1.000000e+30 : f32
    %333 = vector.broadcast %cst_86 : f32 to vector<8x8xf32>
    %334 = arith.select %5, %332, %333 : vector<8x8xi1>, vector<8x8xf32>
    %cst_87 = arith.constant dense<0xFF800000> : vector<8xf32>
    %335 = vector.multi_reduction <maximumf>, %334, %cst_87 [1] : vector<8x8xf32> to vector<8xf32>
    %336 = vector.shape_cast %335 : vector<8xf32> to vector<8x1xf32>
    %337 = vector.broadcast %336 : vector<8x1xf32> to vector<8x8xf32>
    %338 = arith.subf %334, %337 : vector<8x8xf32>
    %339 = math.exp %338 : vector<8x8xf32>
    %cst_88 = arith.constant dense<0.000000e+00> : vector<8xf32>
    %340 = vector.multi_reduction <add>, %339, %cst_88 [1] : vector<8x8xf32> to vector<8xf32>
    %341 = vector.shape_cast %340 : vector<8xf32> to vector<8x1xf32>
    %342 = tpu.reciprocal %341 {approx = true} : vector<8x1xf32> -> vector<8x1xf32>
    %343 = vector.broadcast %342 : vector<8x1xf32> to vector<8x8xf32>
    %344 = arith.mulf %339, %343 : vector<8x8xf32>
    %345 = arith.truncf %344 : vector<8x8xf32> to vector<8x8xbf16>
    %346 = arith.truncf %329 : vector<8x32xf32> to vector<8x32xbf16>
    %cst_89 = arith.constant dense<0.000000e+00> : vector<8x32xf32>
    %347 = tpu.matmul %345, %346, %cst_89 {dimension_numbers = #tpu.dot_dimension_numbers<[1], [0], [0], [1], [0, 0, 1, 1], [], []>} : vector<8x8xbf16>, vector<8x32xbf16>, vector<8x32xf32> -> vector<8x32xf32>
    %348 = tpu.concatenate %230, %269, %308, %347 in 1 : vector<8x32xf32>, vector<8x32xf32>, vector<8x32xf32>, vector<8x32xf32> -> vector<8x128xf32>
    %349 = tpu.concatenate %191, %348 in 0 : vector<8x128xf32>, vector<8x128xf32> -> vector<16x128xf32>
    %350 = arith.truncf %349 : vector<16x128xf32> to vector<16x128xbf16>
    %cst_90 = arith.constant dense<0.000000e+00> : vector<16x128xf32>
    %351 = tpu.matmul %350, %11, %cst_90 {dimension_numbers = #tpu.dot_dimension_numbers<[1], [0], [0], [1], [0, 0, 1, 1], [], []>} : vector<16x128xbf16>, vector<128x128xbf16>, vector<16x128xf32> -> vector<16x128xf32>
    %352 = arith.addf %0, %351 : vector<16x128xf32>
    %353 = arith.mulf %352, %352 : vector<16x128xf32>
    %cst_91 = arith.constant dense<0.000000e+00> : vector<16xf32>
    %354 = vector.multi_reduction <add>, %353, %cst_91 [1] : vector<16x128xf32> to vector<16xf32>
    %355 = vector.shape_cast %354 : vector<16xf32> to vector<16x1xf32>
    %cst_92 = arith.constant 1.280000e+02 : f32
    %356 = vector.broadcast %cst_92 : f32 to vector<16x1xf32>
    %357 = arith.divf %355, %356 : vector<16x1xf32>
    %cst_93 = arith.constant 9.99999997E-7 : f32
    %358 = vector.broadcast %cst_93 : f32 to vector<16x1xf32>
    %359 = arith.addf %357, %358 : vector<16x1xf32>
    %360 = math.rsqrt %359 : vector<16x1xf32>
    %361 = vector.broadcast %360 : vector<16x1xf32> to vector<16x128xf32>
    %362 = arith.mulf %352, %361 : vector<16x128xf32>
    %363 = vector.broadcast %13 : vector<1x128xf32> to vector<16x128xf32>
    %364 = arith.mulf %362, %363 : vector<16x128xf32>
    %365 = arith.truncf %364 : vector<16x128xf32> to vector<16x128xbf16>
    %cst_94 = arith.constant dense<0.000000e+00> : vector<16x512xf32>
    %366 = tpu.matmul %365, %15, %cst_94 {dimension_numbers = #tpu.dot_dimension_numbers<[1], [0], [0], [1], [0, 0, 1, 1], [], []>} : vector<16x128xbf16>, vector<128x512xbf16>, vector<16x512xf32> -> vector<16x512xf32>
    %367 = vector.extract_strided_slice %366 {offsets = [0, 0], sizes = [16, 256], strides = [1, 1]} : vector<16x512xf32> to vector<16x256xf32>
    %368 = vector.extract_strided_slice %366 {offsets = [0, 256], sizes = [16, 256], strides = [1, 1]} : vector<16x512xf32> to vector<16x256xf32>
    %369 = arith.negf %367 : vector<16x256xf32>
    %370 = math.exp %369 : vector<16x256xf32>
    %cst_95 = arith.constant 1.000000e+00 : f32
    %371 = vector.broadcast %cst_95 : f32 to vector<16x256xf32>
    %372 = arith.addf %371, %370 : vector<16x256xf32>
    %373 = arith.divf %371, %372 : vector<16x256xf32>
    %374 = arith.mulf %367, %373 : vector<16x256xf32>
    %375 = arith.mulf %374, %368 : vector<16x256xf32>
    %376 = arith.truncf %375 : vector<16x256xf32> to vector<16x256xbf16>
    %cst_96 = arith.constant dense<0.000000e+00> : vector<16x128xf32>
    %377 = tpu.matmul %376, %17, %cst_96 {dimension_numbers = #tpu.dot_dimension_numbers<[1], [0], [0], [1], [0, 0, 1, 1], [], []>} : vector<16x256xbf16>, vector<256x128xbf16>, vector<16x128xf32> -> vector<16x128xf32>
    %378 = arith.addf %352, %377 : vector<16x128xf32>
    %c1 = arith.constant 1 : index
    %c0_97 = arith.constant 0 : index
    %c0_98 = arith.constant 0 : index
    %379 = vector.load %arg3[%c1, %c0_97, %c0_98] : memref<2x1x128xf32, #tpu.memory_space<vmem>>, vector<1x1x128xf32>
    %380 = vector.shape_cast %379 : vector<1x1x128xf32> to vector<1x128xf32>
    %c1_99 = arith.constant 1 : index
    %c0_100 = arith.constant 0 : index
    %c0_101 = arith.constant 0 : index
    %381 = vector.load %arg4[%c1_99, %c0_100, %c0_101] : memref<2x128x384xbf16, #tpu.memory_space<vmem>>, vector<1x128x384xbf16>
    %382 = vector.shape_cast %381 : vector<1x128x384xbf16> to vector<128x384xbf16>
    %c1_102 = arith.constant 1 : index
    %c0_103 = arith.constant 0 : index
    %c0_104 = arith.constant 0 : index
    %383 = vector.load %arg5[%c1_102, %c0_103, %c0_104] : memref<2x128x128xbf16, #tpu.memory_space<vmem>>, vector<1x128x128xbf16>
    %384 = vector.shape_cast %383 : vector<1x128x128xbf16> to vector<128x128xbf16>
    %c1_105 = arith.constant 1 : index
    %c0_106 = arith.constant 0 : index
    %c0_107 = arith.constant 0 : index
    %385 = vector.load %arg6[%c1_105, %c0_106, %c0_107] : memref<2x1x128xf32, #tpu.memory_space<vmem>>, vector<1x1x128xf32>
    %386 = vector.shape_cast %385 : vector<1x1x128xf32> to vector<1x128xf32>
    %c1_108 = arith.constant 1 : index
    %c0_109 = arith.constant 0 : index
    %c0_110 = arith.constant 0 : index
    %387 = vector.load %arg7[%c1_108, %c0_109, %c0_110] : memref<2x128x512xbf16, #tpu.memory_space<vmem>>, vector<1x128x512xbf16>
    %388 = vector.shape_cast %387 : vector<1x128x512xbf16> to vector<128x512xbf16>
    %c1_111 = arith.constant 1 : index
    %c0_112 = arith.constant 0 : index
    %c0_113 = arith.constant 0 : index
    %389 = vector.load %arg8[%c1_111, %c0_112, %c0_113] : memref<2x256x128xbf16, #tpu.memory_space<vmem>>, vector<1x256x128xbf16>
    %390 = vector.shape_cast %389 : vector<1x256x128xbf16> to vector<256x128xbf16>
    %391 = arith.mulf %378, %378 : vector<16x128xf32>
    %cst_114 = arith.constant dense<0.000000e+00> : vector<16xf32>
    %392 = vector.multi_reduction <add>, %391, %cst_114 [1] : vector<16x128xf32> to vector<16xf32>
    %393 = vector.shape_cast %392 : vector<16xf32> to vector<16x1xf32>
    %cst_115 = arith.constant 1.280000e+02 : f32
    %394 = vector.broadcast %cst_115 : f32 to vector<16x1xf32>
    %395 = arith.divf %393, %394 : vector<16x1xf32>
    %cst_116 = arith.constant 9.99999997E-7 : f32
    %396 = vector.broadcast %cst_116 : f32 to vector<16x1xf32>
    %397 = arith.addf %395, %396 : vector<16x1xf32>
    %398 = math.rsqrt %397 : vector<16x1xf32>
    %399 = vector.broadcast %398 : vector<16x1xf32> to vector<16x128xf32>
    %400 = arith.mulf %378, %399 : vector<16x128xf32>
    %401 = vector.broadcast %380 : vector<1x128xf32> to vector<16x128xf32>
    %402 = arith.mulf %400, %401 : vector<16x128xf32>
    %403 = arith.truncf %402 : vector<16x128xf32> to vector<16x128xbf16>
    %cst_117 = arith.constant dense<0.000000e+00> : vector<16x384xf32>
    %404 = tpu.matmul %403, %382, %cst_117 {dimension_numbers = #tpu.dot_dimension_numbers<[1], [0], [0], [1], [0, 0, 1, 1], [], []>} : vector<16x128xbf16>, vector<128x384xbf16>, vector<16x384xf32> -> vector<16x384xf32>
    %405 = vector.extract_strided_slice %404 {offsets = [0, 0], sizes = [16, 128], strides = [1, 1]} : vector<16x384xf32> to vector<16x128xf32>
    %406 = vector.extract_strided_slice %404 {offsets = [0, 128], sizes = [16, 128], strides = [1, 1]} : vector<16x384xf32> to vector<16x128xf32>
    %407 = vector.extract_strided_slice %404 {offsets = [0, 256], sizes = [16, 128], strides = [1, 1]} : vector<16x384xf32> to vector<16x128xf32>
    %408 = vector.extract_strided_slice %405 {offsets = [0, 0], sizes = [8, 32], strides = [1, 1]} : vector<16x128xf32> to vector<8x32xf32>
    %409 = vector.extract_strided_slice %408 {offsets = [0, 0], sizes = [8, 16], strides = [1, 1]} : vector<8x32xf32> to vector<8x16xf32>
    %410 = vector.extract_strided_slice %408 {offsets = [0, 16], sizes = [8, 16], strides = [1, 1]} : vector<8x32xf32> to vector<8x16xf32>
    %cst_118 = arith.constant 0.000000e+00 : f32
    %411 = vector.broadcast %cst_118 : f32 to vector<8x16xf32>
    %412 = arith.subf %411, %410 : vector<8x16xf32>
    %413 = tpu.concatenate %412, %409 in 1 : vector<8x16xf32>, vector<8x16xf32> -> vector<8x32xf32>
    %414 = arith.mulf %408, %1 : vector<8x32xf32>
    %415 = arith.mulf %413, %2 : vector<8x32xf32>
    %416 = arith.addf %414, %415 : vector<8x32xf32>
    %cst_119 = arith.constant 0.176776692 : f32
    %417 = vector.broadcast %cst_119 : f32 to vector<8x32xf32>
    %418 = arith.mulf %416, %417 : vector<8x32xf32>
    %419 = vector.extract_strided_slice %406 {offsets = [0, 0], sizes = [8, 32], strides = [1, 1]} : vector<16x128xf32> to vector<8x32xf32>
    %420 = vector.extract_strided_slice %419 {offsets = [0, 0], sizes = [8, 16], strides = [1, 1]} : vector<8x32xf32> to vector<8x16xf32>
    %421 = vector.extract_strided_slice %419 {offsets = [0, 16], sizes = [8, 16], strides = [1, 1]} : vector<8x32xf32> to vector<8x16xf32>
    %cst_120 = arith.constant 0.000000e+00 : f32
    %422 = vector.broadcast %cst_120 : f32 to vector<8x16xf32>
    %423 = arith.subf %422, %421 : vector<8x16xf32>
    %424 = tpu.concatenate %423, %420 in 1 : vector<8x16xf32>, vector<8x16xf32> -> vector<8x32xf32>
    %425 = arith.mulf %419, %1 : vector<8x32xf32>
    %426 = arith.mulf %424, %2 : vector<8x32xf32>
    %427 = arith.addf %425, %426 : vector<8x32xf32>
    %428 = vector.extract_strided_slice %407 {offsets = [0, 0], sizes = [8, 32], strides = [1, 1]} : vector<16x128xf32> to vector<8x32xf32>
    %429 = arith.truncf %418 : vector<8x32xf32> to vector<8x32xbf16>
    %430 = arith.truncf %427 : vector<8x32xf32> to vector<8x32xbf16>
    %cst_121 = arith.constant dense<0.000000e+00> : vector<8x8xf32>
    %431 = tpu.matmul %429, %430, %cst_121 {dimension_numbers = #tpu.dot_dimension_numbers<[1], [1], [0], [0], [0, 0, 1, 0], [], []>} : vector<8x32xbf16>, vector<8x32xbf16>, vector<8x8xf32> -> vector<8x8xf32>
    %cst_122 = arith.constant -1.000000e+30 : f32
    %432 = vector.broadcast %cst_122 : f32 to vector<8x8xf32>
    %433 = arith.select %5, %431, %432 : vector<8x8xi1>, vector<8x8xf32>
    %cst_123 = arith.constant dense<0xFF800000> : vector<8xf32>
    %434 = vector.multi_reduction <maximumf>, %433, %cst_123 [1] : vector<8x8xf32> to vector<8xf32>
    %435 = vector.shape_cast %434 : vector<8xf32> to vector<8x1xf32>
    %436 = vector.broadcast %435 : vector<8x1xf32> to vector<8x8xf32>
    %437 = arith.subf %433, %436 : vector<8x8xf32>
    %438 = math.exp %437 : vector<8x8xf32>
    %cst_124 = arith.constant dense<0.000000e+00> : vector<8xf32>
    %439 = vector.multi_reduction <add>, %438, %cst_124 [1] : vector<8x8xf32> to vector<8xf32>
    %440 = vector.shape_cast %439 : vector<8xf32> to vector<8x1xf32>
    %441 = tpu.reciprocal %440 {approx = true} : vector<8x1xf32> -> vector<8x1xf32>
    %442 = vector.broadcast %441 : vector<8x1xf32> to vector<8x8xf32>
    %443 = arith.mulf %438, %442 : vector<8x8xf32>
    %444 = arith.truncf %443 : vector<8x8xf32> to vector<8x8xbf16>
    %445 = arith.truncf %428 : vector<8x32xf32> to vector<8x32xbf16>
    %cst_125 = arith.constant dense<0.000000e+00> : vector<8x32xf32>
    %446 = tpu.matmul %444, %445, %cst_125 {dimension_numbers = #tpu.dot_dimension_numbers<[1], [0], [0], [1], [0, 0, 1, 1], [], []>} : vector<8x8xbf16>, vector<8x32xbf16>, vector<8x32xf32> -> vector<8x32xf32>
    %447 = vector.extract_strided_slice %405 {offsets = [0, 32], sizes = [8, 32], strides = [1, 1]} : vector<16x128xf32> to vector<8x32xf32>
    %448 = vector.extract_strided_slice %447 {offsets = [0, 0], sizes = [8, 16], strides = [1, 1]} : vector<8x32xf32> to vector<8x16xf32>
    %449 = vector.extract_strided_slice %447 {offsets = [0, 16], sizes = [8, 16], strides = [1, 1]} : vector<8x32xf32> to vector<8x16xf32>
    %cst_126 = arith.constant 0.000000e+00 : f32
    %450 = vector.broadcast %cst_126 : f32 to vector<8x16xf32>
    %451 = arith.subf %450, %449 : vector<8x16xf32>
    %452 = tpu.concatenate %451, %448 in 1 : vector<8x16xf32>, vector<8x16xf32> -> vector<8x32xf32>
    %453 = arith.mulf %447, %1 : vector<8x32xf32>
    %454 = arith.mulf %452, %2 : vector<8x32xf32>
    %455 = arith.addf %453, %454 : vector<8x32xf32>
    %cst_127 = arith.constant 0.176776692 : f32
    %456 = vector.broadcast %cst_127 : f32 to vector<8x32xf32>
    %457 = arith.mulf %455, %456 : vector<8x32xf32>
    %458 = vector.extract_strided_slice %406 {offsets = [0, 32], sizes = [8, 32], strides = [1, 1]} : vector<16x128xf32> to vector<8x32xf32>
    %459 = vector.extract_strided_slice %458 {offsets = [0, 0], sizes = [8, 16], strides = [1, 1]} : vector<8x32xf32> to vector<8x16xf32>
    %460 = vector.extract_strided_slice %458 {offsets = [0, 16], sizes = [8, 16], strides = [1, 1]} : vector<8x32xf32> to vector<8x16xf32>
    %cst_128 = arith.constant 0.000000e+00 : f32
    %461 = vector.broadcast %cst_128 : f32 to vector<8x16xf32>
    %462 = arith.subf %461, %460 : vector<8x16xf32>
    %463 = tpu.concatenate %462, %459 in 1 : vector<8x16xf32>, vector<8x16xf32> -> vector<8x32xf32>
    %464 = arith.mulf %458, %1 : vector<8x32xf32>
    %465 = arith.mulf %463, %2 : vector<8x32xf32>
    %466 = arith.addf %464, %465 : vector<8x32xf32>
    %467 = vector.extract_strided_slice %407 {offsets = [0, 32], sizes = [8, 32], strides = [1, 1]} : vector<16x128xf32> to vector<8x32xf32>
    %468 = arith.truncf %457 : vector<8x32xf32> to vector<8x32xbf16>
    %469 = arith.truncf %466 : vector<8x32xf32> to vector<8x32xbf16>
    %cst_129 = arith.constant dense<0.000000e+00> : vector<8x8xf32>
    %470 = tpu.matmul %468, %469, %cst_129 {dimension_numbers = #tpu.dot_dimension_numbers<[1], [1], [0], [0], [0, 0, 1, 0], [], []>} : vector<8x32xbf16>, vector<8x32xbf16>, vector<8x8xf32> -> vector<8x8xf32>
    %cst_130 = arith.constant -1.000000e+30 : f32
    %471 = vector.broadcast %cst_130 : f32 to vector<8x8xf32>
    %472 = arith.select %5, %470, %471 : vector<8x8xi1>, vector<8x8xf32>
    %cst_131 = arith.constant dense<0xFF800000> : vector<8xf32>
    %473 = vector.multi_reduction <maximumf>, %472, %cst_131 [1] : vector<8x8xf32> to vector<8xf32>
    %474 = vector.shape_cast %473 : vector<8xf32> to vector<8x1xf32>
    %475 = vector.broadcast %474 : vector<8x1xf32> to vector<8x8xf32>
    %476 = arith.subf %472, %475 : vector<8x8xf32>
    %477 = math.exp %476 : vector<8x8xf32>
    %cst_132 = arith.constant dense<0.000000e+00> : vector<8xf32>
    %478 = vector.multi_reduction <add>, %477, %cst_132 [1] : vector<8x8xf32> to vector<8xf32>
    %479 = vector.shape_cast %478 : vector<8xf32> to vector<8x1xf32>
    %480 = tpu.reciprocal %479 {approx = true} : vector<8x1xf32> -> vector<8x1xf32>
    %481 = vector.broadcast %480 : vector<8x1xf32> to vector<8x8xf32>
    %482 = arith.mulf %477, %481 : vector<8x8xf32>
    %483 = arith.truncf %482 : vector<8x8xf32> to vector<8x8xbf16>
    %484 = arith.truncf %467 : vector<8x32xf32> to vector<8x32xbf16>
    %cst_133 = arith.constant dense<0.000000e+00> : vector<8x32xf32>
    %485 = tpu.matmul %483, %484, %cst_133 {dimension_numbers = #tpu.dot_dimension_numbers<[1], [0], [0], [1], [0, 0, 1, 1], [], []>} : vector<8x8xbf16>, vector<8x32xbf16>, vector<8x32xf32> -> vector<8x32xf32>
    %486 = vector.extract_strided_slice %405 {offsets = [0, 64], sizes = [8, 32], strides = [1, 1]} : vector<16x128xf32> to vector<8x32xf32>
    %487 = vector.extract_strided_slice %486 {offsets = [0, 0], sizes = [8, 16], strides = [1, 1]} : vector<8x32xf32> to vector<8x16xf32>
    %488 = vector.extract_strided_slice %486 {offsets = [0, 16], sizes = [8, 16], strides = [1, 1]} : vector<8x32xf32> to vector<8x16xf32>
    %cst_134 = arith.constant 0.000000e+00 : f32
    %489 = vector.broadcast %cst_134 : f32 to vector<8x16xf32>
    %490 = arith.subf %489, %488 : vector<8x16xf32>
    %491 = tpu.concatenate %490, %487 in 1 : vector<8x16xf32>, vector<8x16xf32> -> vector<8x32xf32>
    %492 = arith.mulf %486, %1 : vector<8x32xf32>
    %493 = arith.mulf %491, %2 : vector<8x32xf32>
    %494 = arith.addf %492, %493 : vector<8x32xf32>
    %cst_135 = arith.constant 0.176776692 : f32
    %495 = vector.broadcast %cst_135 : f32 to vector<8x32xf32>
    %496 = arith.mulf %494, %495 : vector<8x32xf32>
    %497 = vector.extract_strided_slice %406 {offsets = [0, 64], sizes = [8, 32], strides = [1, 1]} : vector<16x128xf32> to vector<8x32xf32>
    %498 = vector.extract_strided_slice %497 {offsets = [0, 0], sizes = [8, 16], strides = [1, 1]} : vector<8x32xf32> to vector<8x16xf32>
    %499 = vector.extract_strided_slice %497 {offsets = [0, 16], sizes = [8, 16], strides = [1, 1]} : vector<8x32xf32> to vector<8x16xf32>
    %cst_136 = arith.constant 0.000000e+00 : f32
    %500 = vector.broadcast %cst_136 : f32 to vector<8x16xf32>
    %501 = arith.subf %500, %499 : vector<8x16xf32>
    %502 = tpu.concatenate %501, %498 in 1 : vector<8x16xf32>, vector<8x16xf32> -> vector<8x32xf32>
    %503 = arith.mulf %497, %1 : vector<8x32xf32>
    %504 = arith.mulf %502, %2 : vector<8x32xf32>
    %505 = arith.addf %503, %504 : vector<8x32xf32>
    %506 = vector.extract_strided_slice %407 {offsets = [0, 64], sizes = [8, 32], strides = [1, 1]} : vector<16x128xf32> to vector<8x32xf32>
    %507 = arith.truncf %496 : vector<8x32xf32> to vector<8x32xbf16>
    %508 = arith.truncf %505 : vector<8x32xf32> to vector<8x32xbf16>
    %cst_137 = arith.constant dense<0.000000e+00> : vector<8x8xf32>
    %509 = tpu.matmul %507, %508, %cst_137 {dimension_numbers = #tpu.dot_dimension_numbers<[1], [1], [0], [0], [0, 0, 1, 0], [], []>} : vector<8x32xbf16>, vector<8x32xbf16>, vector<8x8xf32> -> vector<8x8xf32>
    %cst_138 = arith.constant -1.000000e+30 : f32
    %510 = vector.broadcast %cst_138 : f32 to vector<8x8xf32>
    %511 = arith.select %5, %509, %510 : vector<8x8xi1>, vector<8x8xf32>
    %cst_139 = arith.constant dense<0xFF800000> : vector<8xf32>
    %512 = vector.multi_reduction <maximumf>, %511, %cst_139 [1] : vector<8x8xf32> to vector<8xf32>
    %513 = vector.shape_cast %512 : vector<8xf32> to vector<8x1xf32>
    %514 = vector.broadcast %513 : vector<8x1xf32> to vector<8x8xf32>
    %515 = arith.subf %511, %514 : vector<8x8xf32>
    %516 = math.exp %515 : vector<8x8xf32>
    %cst_140 = arith.constant dense<0.000000e+00> : vector<8xf32>
    %517 = vector.multi_reduction <add>, %516, %cst_140 [1] : vector<8x8xf32> to vector<8xf32>
    %518 = vector.shape_cast %517 : vector<8xf32> to vector<8x1xf32>
    %519 = tpu.reciprocal %518 {approx = true} : vector<8x1xf32> -> vector<8x1xf32>
    %520 = vector.broadcast %519 : vector<8x1xf32> to vector<8x8xf32>
    %521 = arith.mulf %516, %520 : vector<8x8xf32>
    %522 = arith.truncf %521 : vector<8x8xf32> to vector<8x8xbf16>
    %523 = arith.truncf %506 : vector<8x32xf32> to vector<8x32xbf16>
    %cst_141 = arith.constant dense<0.000000e+00> : vector<8x32xf32>
    %524 = tpu.matmul %522, %523, %cst_141 {dimension_numbers = #tpu.dot_dimension_numbers<[1], [0], [0], [1], [0, 0, 1, 1], [], []>} : vector<8x8xbf16>, vector<8x32xbf16>, vector<8x32xf32> -> vector<8x32xf32>
    %525 = vector.extract_strided_slice %405 {offsets = [0, 96], sizes = [8, 32], strides = [1, 1]} : vector<16x128xf32> to vector<8x32xf32>
    %526 = vector.extract_strided_slice %525 {offsets = [0, 0], sizes = [8, 16], strides = [1, 1]} : vector<8x32xf32> to vector<8x16xf32>
    %527 = vector.extract_strided_slice %525 {offsets = [0, 16], sizes = [8, 16], strides = [1, 1]} : vector<8x32xf32> to vector<8x16xf32>
    %cst_142 = arith.constant 0.000000e+00 : f32
    %528 = vector.broadcast %cst_142 : f32 to vector<8x16xf32>
    %529 = arith.subf %528, %527 : vector<8x16xf32>
    %530 = tpu.concatenate %529, %526 in 1 : vector<8x16xf32>, vector<8x16xf32> -> vector<8x32xf32>
    %531 = arith.mulf %525, %1 : vector<8x32xf32>
    %532 = arith.mulf %530, %2 : vector<8x32xf32>
    %533 = arith.addf %531, %532 : vector<8x32xf32>
    %cst_143 = arith.constant 0.176776692 : f32
    %534 = vector.broadcast %cst_143 : f32 to vector<8x32xf32>
    %535 = arith.mulf %533, %534 : vector<8x32xf32>
    %536 = vector.extract_strided_slice %406 {offsets = [0, 96], sizes = [8, 32], strides = [1, 1]} : vector<16x128xf32> to vector<8x32xf32>
    %537 = vector.extract_strided_slice %536 {offsets = [0, 0], sizes = [8, 16], strides = [1, 1]} : vector<8x32xf32> to vector<8x16xf32>
    %538 = vector.extract_strided_slice %536 {offsets = [0, 16], sizes = [8, 16], strides = [1, 1]} : vector<8x32xf32> to vector<8x16xf32>
    %cst_144 = arith.constant 0.000000e+00 : f32
    %539 = vector.broadcast %cst_144 : f32 to vector<8x16xf32>
    %540 = arith.subf %539, %538 : vector<8x16xf32>
    %541 = tpu.concatenate %540, %537 in 1 : vector<8x16xf32>, vector<8x16xf32> -> vector<8x32xf32>
    %542 = arith.mulf %536, %1 : vector<8x32xf32>
    %543 = arith.mulf %541, %2 : vector<8x32xf32>
    %544 = arith.addf %542, %543 : vector<8x32xf32>
    %545 = vector.extract_strided_slice %407 {offsets = [0, 96], sizes = [8, 32], strides = [1, 1]} : vector<16x128xf32> to vector<8x32xf32>
    %546 = arith.truncf %535 : vector<8x32xf32> to vector<8x32xbf16>
    %547 = arith.truncf %544 : vector<8x32xf32> to vector<8x32xbf16>
    %cst_145 = arith.constant dense<0.000000e+00> : vector<8x8xf32>
    %548 = tpu.matmul %546, %547, %cst_145 {dimension_numbers = #tpu.dot_dimension_numbers<[1], [1], [0], [0], [0, 0, 1, 0], [], []>} : vector<8x32xbf16>, vector<8x32xbf16>, vector<8x8xf32> -> vector<8x8xf32>
    %cst_146 = arith.constant -1.000000e+30 : f32
    %549 = vector.broadcast %cst_146 : f32 to vector<8x8xf32>
    %550 = arith.select %5, %548, %549 : vector<8x8xi1>, vector<8x8xf32>
    %cst_147 = arith.constant dense<0xFF800000> : vector<8xf32>
    %551 = vector.multi_reduction <maximumf>, %550, %cst_147 [1] : vector<8x8xf32> to vector<8xf32>
    %552 = vector.shape_cast %551 : vector<8xf32> to vector<8x1xf32>
    %553 = vector.broadcast %552 : vector<8x1xf32> to vector<8x8xf32>
    %554 = arith.subf %550, %553 : vector<8x8xf32>
    %555 = math.exp %554 : vector<8x8xf32>
    %cst_148 = arith.constant dense<0.000000e+00> : vector<8xf32>
    %556 = vector.multi_reduction <add>, %555, %cst_148 [1] : vector<8x8xf32> to vector<8xf32>
    %557 = vector.shape_cast %556 : vector<8xf32> to vector<8x1xf32>
    %558 = tpu.reciprocal %557 {approx = true} : vector<8x1xf32> -> vector<8x1xf32>
    %559 = vector.broadcast %558 : vector<8x1xf32> to vector<8x8xf32>
    %560 = arith.mulf %555, %559 : vector<8x8xf32>
    %561 = arith.truncf %560 : vector<8x8xf32> to vector<8x8xbf16>
    %562 = arith.truncf %545 : vector<8x32xf32> to vector<8x32xbf16>
    %cst_149 = arith.constant dense<0.000000e+00> : vector<8x32xf32>
    %563 = tpu.matmul %561, %562, %cst_149 {dimension_numbers = #tpu.dot_dimension_numbers<[1], [0], [0], [1], [0, 0, 1, 1], [], []>} : vector<8x8xbf16>, vector<8x32xbf16>, vector<8x32xf32> -> vector<8x32xf32>
    %564 = tpu.concatenate %446, %485, %524, %563 in 1 : vector<8x32xf32>, vector<8x32xf32>, vector<8x32xf32>, vector<8x32xf32> -> vector<8x128xf32>
    %565 = vector.extract_strided_slice %405 {offsets = [8, 0], sizes = [8, 32], strides = [1, 1]} : vector<16x128xf32> to vector<8x32xf32>
    %566 = vector.extract_strided_slice %565 {offsets = [0, 0], sizes = [8, 16], strides = [1, 1]} : vector<8x32xf32> to vector<8x16xf32>
    %567 = vector.extract_strided_slice %565 {offsets = [0, 16], sizes = [8, 16], strides = [1, 1]} : vector<8x32xf32> to vector<8x16xf32>
    %cst_150 = arith.constant 0.000000e+00 : f32
    %568 = vector.broadcast %cst_150 : f32 to vector<8x16xf32>
    %569 = arith.subf %568, %567 : vector<8x16xf32>
    %570 = tpu.concatenate %569, %566 in 1 : vector<8x16xf32>, vector<8x16xf32> -> vector<8x32xf32>
    %571 = arith.mulf %565, %1 : vector<8x32xf32>
    %572 = arith.mulf %570, %2 : vector<8x32xf32>
    %573 = arith.addf %571, %572 : vector<8x32xf32>
    %cst_151 = arith.constant 0.176776692 : f32
    %574 = vector.broadcast %cst_151 : f32 to vector<8x32xf32>
    %575 = arith.mulf %573, %574 : vector<8x32xf32>
    %576 = vector.extract_strided_slice %406 {offsets = [8, 0], sizes = [8, 32], strides = [1, 1]} : vector<16x128xf32> to vector<8x32xf32>
    %577 = vector.extract_strided_slice %576 {offsets = [0, 0], sizes = [8, 16], strides = [1, 1]} : vector<8x32xf32> to vector<8x16xf32>
    %578 = vector.extract_strided_slice %576 {offsets = [0, 16], sizes = [8, 16], strides = [1, 1]} : vector<8x32xf32> to vector<8x16xf32>
    %cst_152 = arith.constant 0.000000e+00 : f32
    %579 = vector.broadcast %cst_152 : f32 to vector<8x16xf32>
    %580 = arith.subf %579, %578 : vector<8x16xf32>
    %581 = tpu.concatenate %580, %577 in 1 : vector<8x16xf32>, vector<8x16xf32> -> vector<8x32xf32>
    %582 = arith.mulf %576, %1 : vector<8x32xf32>
    %583 = arith.mulf %581, %2 : vector<8x32xf32>
    %584 = arith.addf %582, %583 : vector<8x32xf32>
    %585 = vector.extract_strided_slice %407 {offsets = [8, 0], sizes = [8, 32], strides = [1, 1]} : vector<16x128xf32> to vector<8x32xf32>
    %586 = arith.truncf %575 : vector<8x32xf32> to vector<8x32xbf16>
    %587 = arith.truncf %584 : vector<8x32xf32> to vector<8x32xbf16>
    %cst_153 = arith.constant dense<0.000000e+00> : vector<8x8xf32>
    %588 = tpu.matmul %586, %587, %cst_153 {dimension_numbers = #tpu.dot_dimension_numbers<[1], [1], [0], [0], [0, 0, 1, 0], [], []>} : vector<8x32xbf16>, vector<8x32xbf16>, vector<8x8xf32> -> vector<8x8xf32>
    %cst_154 = arith.constant -1.000000e+30 : f32
    %589 = vector.broadcast %cst_154 : f32 to vector<8x8xf32>
    %590 = arith.select %5, %588, %589 : vector<8x8xi1>, vector<8x8xf32>
    %cst_155 = arith.constant dense<0xFF800000> : vector<8xf32>
    %591 = vector.multi_reduction <maximumf>, %590, %cst_155 [1] : vector<8x8xf32> to vector<8xf32>
    %592 = vector.shape_cast %591 : vector<8xf32> to vector<8x1xf32>
    %593 = vector.broadcast %592 : vector<8x1xf32> to vector<8x8xf32>
    %594 = arith.subf %590, %593 : vector<8x8xf32>
    %595 = math.exp %594 : vector<8x8xf32>
    %cst_156 = arith.constant dense<0.000000e+00> : vector<8xf32>
    %596 = vector.multi_reduction <add>, %595, %cst_156 [1] : vector<8x8xf32> to vector<8xf32>
    %597 = vector.shape_cast %596 : vector<8xf32> to vector<8x1xf32>
    %598 = tpu.reciprocal %597 {approx = true} : vector<8x1xf32> -> vector<8x1xf32>
    %599 = vector.broadcast %598 : vector<8x1xf32> to vector<8x8xf32>
    %600 = arith.mulf %595, %599 : vector<8x8xf32>
    %601 = arith.truncf %600 : vector<8x8xf32> to vector<8x8xbf16>
    %602 = arith.truncf %585 : vector<8x32xf32> to vector<8x32xbf16>
    %cst_157 = arith.constant dense<0.000000e+00> : vector<8x32xf32>
    %603 = tpu.matmul %601, %602, %cst_157 {dimension_numbers = #tpu.dot_dimension_numbers<[1], [0], [0], [1], [0, 0, 1, 1], [], []>} : vector<8x8xbf16>, vector<8x32xbf16>, vector<8x32xf32> -> vector<8x32xf32>
    %604 = vector.extract_strided_slice %405 {offsets = [8, 32], sizes = [8, 32], strides = [1, 1]} : vector<16x128xf32> to vector<8x32xf32>
    %605 = vector.extract_strided_slice %604 {offsets = [0, 0], sizes = [8, 16], strides = [1, 1]} : vector<8x32xf32> to vector<8x16xf32>
    %606 = vector.extract_strided_slice %604 {offsets = [0, 16], sizes = [8, 16], strides = [1, 1]} : vector<8x32xf32> to vector<8x16xf32>
    %cst_158 = arith.constant 0.000000e+00 : f32
    %607 = vector.broadcast %cst_158 : f32 to vector<8x16xf32>
    %608 = arith.subf %607, %606 : vector<8x16xf32>
    %609 = tpu.concatenate %608, %605 in 1 : vector<8x16xf32>, vector<8x16xf32> -> vector<8x32xf32>
    %610 = arith.mulf %604, %1 : vector<8x32xf32>
    %611 = arith.mulf %609, %2 : vector<8x32xf32>
    %612 = arith.addf %610, %611 : vector<8x32xf32>
    %cst_159 = arith.constant 0.176776692 : f32
    %613 = vector.broadcast %cst_159 : f32 to vector<8x32xf32>
    %614 = arith.mulf %612, %613 : vector<8x32xf32>
    %615 = vector.extract_strided_slice %406 {offsets = [8, 32], sizes = [8, 32], strides = [1, 1]} : vector<16x128xf32> to vector<8x32xf32>
    %616 = vector.extract_strided_slice %615 {offsets = [0, 0], sizes = [8, 16], strides = [1, 1]} : vector<8x32xf32> to vector<8x16xf32>
    %617 = vector.extract_strided_slice %615 {offsets = [0, 16], sizes = [8, 16], strides = [1, 1]} : vector<8x32xf32> to vector<8x16xf32>
    %cst_160 = arith.constant 0.000000e+00 : f32
    %618 = vector.broadcast %cst_160 : f32 to vector<8x16xf32>
    %619 = arith.subf %618, %617 : vector<8x16xf32>
    %620 = tpu.concatenate %619, %616 in 1 : vector<8x16xf32>, vector<8x16xf32> -> vector<8x32xf32>
    %621 = arith.mulf %615, %1 : vector<8x32xf32>
    %622 = arith.mulf %620, %2 : vector<8x32xf32>
    %623 = arith.addf %621, %622 : vector<8x32xf32>
    %624 = vector.extract_strided_slice %407 {offsets = [8, 32], sizes = [8, 32], strides = [1, 1]} : vector<16x128xf32> to vector<8x32xf32>
    %625 = arith.truncf %614 : vector<8x32xf32> to vector<8x32xbf16>
    %626 = arith.truncf %623 : vector<8x32xf32> to vector<8x32xbf16>
    %cst_161 = arith.constant dense<0.000000e+00> : vector<8x8xf32>
    %627 = tpu.matmul %625, %626, %cst_161 {dimension_numbers = #tpu.dot_dimension_numbers<[1], [1], [0], [0], [0, 0, 1, 0], [], []>} : vector<8x32xbf16>, vector<8x32xbf16>, vector<8x8xf32> -> vector<8x8xf32>
    %cst_162 = arith.constant -1.000000e+30 : f32
    %628 = vector.broadcast %cst_162 : f32 to vector<8x8xf32>
    %629 = arith.select %5, %627, %628 : vector<8x8xi1>, vector<8x8xf32>
    %cst_163 = arith.constant dense<0xFF800000> : vector<8xf32>
    %630 = vector.multi_reduction <maximumf>, %629, %cst_163 [1] : vector<8x8xf32> to vector<8xf32>
    %631 = vector.shape_cast %630 : vector<8xf32> to vector<8x1xf32>
    %632 = vector.broadcast %631 : vector<8x1xf32> to vector<8x8xf32>
    %633 = arith.subf %629, %632 : vector<8x8xf32>
    %634 = math.exp %633 : vector<8x8xf32>
    %cst_164 = arith.constant dense<0.000000e+00> : vector<8xf32>
    %635 = vector.multi_reduction <add>, %634, %cst_164 [1] : vector<8x8xf32> to vector<8xf32>
    %636 = vector.shape_cast %635 : vector<8xf32> to vector<8x1xf32>
    %637 = tpu.reciprocal %636 {approx = true} : vector<8x1xf32> -> vector<8x1xf32>
    %638 = vector.broadcast %637 : vector<8x1xf32> to vector<8x8xf32>
    %639 = arith.mulf %634, %638 : vector<8x8xf32>
    %640 = arith.truncf %639 : vector<8x8xf32> to vector<8x8xbf16>
    %641 = arith.truncf %624 : vector<8x32xf32> to vector<8x32xbf16>
    %cst_165 = arith.constant dense<0.000000e+00> : vector<8x32xf32>
    %642 = tpu.matmul %640, %641, %cst_165 {dimension_numbers = #tpu.dot_dimension_numbers<[1], [0], [0], [1], [0, 0, 1, 1], [], []>} : vector<8x8xbf16>, vector<8x32xbf16>, vector<8x32xf32> -> vector<8x32xf32>
    %643 = vector.extract_strided_slice %405 {offsets = [8, 64], sizes = [8, 32], strides = [1, 1]} : vector<16x128xf32> to vector<8x32xf32>
    %644 = vector.extract_strided_slice %643 {offsets = [0, 0], sizes = [8, 16], strides = [1, 1]} : vector<8x32xf32> to vector<8x16xf32>
    %645 = vector.extract_strided_slice %643 {offsets = [0, 16], sizes = [8, 16], strides = [1, 1]} : vector<8x32xf32> to vector<8x16xf32>
    %cst_166 = arith.constant 0.000000e+00 : f32
    %646 = vector.broadcast %cst_166 : f32 to vector<8x16xf32>
    %647 = arith.subf %646, %645 : vector<8x16xf32>
    %648 = tpu.concatenate %647, %644 in 1 : vector<8x16xf32>, vector<8x16xf32> -> vector<8x32xf32>
    %649 = arith.mulf %643, %1 : vector<8x32xf32>
    %650 = arith.mulf %648, %2 : vector<8x32xf32>
    %651 = arith.addf %649, %650 : vector<8x32xf32>
    %cst_167 = arith.constant 0.176776692 : f32
    %652 = vector.broadcast %cst_167 : f32 to vector<8x32xf32>
    %653 = arith.mulf %651, %652 : vector<8x32xf32>
    %654 = vector.extract_strided_slice %406 {offsets = [8, 64], sizes = [8, 32], strides = [1, 1]} : vector<16x128xf32> to vector<8x32xf32>
    %655 = vector.extract_strided_slice %654 {offsets = [0, 0], sizes = [8, 16], strides = [1, 1]} : vector<8x32xf32> to vector<8x16xf32>
    %656 = vector.extract_strided_slice %654 {offsets = [0, 16], sizes = [8, 16], strides = [1, 1]} : vector<8x32xf32> to vector<8x16xf32>
    %cst_168 = arith.constant 0.000000e+00 : f32
    %657 = vector.broadcast %cst_168 : f32 to vector<8x16xf32>
    %658 = arith.subf %657, %656 : vector<8x16xf32>
    %659 = tpu.concatenate %658, %655 in 1 : vector<8x16xf32>, vector<8x16xf32> -> vector<8x32xf32>
    %660 = arith.mulf %654, %1 : vector<8x32xf32>
    %661 = arith.mulf %659, %2 : vector<8x32xf32>
    %662 = arith.addf %660, %661 : vector<8x32xf32>
    %663 = vector.extract_strided_slice %407 {offsets = [8, 64], sizes = [8, 32], strides = [1, 1]} : vector<16x128xf32> to vector<8x32xf32>
    %664 = arith.truncf %653 : vector<8x32xf32> to vector<8x32xbf16>
    %665 = arith.truncf %662 : vector<8x32xf32> to vector<8x32xbf16>
    %cst_169 = arith.constant dense<0.000000e+00> : vector<8x8xf32>
    %666 = tpu.matmul %664, %665, %cst_169 {dimension_numbers = #tpu.dot_dimension_numbers<[1], [1], [0], [0], [0, 0, 1, 0], [], []>} : vector<8x32xbf16>, vector<8x32xbf16>, vector<8x8xf32> -> vector<8x8xf32>
    %cst_170 = arith.constant -1.000000e+30 : f32
    %667 = vector.broadcast %cst_170 : f32 to vector<8x8xf32>
    %668 = arith.select %5, %666, %667 : vector<8x8xi1>, vector<8x8xf32>
    %cst_171 = arith.constant dense<0xFF800000> : vector<8xf32>
    %669 = vector.multi_reduction <maximumf>, %668, %cst_171 [1] : vector<8x8xf32> to vector<8xf32>
    %670 = vector.shape_cast %669 : vector<8xf32> to vector<8x1xf32>
    %671 = vector.broadcast %670 : vector<8x1xf32> to vector<8x8xf32>
    %672 = arith.subf %668, %671 : vector<8x8xf32>
    %673 = math.exp %672 : vector<8x8xf32>
    %cst_172 = arith.constant dense<0.000000e+00> : vector<8xf32>
    %674 = vector.multi_reduction <add>, %673, %cst_172 [1] : vector<8x8xf32> to vector<8xf32>
    %675 = vector.shape_cast %674 : vector<8xf32> to vector<8x1xf32>
    %676 = tpu.reciprocal %675 {approx = true} : vector<8x1xf32> -> vector<8x1xf32>
    %677 = vector.broadcast %676 : vector<8x1xf32> to vector<8x8xf32>
    %678 = arith.mulf %673, %677 : vector<8x8xf32>
    %679 = arith.truncf %678 : vector<8x8xf32> to vector<8x8xbf16>
    %680 = arith.truncf %663 : vector<8x32xf32> to vector<8x32xbf16>
    %cst_173 = arith.constant dense<0.000000e+00> : vector<8x32xf32>
    %681 = tpu.matmul %679, %680, %cst_173 {dimension_numbers = #tpu.dot_dimension_numbers<[1], [0], [0], [1], [0, 0, 1, 1], [], []>} : vector<8x8xbf16>, vector<8x32xbf16>, vector<8x32xf32> -> vector<8x32xf32>
    %682 = vector.extract_strided_slice %405 {offsets = [8, 96], sizes = [8, 32], strides = [1, 1]} : vector<16x128xf32> to vector<8x32xf32>
    %683 = vector.extract_strided_slice %682 {offsets = [0, 0], sizes = [8, 16], strides = [1, 1]} : vector<8x32xf32> to vector<8x16xf32>
    %684 = vector.extract_strided_slice %682 {offsets = [0, 16], sizes = [8, 16], strides = [1, 1]} : vector<8x32xf32> to vector<8x16xf32>
    %cst_174 = arith.constant 0.000000e+00 : f32
    %685 = vector.broadcast %cst_174 : f32 to vector<8x16xf32>
    %686 = arith.subf %685, %684 : vector<8x16xf32>
    %687 = tpu.concatenate %686, %683 in 1 : vector<8x16xf32>, vector<8x16xf32> -> vector<8x32xf32>
    %688 = arith.mulf %682, %1 : vector<8x32xf32>
    %689 = arith.mulf %687, %2 : vector<8x32xf32>
    %690 = arith.addf %688, %689 : vector<8x32xf32>
    %cst_175 = arith.constant 0.176776692 : f32
    %691 = vector.broadcast %cst_175 : f32 to vector<8x32xf32>
    %692 = arith.mulf %690, %691 : vector<8x32xf32>
    %693 = vector.extract_strided_slice %406 {offsets = [8, 96], sizes = [8, 32], strides = [1, 1]} : vector<16x128xf32> to vector<8x32xf32>
    %694 = vector.extract_strided_slice %693 {offsets = [0, 0], sizes = [8, 16], strides = [1, 1]} : vector<8x32xf32> to vector<8x16xf32>
    %695 = vector.extract_strided_slice %693 {offsets = [0, 16], sizes = [8, 16], strides = [1, 1]} : vector<8x32xf32> to vector<8x16xf32>
    %cst_176 = arith.constant 0.000000e+00 : f32
    %696 = vector.broadcast %cst_176 : f32 to vector<8x16xf32>
    %697 = arith.subf %696, %695 : vector<8x16xf32>
    %698 = tpu.concatenate %697, %694 in 1 : vector<8x16xf32>, vector<8x16xf32> -> vector<8x32xf32>
    %699 = arith.mulf %693, %1 : vector<8x32xf32>
    %700 = arith.mulf %698, %2 : vector<8x32xf32>
    %701 = arith.addf %699, %700 : vector<8x32xf32>
    %702 = vector.extract_strided_slice %407 {offsets = [8, 96], sizes = [8, 32], strides = [1, 1]} : vector<16x128xf32> to vector<8x32xf32>
    %703 = arith.truncf %692 : vector<8x32xf32> to vector<8x32xbf16>
    %704 = arith.truncf %701 : vector<8x32xf32> to vector<8x32xbf16>
    %cst_177 = arith.constant dense<0.000000e+00> : vector<8x8xf32>
    %705 = tpu.matmul %703, %704, %cst_177 {dimension_numbers = #tpu.dot_dimension_numbers<[1], [1], [0], [0], [0, 0, 1, 0], [], []>} : vector<8x32xbf16>, vector<8x32xbf16>, vector<8x8xf32> -> vector<8x8xf32>
    %cst_178 = arith.constant -1.000000e+30 : f32
    %706 = vector.broadcast %cst_178 : f32 to vector<8x8xf32>
    %707 = arith.select %5, %705, %706 : vector<8x8xi1>, vector<8x8xf32>
    %cst_179 = arith.constant dense<0xFF800000> : vector<8xf32>
    %708 = vector.multi_reduction <maximumf>, %707, %cst_179 [1] : vector<8x8xf32> to vector<8xf32>
    %709 = vector.shape_cast %708 : vector<8xf32> to vector<8x1xf32>
    %710 = vector.broadcast %709 : vector<8x1xf32> to vector<8x8xf32>
    %711 = arith.subf %707, %710 : vector<8x8xf32>
    %712 = math.exp %711 : vector<8x8xf32>
    %cst_180 = arith.constant dense<0.000000e+00> : vector<8xf32>
    %713 = vector.multi_reduction <add>, %712, %cst_180 [1] : vector<8x8xf32> to vector<8xf32>
    %714 = vector.shape_cast %713 : vector<8xf32> to vector<8x1xf32>
    %715 = tpu.reciprocal %714 {approx = true} : vector<8x1xf32> -> vector<8x1xf32>
    %716 = vector.broadcast %715 : vector<8x1xf32> to vector<8x8xf32>
    %717 = arith.mulf %712, %716 : vector<8x8xf32>
    %718 = arith.truncf %717 : vector<8x8xf32> to vector<8x8xbf16>
    %719 = arith.truncf %702 : vector<8x32xf32> to vector<8x32xbf16>
    %cst_181 = arith.constant dense<0.000000e+00> : vector<8x32xf32>
    %720 = tpu.matmul %718, %719, %cst_181 {dimension_numbers = #tpu.dot_dimension_numbers<[1], [0], [0], [1], [0, 0, 1, 1], [], []>} : vector<8x8xbf16>, vector<8x32xbf16>, vector<8x32xf32> -> vector<8x32xf32>
    %721 = tpu.concatenate %603, %642, %681, %720 in 1 : vector<8x32xf32>, vector<8x32xf32>, vector<8x32xf32>, vector<8x32xf32> -> vector<8x128xf32>
    %722 = tpu.concatenate %564, %721 in 0 : vector<8x128xf32>, vector<8x128xf32> -> vector<16x128xf32>
    %723 = arith.truncf %722 : vector<16x128xf32> to vector<16x128xbf16>
    %cst_182 = arith.constant dense<0.000000e+00> : vector<16x128xf32>
    %724 = tpu.matmul %723, %384, %cst_182 {dimension_numbers = #tpu.dot_dimension_numbers<[1], [0], [0], [1], [0, 0, 1, 1], [], []>} : vector<16x128xbf16>, vector<128x128xbf16>, vector<16x128xf32> -> vector<16x128xf32>
    %725 = arith.addf %378, %724 : vector<16x128xf32>
    %726 = arith.mulf %725, %725 : vector<16x128xf32>
    %cst_183 = arith.constant dense<0.000000e+00> : vector<16xf32>
    %727 = vector.multi_reduction <add>, %726, %cst_183 [1] : vector<16x128xf32> to vector<16xf32>
    %728 = vector.shape_cast %727 : vector<16xf32> to vector<16x1xf32>
    %cst_184 = arith.constant 1.280000e+02 : f32
    %729 = vector.broadcast %cst_184 : f32 to vector<16x1xf32>
    %730 = arith.divf %728, %729 : vector<16x1xf32>
    %cst_185 = arith.constant 9.99999997E-7 : f32
    %731 = vector.broadcast %cst_185 : f32 to vector<16x1xf32>
    %732 = arith.addf %730, %731 : vector<16x1xf32>
    %733 = math.rsqrt %732 : vector<16x1xf32>
    %734 = vector.broadcast %733 : vector<16x1xf32> to vector<16x128xf32>
    %735 = arith.mulf %725, %734 : vector<16x128xf32>
    %736 = vector.broadcast %386 : vector<1x128xf32> to vector<16x128xf32>
    %737 = arith.mulf %735, %736 : vector<16x128xf32>
    %738 = arith.truncf %737 : vector<16x128xf32> to vector<16x128xbf16>
    %cst_186 = arith.constant dense<0.000000e+00> : vector<16x512xf32>
    %739 = tpu.matmul %738, %388, %cst_186 {dimension_numbers = #tpu.dot_dimension_numbers<[1], [0], [0], [1], [0, 0, 1, 1], [], []>} : vector<16x128xbf16>, vector<128x512xbf16>, vector<16x512xf32> -> vector<16x512xf32>
    %740 = vector.extract_strided_slice %739 {offsets = [0, 0], sizes = [16, 256], strides = [1, 1]} : vector<16x512xf32> to vector<16x256xf32>
    %741 = vector.extract_strided_slice %739 {offsets = [0, 256], sizes = [16, 256], strides = [1, 1]} : vector<16x512xf32> to vector<16x256xf32>
    %742 = arith.negf %740 : vector<16x256xf32>
    %743 = math.exp %742 : vector<16x256xf32>
    %cst_187 = arith.constant 1.000000e+00 : f32
    %744 = vector.broadcast %cst_187 : f32 to vector<16x256xf32>
    %745 = arith.addf %744, %743 : vector<16x256xf32>
    %746 = arith.divf %744, %745 : vector<16x256xf32>
    %747 = arith.mulf %740, %746 : vector<16x256xf32>
    %748 = arith.mulf %747, %741 : vector<16x256xf32>
    %749 = arith.truncf %748 : vector<16x256xf32> to vector<16x256xbf16>
    %cst_188 = arith.constant dense<0.000000e+00> : vector<16x128xf32>
    %750 = tpu.matmul %749, %390, %cst_188 {dimension_numbers = #tpu.dot_dimension_numbers<[1], [0], [0], [1], [0, 0, 1, 1], [], []>} : vector<16x256xbf16>, vector<256x128xbf16>, vector<16x128xf32> -> vector<16x128xf32>
    %751 = arith.addf %725, %750 : vector<16x128xf32>
    %c0_189 = arith.constant 0 : index
    %c0_190 = arith.constant 0 : index
    %752 = vector.load %arg9[%c0_189, %c0_190] : memref<1x128xf32, #tpu.memory_space<vmem>>, vector<1x128xf32>
    %753 = arith.mulf %751, %751 : vector<16x128xf32>
    %cst_191 = arith.constant dense<0.000000e+00> : vector<16xf32>
    %754 = vector.multi_reduction <add>, %753, %cst_191 [1] : vector<16x128xf32> to vector<16xf32>
    %755 = vector.shape_cast %754 : vector<16xf32> to vector<16x1xf32>
    %cst_192 = arith.constant 1.280000e+02 : f32
    %756 = vector.broadcast %cst_192 : f32 to vector<16x1xf32>
    %757 = arith.divf %755, %756 : vector<16x1xf32>
    %cst_193 = arith.constant 9.99999997E-7 : f32
    %758 = vector.broadcast %cst_193 : f32 to vector<16x1xf32>
    %759 = arith.addf %757, %758 : vector<16x1xf32>
    %760 = math.rsqrt %759 : vector<16x1xf32>
    %761 = vector.broadcast %760 : vector<16x1xf32> to vector<16x128xf32>
    %762 = arith.mulf %751, %761 : vector<16x128xf32>
    %763 = vector.broadcast %752 : vector<1x128xf32> to vector<16x128xf32>
    %764 = arith.mulf %762, %763 : vector<16x128xf32>
    %765 = arith.truncf %764 : vector<16x128xf32> to vector<16x128xbf16>
    %c0_194 = arith.constant 0 : index
    %c0_195 = arith.constant 0 : index
    %766 = vector.load %arg10[%c0_194, %c0_195] : memref<128x256xbf16, #tpu.memory_space<vmem>>, vector<128x256xbf16>
    %cst_196 = arith.constant dense<0.000000e+00> : vector<16x256xf32>
    %767 = tpu.matmul %765, %766, %cst_196 {dimension_numbers = #tpu.dot_dimension_numbers<[1], [0], [0], [1], [0, 0, 1, 1], [], []>} : vector<16x128xbf16>, vector<128x256xbf16>, vector<16x256xf32> -> vector<16x256xf32>
    %c0_197 = arith.constant 0 : index
    %c0_198 = arith.constant 0 : index
    %768 = vector.load %arg11[%c0_197, %c0_198] : memref<16x256xf32, #tpu.memory_space<vmem>>, vector<16x256xf32>
    tpu.vector_store %arg11[%c0_197, %c0_198], %767 {strides = array<i32>} : memref<16x256xf32, #tpu.memory_space<vmem>>, vector<16x256xf32>,
    return
  }
}

</mosaic_0001>

<bundles_post_ra>
// kernel: tpu_custom_call.1
= control target key start
LH: loop header
LB: loop body
LE: loop exit
PB: predicated region body
PF: predicated region fallthrough
CT: control target
= control target key end

     0   :  { %16 = vsyncpa [#allocation3], 0  ;;  %s6756_s0 = inlined_call_operand.hbm [shape: f32[16,128], index: 0, kind: input, shape index: {}]   ;;  %s6757_s1 = inlined_call_operand.hbm [shape: f32[8,32], index: 1, kind: input, shape index: {}]   ;;  %s6758_s2 = inlined_call_operand.hbm [shape: f32[8,32], index: 2, kind: input, shape index: {}]   ;;  %s6759_s3 = inlined_call_operand.vmem [shape: f32[2,1,128], index: 3, kind: input, shape index: {}]   ;;  %s6760_s4 = inlined_call_operand.hbm [shape: bf16[2,128,384], index: 4, kind: input, shape index: {}]   ;;  %s6761_s5 = inlined_call_operand.hbm [shape: bf16[2,128,128], index: 5, kind: input, shape index: {}]   ;;  %s6762_s6 = inlined_call_operand.vmem [shape: f32[2,1,128], index: 6, kind: input, shape index: {}]   ;;  %s6763_s7 = inlined_call_operand.hbm [shape: bf16[2,128,512], index: 7, kind: input, shape index: {}]   ;;  %s6764_s8 = inlined_call_operand.hbm [shape: bf16[2,256,128], index: 8, kind: input, shape index: {}]   ;;  %s6765_s9 = inlined_call_operand.vmem [shape: f32[1,128], index: 9, kind: input, shape index: {}]   ;;  %s6766_s10 = inlined_call_operand.hbm [shape: bf16[128,256], index: 10, kind: input, shape index: {}]   ;;  %s6767_s11 = inlined_call_operand.hbm [shape: f32[16,256], index: 11, kind: output, shape index: {}]  }
   0x1   :  { %17 = vsyncpa [#allocation6], 0 }
   0x2   :  { %18 = vsyncpa [#allocation9], 0 }
   0x3   :  { %19 = vsyncpa [#allocation12], 0 }
   0x4   :  { %20 = vsyncpa [#allocation15], 0 }
   0x5   :  { %21 = vsyncpa [#allocation4], 0  ;;  %s5719_s17 = smov [#allocation5]   ;;  %s5720_s19 = smov [#allocation8]  }
   0x6   :  { %s40_s18 = sshll.u32 %s5719_s17, 4  ;;  %s61_s20 = sshll.u32 %s5720_s19, 4  ;;  %s41_s18 = int_to_ptr.vmem [resolvable:$true] %s40_s18  ;;  %s5804_s20 = int_to_ptr.vmem [resolvable:$true] %s61_s20 }
   0x7   :  { %s5509_s23 = scalar_lea.hbm %s6757_s1, 128 }
   0x8   :  { %p5510_p0 = scmp.ne.s32.totalorder %s6757_s1, %s5509_s23  ;;  %p5513_p1 = scmp.lt.u32.totalorder %s5509_s23, %s6757_s1 }
   0xa   :  { %p5515_p2 = pnand %p5513_p1, %p5510_p0 }
   0xc   :  { %5518 = shalt.err (!%p5515_p2)
}
   0xd   :  { %s5519_s28 = scalar_lea.vmem %s41_s18, 128  ;;  %p5524_p4 = scmp.lt.s32.totalorder %s41_s18, %s41_s18 }
   0xe   :  { %p5520_p3 = scmp.ne.s32.totalorder %s41_s18, %s5519_s28  ;;  %p5525_p5 = scmp.lt.s32.totalorder %s5519_s28, %s5519_s28 }
  0x10   :  { %p5526_p6 = por %p5525_p5, %p5524_p4 }
  0x12   :  { %p5527_p7 = pnand %p5526_p6, %p5520_p3 }
  0x14   :  { %5530 = shalt.err (!%p5527_p7)
}
  0x15   :  { %43 = dma.hbm_to_vmem [thread:$0]  %s6757_s1, 128, %s41_s18, [#allocation6]  }
  0x16   :  { %s5531_s14 = scalar_lea.hbm %s6760_s4, 6144 }
  0x17   :  { %p5532_p8 = scmp.ne.s32.totalorder %s6760_s4, %s5531_s14  ;;  %p5535_p9 = scmp.lt.u32.totalorder %s5531_s14, %s6760_s4 }
  0x19   :  { %p5537_p10 = pnand %p5535_p9, %p5532_p8 }
  0x1b   :  { %5540 = shalt.err (!%p5537_p10)
}
  0x1c   :  { %s5541_s21 = scalar_lea.vmem %s5804_s20, 6144  ;;  %p5546_p12 = scmp.lt.s32.totalorder %s5804_s20, %s5804_s20 }
  0x1d   :  { %p5542_p11 = scmp.ne.s32.totalorder %s5804_s20, %s5541_s21  ;;  %p5547_p13 = scmp.lt.s32.totalorder %s5541_s21, %s5541_s21 }
  0x1f   :  { %p5548_p0 = por %p5547_p13, %p5546_p12 }
  0x21   :  { %p5549_p1 = pnand %p5548_p0, %p5542_p11 }
  0x23   :  { %5552 = shalt.err (!%p5549_p1)
}
  0x24   :  { %s5721_s1 = smov 192   ;;  %s5722_s18 = smov 12  }
  0x25   :  { %67 = dma.hbm_to_vmem [thread:$0]  %s6760_s4, 6144, %s5804_s20, [#allocation9], %s5721_s1, %s5721_s1, %s5722_s18  }
  0x26   :  { %s5723_s24 = smov [#allocation11]   ;;  %s5553_s28 = scalar_lea.hbm %s6763_s7, 8192 }
  0x27   :  { %s87_s25 = sshll.u32 %s5723_s24, 4  ;;  %p5554_p2 = scmp.ne.s32.totalorder %s6763_s7, %s5553_s28  ;;  %s88_s25 = int_to_ptr.vmem [resolvable:$true] %s87_s25 }
  0x28   :  { %p5557_p3 = scmp.lt.u32.totalorder %s5553_s28, %s6763_s7 }
  0x2a   :  { %p5559_p4 = pnand %p5557_p3, %p5554_p2 }
  0x2c   :  { %5562 = shalt.err (!%p5559_p4)
}
  0x2d   :  { %s5563_s14 = scalar_lea.vmem %s88_s25, 8192  ;;  %p5568_p6 = scmp.lt.s32.totalorder %s88_s25, %s88_s25 }
  0x2e   :  { %p5564_p5 = scmp.ne.s32.totalorder %s88_s25, %s5563_s14  ;;  %p5569_p7 = scmp.lt.s32.totalorder %s5563_s14, %s5563_s14 }
  0x30   :  { %p5570_p8 = por %p5569_p7, %p5568_p6 }
  0x32   :  { %p5571_p9 = pnand %p5570_p8, %p5564_p5 }
  0x34   :  { %5574 = shalt.err (!%p5571_p9)
}
  0x35   :  { %s5724_s4 = smov 256   ;;  %s5725_s20 = smov 16  }
  0x36   :  { %93 = dma.hbm_to_vmem [thread:$0]  %s6763_s7, 8192, %s88_s25, [#allocation12], %s5724_s4, %s5724_s4, %s5725_s20  }
  0x37   :  { %s5726_s17 = smov [#allocation2]   ;;  %s5575_s18 = scalar_lea.hbm %s6756_s0, 256 }
  0x38   :  { %s27_s19 = sshll.u32 %s5726_s17, 4  ;;  %p5576_p10 = scmp.ne.s32.totalorder %s6756_s0, %s5575_s18  ;;  %s28_s19 = int_to_ptr.vmem [resolvable:$true] %s27_s19 }
  0x39   :  { %p5579_p11 = scmp.lt.u32.totalorder %s5575_s18, %s6756_s0 }
  0x3b   :  { %p5581_p12 = pnand %p5579_p11, %p5576_p10 }
  0x3d   :  { %5584 = shalt.err (!%p5581_p12)
}
  0x3e   :  { %s5585_s27 = scalar_lea.vmem %s28_s19, 256  ;;  %p5590_p0 = scmp.lt.s32.totalorder %s28_s19, %s28_s19 }
  0x3f   :  { %p5586_p13 = scmp.ne.s32.totalorder %s28_s19, %s5585_s27  ;;  %p5591_p1 = scmp.lt.s32.totalorder %s5585_s27, %s5585_s27 }
  0x41   :  { %p5592_p2 = por %p5591_p1, %p5590_p0 }
  0x43   :  { %p5593_p3 = pnand %p5592_p2, %p5586_p13 }
  0x45   :  { %5596 = shalt.err (!%p5593_p3)
}
  0x46   :  { %s5727_s7 = smov 128   ;;  %s5728_s25 = smov 8  }
  0x47   :  { %33 = dma.hbm_to_vmem [thread:$0]  %s6756_s0, 256, %s28_s19, [#allocation3], %s5727_s7, %s5727_s7, %s5728_s25  }
  0x48   :  { %s5729_s30 = smov [#allocation7]   ;;  %s5730_s13 = smov [#allocation10]  }
  0x49   :  { %s50_s12 = sshll.u32 %s5729_s30, 4  ;;  %s73_s14 = sshll.u32 %s5730_s13, 4  ;;  %s51_s12 = int_to_ptr.vmem [resolvable:$true] %s50_s12  ;;  %s5865_s14 = int_to_ptr.vmem [resolvable:$true] %s73_s14 }
  0x4a   :  { %s5597_s17 = scalar_lea.hbm %s6758_s2, 128 }
  0x4b   :  { %p5598_p4 = scmp.ne.s32.totalorder %s6758_s2, %s5597_s17  ;;  %p5601_p5 = scmp.lt.u32.totalorder %s5597_s17, %s6758_s2 }
  0x4d   :  { %p5603_p6 = pnand %p5601_p5, %p5598_p4 }
  0x4f   :  { %5606 = shalt.err (!%p5603_p6)
}
  0x50   :  { %s5607_s0 = scalar_lea.vmem %s51_s12, 128  ;;  %p5612_p8 = scmp.lt.s32.totalorder %s51_s12, %s51_s12 }
  0x51   :  { %p5608_p7 = scmp.ne.s32.totalorder %s51_s12, %s5607_s0  ;;  %p5613_p9 = scmp.lt.s32.totalorder %s5607_s0, %s5607_s0 }
  0x53   :  { %p5614_p10 = por %p5613_p9, %p5612_p8 }
  0x55   :  { %p5615_p11 = pnand %p5614_p10, %p5608_p7 }
  0x57   :  { %5618 = shalt.err (!%p5615_p11)
}
  0x58   :  { %53 = dma.hbm_to_vmem [thread:$0]  %s6758_s2, 128, %s51_s12, [#allocation6]  }
  0x59   :  { %s5619_s27 = scalar_lea.hbm %s6761_s5, 2048 }
  0x5a   :  { %p5620_p12 = scmp.ne.s32.totalorder %s6761_s5, %s5619_s27  ;;  %p5623_p13 = scmp.lt.u32.totalorder %s5619_s27, %s6761_s5 }
  0x5c   :  { %p5625_p0 = pnand %p5623_p13, %p5620_p12 }
  0x5e   :  { %5628 = shalt.err (!%p5625_p0)
}
  0x5f   :  { %s5629_s15 = scalar_lea.vmem %s5865_s14, 2048  ;;  %p5634_p2 = scmp.lt.s32.totalorder %s5865_s14, %s5865_s14 }
  0x60   :  { %p5630_p1 = scmp.ne.s32.totalorder %s5865_s14, %s5629_s15  ;;  %p5635_p3 = scmp.lt.s32.totalorder %s5629_s15, %s5629_s15 }
  0x62   :  { %p5636_p4 = por %p5635_p3, %p5634_p2 }
  0x64   :  { %p5637_p5 = pnand %p5636_p4, %p5630_p1 }
  0x66   :  { %5640 = shalt.err (!%p5637_p5)
}
  0x67   :  { %s5731_s2 = smov 64   ;;  %s5732_s12 = smov 4  }
  0x68   :  { %79 = dma.hbm_to_vmem [thread:$0]  %s6761_s5, 2048, %s5865_s14, [#allocation9], %s5731_s2, %s5731_s2, %s5732_s12  }
  0x69   :  { %s5733_s21 = smov [#allocation13]   ;;  %s5734_s18 = smov [#allocation14]  }
  0x6a   :  { %s99_s1 = sshll.u32 %s5733_s21, 4  ;;  %s113_s22 = sshll.u32 %s5734_s18, 4  ;;  %s100_s1 = int_to_ptr.vmem [resolvable:$true] %s99_s1  ;;  %s5898_s22 = int_to_ptr.vmem [resolvable:$true] %s113_s22 }
  0x6b   :  { %s5641_s23 = scalar_lea.hbm %s6764_s8, 4096 }
  0x6c   :  { %p5642_p6 = scmp.ne.s32.totalorder %s6764_s8, %s5641_s23  ;;  %p5645_p7 = scmp.lt.u32.totalorder %s5641_s23, %s6764_s8 }
  0x6e   :  { %p5647_p8 = pnand %p5645_p7, %p5642_p6 }
  0x70   :  { %5650 = shalt.err (!%p5647_p8)
}
  0x71   :  { %s5651_s5 = scalar_lea.vmem %s100_s1, 4096  ;;  %p5656_p10 = scmp.lt.s32.totalorder %s100_s1, %s100_s1 }
  0x72   :  { %p5652_p9 = scmp.ne.s32.totalorder %s100_s1, %s5651_s5  ;;  %p5657_p11 = scmp.lt.s32.totalorder %s5651_s5, %s5651_s5 }
  0x74   :  { %p5658_p12 = por %p5657_p11, %p5656_p10 }
  0x76   :  { %p5659_p13 = pnand %p5658_p12, %p5652_p9 }
  0x78   :  { %5662 = shalt.err (!%p5659_p13)
}
  0x79   :  { %105 = dma.hbm_to_vmem [thread:$0]  %s6764_s8, 4096, %s100_s1, [#allocation12], %s5731_s2, %s5731_s2, %s5732_s12  }
  0x7a   :  { %s5663_s15 = scalar_lea.hbm %s6766_s10, 2048 }
  0x7b   :  { %p5664_p0 = scmp.ne.s32.totalorder %s6766_s10, %s5663_s15  ;;  %p5667_p1 = scmp.lt.u32.totalorder %s5663_s15, %s6766_s10 }
  0x7d   :  { %p5669_p2 = pnand %p5667_p1, %p5664_p0 }
  0x7f   :  { %5672 = shalt.err (!%p5669_p2)
}
  0x80   :  { %s5673_s0 = scalar_lea.vmem %s5898_s22, 2048  ;;  %p5678_p4 = scmp.lt.s32.totalorder %s5898_s22, %s5898_s22 }
  0x81   :  { %p5674_p3 = scmp.ne.s32.totalorder %s5898_s22, %s5673_s0  ;;  %p5679_p5 = scmp.lt.s32.totalorder %s5673_s0, %s5673_s0 }
  0x83   :  { %p5680_p6 = por %p5679_p5, %p5678_p4 }
  0x85   :  { %p5681_p7 = pnand %p5680_p6, %p5674_p3 }
  0x87   :  { %5684 = shalt.err (!%p5681_p7)
}
  0x88   :  { %119 = dma.hbm_to_vmem [thread:$0]  %s6766_s10, 2048, %s5898_s22, [#allocation15], %s5727_s7, %s5727_s7, %s5728_s25  }
  0x89   :  { %5707 = dma.done.wait [#allocation3], 256  }
  0x8a   :  { %5708 = vsyncadd [#allocation3], 4294967040 }
  0x8b   :  { %5709 = dma.done.wait [#allocation6], 256  }
  0x8c   :  { %5710 = vsyncadd [#allocation6], 4294967040 }
  0x8d   :  { %5711 = dma.done.wait [#allocation9], 8192  }
  0x8e   :  { %5712 = vsyncadd [#allocation9], 4294959104 }
  0x8f   :  { %5713 = dma.done.wait [#allocation12], 12288  }
  0x90   :  { %5714 = vsyncadd [#allocation12], 4294955008 }
  0x91   :  { %5715 = dma.done.wait [#allocation15], 2048  }
  0x92   :  { %5716 = vsyncadd [#allocation15], 4294965248  ;;  %v5735_v0 = vmov 0.0   ;;  %v5935_v1 = vld [vmem:[#allocation2] sm:$0xff]  ;;  %v5937_v2 = vld [vmem:[#allocation2 + $0x8] sm:$0xff]  ;;  %v5736_v26 = vmov 0  }
  0x93   :  { %4830 = vmatprep.subr.bf16.mxu1 %v5735_v0  ;;  %v268_v3 = vmul.f32 %v5935_v1, %v5935_v1  ;;  %v5157_v4 = vld [vmem:[#allocation8 + $0x4] ss:$12 sps:$4 sm:$0xff]   ;;  %v5159_v5 = vld [vmem:[#allocation8] ss:$12 sps:$4 sm:$0xff]   ;;  %v5160_v6 = vld [vmem:[#allocation8 + $0x8] ss:$12 sps:$4 sm:$0xff]   ;;  %v269_v7 = vmul.f32 %v5937_v2, %v5937_v2  ;;  %452 = vmatprep.mubr.bf16.mxu0 %v5736_v26 }
  0x94   :  { %420 = vmatprep.subr.bf16.mxu0 %v5157_v4  ;;  %v5161_v8 = vld [vmem:[#allocation8 + $0x1c] ss:$12 sps:$4 sm:$0xff]   ;;  %4831 = vmatpush3.bf16.msra.mxu1 %v5160_v6  ;;  %v5163_v9 = vld [vmem:[#allocation8 + $0x18] ss:$12 sps:$4 sm:$0xff]   ;;  %v5164_v10 = vld [vmem:[#allocation8 + $0x20] ss:$12 sps:$4 sm:$0xff]  }
  0x95   :  { %270 = vadd.xlane.f32.xlu0 %v268_v3  ;;  %421 = vmatpush1.bf16.msra.mxu0 %v5159_v5  ;;  %v5165_v11 = vld [vmem:[#allocation8 + $0x34] ss:$12 sps:$4 sm:$0xff]   ;;  %v5167_v12 = vld [vmem:[#allocation8 + $0x30] ss:$12 sps:$4 sm:$0xff]   ;;  %v5168_v13 = vld [vmem:[#allocation8 + $0x38] ss:$12 sps:$4 sm:$0xff]  }
  0x96   :  { %422 = vmatprep.subr.bf16.mxu0 %v5161_v8  ;;  %4832 = vmatprep.subr.bf16.mxu1 %v5735_v0  ;;  %v5169_v14 = vld [vmem:[#allocation8 + $0x4c] ss:$12 sps:$4 sm:$0xff]   ;;  %v5171_v15 = vld [vmem:[#allocation8 + $0x48] ss:$12 sps:$4 sm:$0xff]   ;;  %v5172_v16 = vld [vmem:[#allocation8 + $0x50] ss:$12 sps:$4 sm:$0xff]  }
  0x97   :  { %v5173_v17 = vld [vmem:[#allocation8 + $0x64] ss:$12 sps:$4 sm:$0xff]   ;;  %v5175_v18 = vld [vmem:[#allocation8 + $0x60] ss:$12 sps:$4 sm:$0xff]   ;;  %v5176_v19 = vld [vmem:[#allocation8 + $0x68] ss:$12 sps:$4 sm:$0xff]  }
  0x98   :  { %4833 = vmatpush3.bf16.msra.mxu1 %v5164_v10  ;;  %v5177_v20 = vld [vmem:[#allocation8 + $0x7c] ss:$12 sps:$4 sm:$0xff]   ;;  %v5179_v21 = vld [vmem:[#allocation8 + $0x78] ss:$12 sps:$4 sm:$0xff]   ;;  %v5180_v22 = vld [vmem:[#allocation8 + $0x80] ss:$12 sps:$4 sm:$0xff]  }
  0x99   :  { %272 = vadd.xlane.f32.xlu0 %v269_v7  ;;  %423 = vmatpush1.bf16.msra.mxu0 %v5163_v9  ;;  %v5181_v23 = vld [vmem:[#allocation8 + $0x94] ss:$12 sps:$4 sm:$0xff]   ;;  %v5183_v24 = vld [vmem:[#allocation8 + $0x90] ss:$12 sps:$4 sm:$0xff]   ;;  %v5184_v25 = vld [vmem:[#allocation8 + $0x98] ss:$12 sps:$4 sm:$0xff]  }
  0x9a   :  { %4834 = vmatprep.subr.bf16.mxu1 %v5735_v0  ;;  %424 = vmatprep.subr.bf16.mxu0 %v5165_v11  ;;  %vm5737_vm0 = vmmov 0   ;;  %v5185_v27 = vld [vmem:[#allocation8 + $0xac] ss:$12 sps:$4 sm:$0xff]   ;;  %v5187_v28 = vld [vmem:[#allocation8 + $0xa8] ss:$12 sps:$4 sm:$0xff]   ;;  %s5738_s25 = smov 112  }
  0x9b   :  { %4846 = vmatprep.mubr.msk.bf16.mxu1 %vm5737_vm0, %v5735_v0  ;;  %v5188_v29 = vld [vmem:[#allocation8 + $0xb0] ss:$12 sps:$4 sm:$0xff]   ;;  %v4463_v39 = vld [vmem:[%s6759_s3] ss:$0 sm:$0xff]  ;;  %s5739_s1 = smov 80   ;;  %s5740_s22 = smov 48  }
  0x9c   :  { %4835 = vmatpush3.bf16.msra.mxu1 %v5168_v13  ;;  %vm513_vm1 = vcmask 130048   ;;  %v6026_v59 = vld [vmem:[#allocation5] sm:$0xff]  ;;  %v6028_v60 = vld [vmem:[#allocation7] sm:$0xff]  ;;  %vm534_vm2 = vcmask 261120   ;;  %vm599_vm3 = vcmask 1043456   ;;  %s5741_s19 = smov 32  }
  0x9d   :  { %425 = vmatpush1.bf16.msra.mxu0 %v5167_v12  ;;  %4836 = vmatprep.subr.bf16.mxu1 %v5735_v0  ;;  %s5742_s23 = smov 96   ;;  %vm582_vm5 = vcmask 64512   ;;  %vm1099_vm6 = vcmask 523264   ;;  %vm1101_vm7 = vcmask 785408   ;;  %s5743_s14 = smov [#allocation16]  }
  0x9e   :  { %426 = vmatprep.subr.bf16.mxu0 %v5169_v14  ;;  %s4447_s29 = sshll.u32 %s5743_s14, 4  ;;  %s4448_s29 = int_to_ptr.vmem [resolvable:$true] %s4447_s29 }
  0x9f   :  { %s5685_s30 = scalar_lea.vmem %s4448_s29, 512  ;;  %p5690_p9 = scmp.lt.s32.totalorder %s4448_s29, %s4448_s29 }
  0xa0   :  { %4837 = vmatpush3.bf16.msra.mxu1 %v5172_v16  ;;  %p5686_p8 = scmp.ne.s32.totalorder %s4448_s29, %s5685_s30  ;;  %p5691_p10 = scmp.lt.s32.totalorder %s5685_s30, %s5685_s30 }
  0xa1   :  { %427 = vmatpush1.bf16.msra.mxu0 %v5171_v15  ;;  %4838 = vmatprep.subr.bf16.mxu1 %v5735_v0 }
  0xa2   :  { %428 = vmatprep.subr.bf16.mxu0 %v5173_v17  ;;  %p5692_p11 = por %p5691_p10, %p5690_p9 }
  0xa4   :  { %4839 = vmatpush3.bf16.msra.mxu1 %v5176_v19  ;;  %p5693_p12 = pnand %p5692_p11, %p5686_p8 }
  0xa5   :  { %429 = vmatpush1.bf16.msra.mxu0 %v5175_v18  ;;  %4840 = vmatprep.subr.bf16.mxu1 %v5735_v0 }
  0xa6   :  { %430 = vmatprep.subr.bf16.mxu0 %v5177_v20 }
  0xa8   :  { %4841 = vmatpush3.bf16.msra.mxu1 %v5180_v22 }
  0xa9   :  { %431 = vmatpush1.bf16.msra.mxu0 %v5179_v21  ;;  %4842 = vmatprep.subr.bf16.mxu1 %v5735_v0 }
  0xaa   :  { %432 = vmatprep.subr.bf16.mxu0 %v5181_v23 }
  0xac   :  { %4843 = vmatpush3.bf16.msra.mxu1 %v5184_v25 }
  0xad   :  { %433 = vmatpush1.bf16.msra.mxu0 %v5183_v24  ;;  %4844 = vmatprep.subr.bf16.mxu1 %v5735_v0 }
  0xae   :  { %434 = vmatprep.subr.bf16.mxu0 %v5185_v27 }
  0xb0   :  { %4845 = vmatpush3.bf16.msra.mxu1 %v5188_v29 }
  0xb1   :  { %435 = vmatpush1.bf16.msra.mxu0 %v5187_v28  ;;  %4850 = vmatprep.subr.bf16.mxu1 %v5735_v0 }
  0xb2   :  { %4874 = vmatprep.subr.bf16.mxu0 %v5735_v0 }
 0x122   :  { %v271_v30 = vpop.xlane.xlu0 %270 }
 0x123   :  { %v275_v31 = vmul.f32 0.0078125, %v271_v30 }
 0x125   :  { %v277_v32 = vadd.f32 1e-06, %v275_v31 }
 0x126   :  { %v273_v33 = vpop.xlane.xlu0 %272 }
 0x127   :  { %5389 = vrsqrt.f32 %v277_v32  ;;  %v276_v34 = vmul.f32 0.0078125, %v273_v33 }
 0x129   :  { %v278_v35 = vadd.f32 1e-06, %v276_v34 }
 0x12b   :  { %5391 = vrsqrt.f32 %v278_v35 }
 0x131   :  { %v5390_v36 = vpop.eup %5389 }
 0x132   :  { %v281_v37 = vmul.f32 %v5390_v36, %v5935_v1 }
 0x134   :  { %v289_v41 = vmul.f32 %v4463_v39, %v281_v37 }
 0x135   :  { %v5392_v38 = vpop.eup %5391 }
 0x136   :  { %v282_v40 = vmul.f32 %v5392_v38, %v5937_v2 }
 0x138   :  { %v290_v42 = vmul.f32 %v4463_v39, %v282_v40  ;;  %v149_v40 = vlaneseq }
 0x13a   :  { %v291_v43 = vpack.c.bf16 %v290_v42, %v289_v41  ;;  %v150_v41 = vshrl.u32 %v149_v40, 7  ;;  %v152_v42 = vand.u32 127, %v149_v40 }
 0x13c   :  { %453 = vmatmul.mubr.bf16.vlgmr.msra.gmra.mrb[0].mxu0 %v291_v43  ;;  %4847 = vmatmul.mubr.bf16.vlgmr.msra.gmra.mrb[0].mxu1 %v291_v43  ;;  %vm6071_vm4 = vcmp.le.s32.totalorder %v152_v42, %v150_v41 }
 0x13d   :  { %4852 = vmatprep.mubr.msk.bf16.mxu1 %vm5737_vm0, %v5735_v0  ;;  %4876 = vmatprep.mubr.msk.bf16.mxu0 %vm5737_vm0, %v5735_v0 }
 0x20f   :  { %v5964_v44 = vpop.f32.mrb[0].mxu0  ;;  %v5966_v45 = vpop.f32.mrb[0].mxu1 }
 0x210   :  { %v5968_v46 = vpop.f32.mrb[1].mxu0  ;;  %v4848_v47 = vpop.f32.mrb[1].mxu1  ;;  %v504_v48 = vsub.f32 0.0, %v5964_v44  ;;  %v515_v7 = vmul.f32 %v5964_v44, %v6026_v59  ;;  %v6046_v15 = vpack.c.bf16 %v5966_v45, %v5966_v45 }
 0x211   :  { %v5971_v49 = vpop.f32.mrb[2].mxu0  ;;  %v5973_v50 = vpop.f32.mrb[2].mxu1  ;;  %v519_v51 = vsub.f32 0.0, %v5968_v46  ;;  %v529_v63 = vmul.f32 %v5968_v46, %v6026_v59 }
 0x212   :  { %v4849_v52 = vpop.f32.mrb[3].mxu1  ;;  %506 = vrot.lane.b32.xlu0 %v504_v48, %s5738_s25  ;;  %v5977_v53 = vpop.f32.mrb[3].mxu0  ;;  %v5997_v54 = vsub.f32 0.0, %v5971_v49  ;;  %v601_v21 = vsel %vm599_vm3, %v6046_v15, 0 }
 0x213   :  { %521 = vrot.lane.b32.xlu1 %v519_v51, %s5738_s25  ;;  %v6010_v55 = vsub.f32 0.0, %v5977_v53 }
 0x216   :  { %643 = vrot.lane.b32.xlu0 %v504_v48, %s5739_s1 }
 0x217   :  { %525 = vrot.lane.b32.xlu1 %v5968_v46, %s5725_s20 }
 0x21a   :  { %646 = vrot.lane.b32.xlu0 %v5964_v44, %s5738_s25 }
 0x21b   :  { %510 = vrot.lane.b32.xlu1 %v5964_v44, %s5725_s20 }
 0x21e   :  { %813 = vrot.lane.b32.xlu0 %v5968_v46, %s5739_s1 }
 0x21f   :  { %665 = vrot.lane.b32.xlu1 %v5968_v46, %s5738_s25 }
 0x222   :  { %792 = vrot.lane.b32.xlu0 %v504_v48, %s5740_s22 }
 0x223   :  { %662 = vrot.lane.b32.xlu1 %v519_v51, %s5739_s1 }
 0x226   :  { %810 = vrot.lane.b32.xlu0 %v519_v51, %s5740_s22 }
 0x227   :  { %960 = vrot.lane.b32.xlu1 %v5968_v46, %s5740_s22 }
 0x22a   :  { %795 = vrot.lane.b32.xlu0 %v5964_v44, %s5739_s1 }
 0x22b   :  { %1238 = vrot.lane.b32.xlu1 %v5997_v54, %s5739_s1 }
 0x22e   :  { %957 = vrot.lane.b32.xlu0 %v519_v51, %s5725_s20 }
 0x232   :  { %939 = vrot.lane.b32.xlu0 %v504_v48, %s5725_s20 }
 0x236   :  { %942 = vrot.lane.b32.xlu0 %v5964_v44, %s5740_s22 }
 0x23a   :  { %1256 = vrot.lane.b32.xlu0 %v5977_v53, %s5738_s25 }
 0x23e   :  { %1253 = vrot.lane.b32.xlu0 %v6010_v55, %s5739_s1 }
 0x242   :  { %1241 = vrot.lane.b32.xlu0 %v5971_v49, %s5738_s25 }
 0x246   :  { %1401 = vrot.lane.b32.xlu0 %v5977_v53, %s5739_s1 }
 0x24a   :  { %1386 = vrot.lane.b32.xlu0 %v5971_v49, %s5739_s1 }
 0x24e   :  { %1545 = vrot.lane.b32.xlu0 %v5977_v53, %s5740_s22 }
 0x252   :  { %1530 = vrot.lane.b32.xlu0 %v5971_v49, %s5740_s22 }
 0x284   :  { %v507_v56 = vpop.permute.xlu0 %506 }
 0x285   :  { %v522_v57 = vpop.permute.xlu1 %521 }
 0x288   :  { %v6024_v58 = vpop.permute.xlu0 %643 }
 0x289   :  { %v526_v61 = vpop.permute.xlu1 %525 }
 0x28a   :  { %v528_v62 = vsel %vm513_vm1, %v522_v57, %v526_v61 }
 0x28b   :  { %v530_v1 = vmul.f32 %v528_v62, %v6028_v60 }
 0x28c   :  { %v6034_v2 = vpop.permute.xlu0 %646 }
 0x28d   :  { %v531_v3 = vadd.f32 %v530_v1, %v529_v63  ;;  %v511_v4 = vpop.permute.xlu1 %510  ;;  %v649_v57 = vsel %vm513_vm1, %v6024_v58, %v6034_v2 }
 0x28e   :  { %v514_v5 = vsel %vm513_vm1, %v507_v56, %v511_v4  ;;  %v655_v61 = vmul.f32 %v649_v57, %v6028_v60 }
 0x28f   :  { %v533_v6 = vpack.c.bf16 %v531_v3, %v531_v3  ;;  %v516_v8 = vmul.f32 %v514_v5, %v6028_v60 }
 0x290   :  { %v6040_v9 = vpop.permute.xlu0 %813 }
 0x291   :  { %v517_v10 = vadd.f32 %v516_v8, %v515_v7  ;;  %v666_v11 = vpop.permute.xlu1 %665  ;;  %v539_v12 = vsel %vm534_vm2, %v533_v6, 0 }
 0x292   :  { %4851 = vmatpush3.bf16.xpose.msra.mxu1 %v539_v12 }
 0x293   :  { %v518_v13 = vmul.f32 0.17677669, %v517_v10  ;;  %4856 = vmatprep.subr.bf16.mxu1 %v5735_v0 }
 0x294   :  { %v793_v14 = vpop.permute.xlu0 %792 }
 0x295   :  { %v663_v16 = vpop.permute.xlu1 %662  ;;  %v532_v18 = vpack.c.bf16 %v518_v13, %v518_v13 }
 0x296   :  { %v668_v17 = vsel %vm513_vm1, %v663_v16, %v666_v11 }
 0x297   :  { %v670_v19 = vmul.f32 %v668_v17, %v6028_v60 }
 0x298   :  { %v811_v20 = vpop.permute.xlu0 %810 }
 0x299   :  { %4853 = vmatmul.mubr.msk.bf16.vlgmr.msra.gmra.mrb[4].mxu1 %vm534_vm2, %v532_v18  ;;  %672 = vrot.lane.b32.xlu0 %v670_v19, %s5741_s19  ;;  %v961_v25 = vpop.permute.xlu1 %960  ;;  %v816_v62 = vsel %vm513_vm1, %v811_v20, %v6040_v9 }
 0x29a   :  { %4857 = vmatpush3.bf16.msra.mxu1 %v601_v21  ;;  %4858 = vmatprep.mubr.msk.bf16.mxu1 %vm5737_vm0, %v5735_v0  ;;  %v818_v63 = vmul.f32 %v816_v62, %v6028_v60 }
 0x29b   :  { %4862 = vmatprep.subr.bf16.mxu1 %v5735_v0 }
 0x29c   :  { %v796_v22 = vpop.permute.xlu0 %795 }
 0x29d   :  { %v798_v23 = vsel %vm513_vm1, %v793_v14, %v796_v22  ;;  %799 = vrot.lane.b32.xlu0 %v6026_v59, %s5731_s2  ;;  %v1239_v36 = vpop.permute.xlu1 %1238 }
 0x29e   :  { %v803_v24 = vmul.f32 %v798_v23, %v6028_v60 }
 0x2a0   :  { %v958_v27 = vpop.permute.xlu0 %957 }
 0x2a1   :  { %v963_v28 = vsel %vm513_vm1, %v958_v27, %v961_v25  ;;  %805 = vrot.lane.b32.xlu0 %v803_v24, %s5731_s2 }
 0x2a2   :  { %v965_v29 = vmul.f32 %v963_v28, %v6028_v60 }
 0x2a4   :  { %v940_v30 = vpop.permute.xlu0 %939 }
 0x2a5   :  { %967 = vrot.lane.b32.xlu0 %v965_v29, %s5742_s23 }
 0x2a8   :  { %v943_v31 = vpop.permute.xlu0 %942 }
 0x2a9   :  { %v945_v1 = vsel %vm513_vm1, %v940_v30, %v943_v31 }
 0x2aa   :  { %v950_v58 = vmul.f32 %v945_v1, %v6028_v60 }
 0x2ac   :  { %v1257_v32 = vpop.permute.xlu0 %1256 }
 0x2b0   :  { %v1254_v33 = vpop.permute.xlu0 %1253 }
 0x2b1   :  { %v1259_v34 = vsel %vm513_vm1, %v1254_v33, %v1257_v32 }
 0x2b2   :  { %v1261_v35 = vmul.f32 %v1259_v34, %v6028_v60 }
 0x2b4   :  { %1263 = vrot.lane.b32.xlu0 %v1261_v35, %s5741_s19  ;;  %v1242_v37 = vpop.permute.xlu0 %1241 }
 0x2b5   :  { %v1244_v38 = vsel %vm513_vm1, %v1239_v36, %v1242_v37 }
 0x2b6   :  { %v1246_v39 = vmul.f32 %v1244_v38, %v6028_v60 }
 0x2b8   :  { %1248 = vrot.lane.b32.xlu0 %v1246_v39, %s5741_s19  ;;  %v1402_v2 = vpop.permute.xlu0 %1401 }
 0x2bc   :  { %v1387_v3 = vpop.permute.xlu0 %1386 }
 0x2c0   :  { %v1546_v7 = vpop.permute.xlu0 %1545 }
 0x2c4   :  { %v1531_v13 = vpop.permute.xlu0 %1530 }
 0x30b   :  { %v673_v18 = vpop.permute.xlu0 %672 }
 0x30f   :  { %v6117_v25 = vpop.permute.xlu0 %799 }
 0x310   :  { %v802_v35 = vmul.f32 %v6117_v25, %v5964_v44  ;;  %v817_v37 = vmul.f32 %v6117_v25, %v5968_v46 }
 0x313   :  { %v806_v34 = vpop.permute.xlu0 %805 }
 0x314   :  { %v808_v39 = vadd.f32 %v806_v34, %v802_v35 }
 0x317   :  { %v968_v42 = vpop.permute.xlu0 %967 }
 0x326   :  { %v1264_v57 = vpop.permute.xlu0 %1263 }
 0x36c   :  { %v575_v45 = vpop.f32.mrb[4].mxu1 }
 0x36d   :  { %v581_v47 = vsel %vm6071_vm4, %v575_v45, -1e+30  ;;  %v4854_v48 = vpop.f32.mrb[5].mxu1 }
 0x36e   :  { %v578_v51 = vpop.f32.mrb[6].mxu1  ;;  %v583_v52 = vsel %vm582_vm5, %v581_v47, -inf  ;;  %v809_v48 = vmul.f32 0.17677669, %v808_v39 }
 0x36f   :  { %v4855_v56 = vpop.f32.mrb[7].mxu1  ;;  %584 = vmax.xlane.f32.xlu1 %v583_v52 }
 0x380   :  { %1398 = vrot.lane.b32.xlu1 %v6010_v55, %s5740_s22 }
 0x384   :  { %1383 = vrot.lane.b32.xlu1 %v5997_v54, %s5740_s22 }
 0x388   :  { %1542 = vrot.lane.b32.xlu1 %v6010_v55, %s5725_s20 }
 0x38c   :  { %1527 = vrot.lane.b32.xlu1 %v5997_v54, %s5725_s20 }
 0x390   :  { %651 = vrot.lane.b32.xlu1 %v6026_v59, %s5741_s19 }
 0x394   :  { %657 = vrot.lane.b32.xlu1 %v655_v61, %s5741_s19  ;;  %v824_v61 = vpack.c.bf16 %v809_v48, %v809_v48 }
 0x398   :  { %820 = vrot.lane.b32.xlu1 %v818_v63, %s5731_s2 }
 0x39c   :  { %946 = vrot.lane.b32.xlu1 %v6026_v59, %s5742_s23 }
 0x3a0   :  { %952 = vrot.lane.b32.xlu1 %v950_v58, %s5742_s23 }
 0x3fc   :  { %v585_v4 = vpop.xlane.xlu1 %584 }
 0x3fd   :  { %v586_v5 = vsub.f32 %v581_v47, %v585_v4  ;;  %v1249_v4 = vpop.permute.xlu0 %1248 }
 0x3ff   :  { %v587_v6 = vmul.f32 1.442695, %v586_v5 }
 0x400   :  { %v1399_v8 = vpop.permute.xlu1 %1398 }
 0x401   :  { %5393 = vpow2.f32 %v587_v6  ;;  %v1404_v9 = vsel %vm513_vm1, %v1399_v8, %v1402_v2  ;;  %v1405_v8 = vmul.f32 %v6117_v25, %v5977_v53 }
 0x402   :  { %v1406_v10 = vmul.f32 %v1404_v9, %v6028_v60 }
 0x404   :  { %v1384_v11 = vpop.permute.xlu1 %1383  ;;  %1408 = vrot.lane.b32.xlu0 %v1406_v10, %s5731_s2 }
 0x405   :  { %v1389_v12 = vsel %vm513_vm1, %v1384_v11, %v1387_v3 }
 0x406   :  { %v1391_v14 = vmul.f32 %v1389_v12, %v6028_v60 }
 0x408   :  { %v1543_v16 = vpop.permute.xlu1 %1542  ;;  %1393 = vrot.lane.b32.xlu0 %v1391_v14, %s5731_s2 }
 0x409   :  { %v1548_v17 = vsel %vm513_vm1, %v1543_v16, %v1546_v7 }
 0x40a   :  { %v1550_v19 = vmul.f32 %v1548_v17, %v6028_v60 }
 0x40b   :  { %v6110_v20 = vpop.eup %5393 }
 0x40c   :  { %v1528_v21 = vpop.permute.xlu1 %1527  ;;  %1552 = vrot.lane.b32.xlu0 %v1550_v19, %s5742_s23  ;;  %v589_v22 = vsel %vm582_vm5, %v6110_v20, 0.0 }
 0x40d   :  { %v1533_v23 = vsel %vm513_vm1, %v1528_v21, %v1531_v13  ;;  %590 = vadd.xlane.f32.xlu1 %v589_v22 }
 0x40e   :  { %v1535_v24 = vmul.f32 %v1533_v23, %v6028_v60 }
 0x410   :  { %v6119_v27 = vpop.permute.xlu1 %651  ;;  %1537 = vrot.lane.b32.xlu0 %v1535_v24, %s5742_s23 }
 0x411   :  { %v669_v28 = vmul.f32 %v6119_v27, %v5968_v46  ;;  %v654_v29 = vmul.f32 %v6119_v27, %v5964_v44  ;;  %v1260_v52 = vmul.f32 %v6119_v27, %v5977_v53  ;;  %v1245_v3 = vmul.f32 %v6119_v27, %v5971_v49 }
 0x413   :  { %v675_v30 = vadd.f32 %v673_v18, %v669_v28  ;;  %v1266_v63 = vadd.f32 %v1264_v57, %v1260_v52  ;;  %v1251_v6 = vadd.f32 %v1249_v4, %v1245_v3 }
 0x414   :  { %v658_v31 = vpop.permute.xlu1 %657 }
 0x415   :  { %v660_v32 = vadd.f32 %v658_v31, %v654_v29  ;;  %v677_v33 = vpack.c.bf16 %v675_v30, %v675_v30  ;;  %v1268_v1 = vpack.c.bf16 %v1266_v63, %v1266_v63  ;;  %v1252_v7 = vmul.f32 0.17677669, %v1251_v6 }
 0x417   :  { %v661_v36 = vmul.f32 0.17677669, %v660_v32  ;;  %682 = vrot.lane.b32.xlu0 %v677_v33, %s5742_s23 }
 0x418   :  { %v821_v38 = vpop.permute.xlu1 %820 }
 0x419   :  { %v676_v40 = vpack.c.bf16 %v661_v36, %v661_v36  ;;  %v823_v41 = vadd.f32 %v821_v38, %v817_v37 }
 0x41b   :  { %679 = vrot.lane.b32.xlu0 %v676_v40, %s5742_s23  ;;  %v825_v47 = vpack.c.bf16 %v823_v41, %v823_v41 }
 0x41c   :  { %v6132_v45 = vpop.permute.xlu1 %946 }
 0x41d   :  { %v964_v51 = vmul.f32 %v6132_v45, %v5968_v46  ;;  %v949_v58 = vmul.f32 %v6132_v45, %v5964_v44  ;;  %v1267_v44 = vpack.c.bf16 %v1252_v7, %v1252_v7  ;;  %v1549_v14 = vmul.f32 %v6132_v45, %v5977_v53 }
 0x41e   :  { %v1534_v22 = vmul.f32 %v6132_v45, %v5971_v49 }
 0x41f   :  { %830 = vrot.lane.b32.xlu0 %v825_v47, %s5731_s2  ;;  %v970_v56 = vadd.f32 %v968_v42, %v964_v51  ;;  %v1127_v42 = vmul.f32 %v5977_v53, %v6026_v59 }
 0x420   :  { %v953_v46 = vpop.permute.xlu1 %952 }
 0x421   :  { %v972_v62 = vpack.c.bf16 %v970_v56, %v970_v56  ;;  %v955_v2 = vadd.f32 %v953_v46, %v949_v58 }
 0x423   :  { %827 = vrot.lane.b32.xlu0 %v824_v61, %s5731_s2  ;;  %977 = vrot.lane.b32.xlu1 %v972_v62, %s5741_s19  ;;  %v956_v5 = vmul.f32 0.17677669, %v955_v2  ;;  %v1113_v62 = vmul.f32 %v5971_v49, %v6026_v59 }
 0x427   :  { %1119 = vrot.lane.b32.xlu0 %v6010_v55, %s5738_s25  ;;  %1273 = vrot.lane.b32.xlu1 %v1268_v1, %s5742_s23  ;;  %v971_v55 = vpack.c.bf16 %v956_v5, %v956_v5 }
 0x42b   :  { %1123 = vrot.lane.b32.xlu0 %v5977_v53, %s5725_s20 }
 0x42f   :  { %1105 = vrot.lane.b32.xlu0 %v5997_v54, %s5738_s25  ;;  %v1390_v54 = vmul.f32 %v6117_v25, %v5971_v49 }
 0x433   :  { %1109 = vrot.lane.b32.xlu0 %v5971_v49, %s5725_s20 }
 0x437   :  { %974 = vrot.lane.b32.xlu0 %v971_v55, %s5741_s19 }
 0x43b   :  { %1270 = vrot.lane.b32.xlu0 %v1267_v44, %s5742_s23 }
 0x476   :  { %v1409_v9 = vpop.permute.xlu0 %1408 }
 0x477   :  { %v1411_v10 = vadd.f32 %v1409_v9, %v1405_v8 }
 0x479   :  { %v1413_v11 = vpack.c.bf16 %v1411_v10, %v1411_v10 }
 0x47a   :  { %v1394_v12 = vpop.permute.xlu0 %1393 }
 0x47b   :  { %v1396_v13 = vadd.f32 %v1394_v12, %v1390_v54  ;;  %1418 = vrot.lane.b32.xlu1 %v1413_v11, %s5731_s2 }
 0x47d   :  { %v1397_v16 = vmul.f32 0.17677669, %v1396_v13 }
 0x47e   :  { %v1553_v17 = vpop.permute.xlu0 %1552 }
 0x47f   :  { %v1555_v18 = vadd.f32 %v1553_v17, %v1549_v14  ;;  %v1412_v19 = vpack.c.bf16 %v1397_v16, %v1397_v16 }
 0x481   :  { %v1557_v21 = vpack.c.bf16 %v1555_v18, %v1555_v18  ;;  %1415 = vrot.lane.b32.xlu0 %v1412_v19, %s5731_s2 }
 0x482   :  { %v1538_v23 = vpop.permute.xlu0 %1537 }
 0x483   :  { %v1540_v24 = vadd.f32 %v1538_v23, %v1534_v22  ;;  %1562 = vrot.lane.b32.xlu1 %v1557_v21, %s5741_s19 }
 0x485   :  { %v1541_v28 = vmul.f32 0.17677669, %v1540_v24 }
 0x487   :  { %v1556_v29 = vpack.c.bf16 %v1541_v28, %v1541_v28 }
 0x489   :  { %1559 = vrot.lane.b32.xlu0 %v1556_v29, %s5741_s19  ;;  %v683_v30 = vpop.permute.xlu0 %682 }
 0x48a   :  { %v688_v58 = vsel %vm534_vm2, %v683_v30, 0 }
 0x48d   :  { %v680_v31 = vpop.permute.xlu0 %679 }
 0x491   :  { %v831_v32 = vpop.permute.xlu0 %830 }
 0x492   :  { %v836_v33 = vsel %vm534_vm2, %v831_v32, 0 }
 0x493   :  { %4875 = vmatpush3.bf16.xpose.msra.mxu0 %v836_v33 }
 0x494   :  { %4886 = vmatprep.subr.bf16.mxu0 %v5735_v0 }
 0x495   :  { %v828_v34 = vpop.permute.xlu0 %827 }
 0x499   :  { %v1120_v35 = vpop.permute.xlu0 %1119 }
 0x49a   :  { %v591_v36 = vpop.xlane.xlu1 %590  ;;  %4877 = vmatmul.mubr.msk.bf16.vlgmr.msra.gmra.mrb[4].mxu0 %vm534_vm2, %v828_v34 }
 0x49b   :  { %5395 = vrcp.f32 %v591_v36  ;;  %4888 = vmatprep.mubr.msk.bf16.mxu0 %vm5737_vm0, %v5735_v0 }
 0x49d   :  { %v1124_v37 = vpop.permute.xlu0 %1123 }
 0x49e   :  { %v1126_v38 = vsel %vm513_vm1, %v1120_v35, %v1124_v37  ;;  %v978_v39 = vpop.permute.xlu1 %977 }
 0x49f   :  { %v1128_v40 = vmul.f32 %v1126_v38, %v6028_v60  ;;  %v983_v41 = vsel %vm534_vm2, %v978_v39, 0 }
 0x4a0   :  { %4887 = vmatpush3.bf16.xpose.msra.mxu0 %v983_v41 }
 0x4a1   :  { %v1106_v47 = vpop.permute.xlu0 %1105  ;;  %4898 = vmatprep.subr.bf16.mxu0 %v5735_v0  ;;  %v1129_v48 = vadd.f32 %v1128_v40, %v1127_v42 }
 0x4a2   :  { %v1274_v49 = vpop.permute.xlu1 %1273 }
 0x4a3   :  { %v1131_v56 = vpack.c.bf16 %v1129_v48, %v1129_v48 }
 0x4a5   :  { %v5396_v51 = vpop.eup %5395  ;;  %v1110_v52 = vpop.permute.xlu0 %1109  ;;  %v1136_v2 = vsel %vm534_vm2, %v1131_v56, 0 }
 0x4a6   :  { %v1112_v57 = vsel %vm513_vm1, %v1106_v47, %v1110_v52  ;;  %v593_v61 = vmul.f32 %v5396_v51, %v6110_v20 }
 0x4a7   :  { %v1114_v63 = vmul.f32 %v1112_v57, %v6028_v60  ;;  %v1279_v60 = vsel %vm534_vm2, %v1274_v49, 0 }
 0x4a8   :  { %v594_v1 = vpack.c.bf16 %v593_v61, %v593_v61 }
 0x4a9   :  { %v1115_v46 = vadd.f32 %v1114_v63, %v1113_v62  ;;  %v975_v53 = vpop.permute.xlu0 %974 }
 0x4aa   :  { %4859 = vmatmul.mubr.msk.bf16.vlgmr.msra.gmra.mrb[8].mxu1 %vm582_vm5, %v594_v1  ;;  %4889 = vmatmul.mubr.msk.bf16.vlgmr.msra.gmra.mrb[8].mxu0 %vm534_vm2, %v975_v53 }
 0x4ab   :  { %4863 = vmatpush3.bf16.xpose.msra.mxu1 %v688_v58  ;;  %4899 = vmatpush3.bf16.xpose.msra.mxu0 %v1136_v2  ;;  %v1116_v3 = vmul.f32 0.17677669, %v1115_v46 }
 0x4ac   :  { %4864 = vmatprep.mubr.msk.bf16.mxu1 %vm5737_vm0, %v5735_v0  ;;  %4900 = vmatprep.mubr.msk.bf16.mxu0 %vm5737_vm0, %v5735_v0 }
 0x4ad   :  { %4910 = vmatprep.subr.bf16.mxu0 %v5735_v0  ;;  %4868 = vmatprep.subr.bf16.mxu1 %v5735_v0  ;;  %v1130_v59 = vpack.c.bf16 %v1116_v3, %v1116_v3  ;;  %v1271_v20 = vpop.permute.xlu0 %1270 }
 0x4b2   :  { %4865 = vmatmul.mubr.msk.bf16.vlgmr.msra.gmra.mrb[12].mxu1 %vm534_vm2, %v680_v31  ;;  %4901 = vmatmul.mubr.msk.bf16.vlgmr.msra.gmra.mrb[12].mxu0 %vm534_vm2, %v1130_v59 }
 0x4b3   :  { %4911 = vmatpush3.bf16.xpose.msra.mxu0 %v1279_v60  ;;  %4912 = vmatprep.mubr.msk.bf16.mxu0 %vm5737_vm0, %v5735_v0 }
 0x4b4   :  { %4922 = vmatprep.subr.bf16.mxu0 %v5735_v0  ;;  %4870 = vmatprep.mubr.msk.bf16.mxu1 %vm5737_vm0, %v5735_v0 }
 0x4ba   :  { %4913 = vmatmul.mubr.msk.bf16.vlgmr.msra.gmra.mrb[16].mxu0 %vm534_vm2, %v1271_v20 }
 0x4bb   :  { %4924 = vmatprep.mubr.msk.bf16.mxu0 %vm5737_vm0, %v5735_v0 }
 0x4ed   :  { %v1419_v4 = vpop.permute.xlu1 %1418 }
 0x4ee   :  { %v1424_v5 = vsel %vm534_vm2, %v1419_v4, 0 }
 0x4ef   :  { %4923 = vmatpush3.bf16.xpose.msra.mxu0 %v1424_v5 }
 0x4f0   :  { %4934 = vmatprep.subr.bf16.mxu0 %v5735_v0 }
 0x4f3   :  { %v1416_v6 = vpop.permute.xlu0 %1415 }
 0x4f5   :  { %v1563_v55 = vpop.permute.xlu1 %1562 }
 0x4f6   :  { %v1568_v7 = vsel %vm534_vm2, %v1563_v55, 0  ;;  %4925 = vmatmul.mubr.msk.bf16.vlgmr.msra.gmra.mrb[20].mxu0 %vm534_vm2, %v1416_v6 }
 0x4f7   :  { %4935 = vmatpush3.bf16.xpose.msra.mxu0 %v1568_v7  ;;  %4936 = vmatprep.mubr.msk.bf16.mxu0 %vm5737_vm0, %v5735_v0 }
 0x4f8   :  { %4946 = vmatprep.subr.bf16.mxu0 %v5735_v0 }
 0x4fb   :  { %v1560_v44 = vpop.permute.xlu0 %1559 }
 0x4fe   :  { %4937 = vmatmul.mubr.msk.bf16.vlgmr.msra.gmra.mrb[24].mxu0 %vm534_vm2, %v1560_v44 }
 0x4ff   :  { %4962 = vmatprep.mubr.msk.bf16.mxu0 %vm5737_vm0, %v5735_v0 }
 0x56d   :  { %v872_v8 = vpop.f32.mrb[4].mxu0 }
 0x56e   :  { %v878_v9 = vsel %vm6071_vm4, %v872_v8, -1e+30  ;;  %v4878_v10 = vpop.f32.mrb[5].mxu0 }
 0x56f   :  { %v875_v54 = vpop.f32.mrb[6].mxu0  ;;  %v879_v11 = vsel %vm582_vm5, %v878_v9, -inf }
 0x570   :  { %880 = vmax.xlane.f32.xlu0 %v879_v11  ;;  %v4879_v12 = vpop.f32.mrb[7].mxu0 }
 0x57d   :  { %v6218_v13 = vpop.f32.mrb[8].mxu1  ;;  %v1019_v14 = vpop.f32.mrb[8].mxu0 }
 0x57e   :  { %v1025_v16 = vsel %vm6071_vm4, %v1019_v14, -1e+30  ;;  %v4860_v17 = vpop.f32.mrb[9].mxu1  ;;  %v4890_v18 = vpop.f32.mrb[9].mxu0 }
 0x57f   :  { %v640_v19 = vpop.f32.mrb[10].mxu1  ;;  %v1022_v21 = vpop.f32.mrb[10].mxu0  ;;  %v1026_v22 = vsel %vm582_vm5, %v1025_v16, -inf }
 0x580   :  { %v4861_v23 = vpop.f32.mrb[11].mxu1  ;;  %1027 = vmax.xlane.f32.xlu0 %v1026_v22  ;;  %v4891_v24 = vpop.f32.mrb[11].mxu0 }
 0x585   :  { %v724_v28 = vpop.f32.mrb[12].mxu1  ;;  %v1172_v29 = vpop.f32.mrb[12].mxu0 }
 0x586   :  { %v730_v30 = vsel %vm6071_vm4, %v724_v28, -1e+30  ;;  %v4866_v31 = vpop.f32.mrb[13].mxu1  ;;  %v4902_v32 = vpop.f32.mrb[13].mxu0  ;;  %v1178_v36 = vsel %vm6071_vm4, %v1172_v29, -1e+30 }
 0x587   :  { %v727_v33 = vpop.f32.mrb[14].mxu1  ;;  %v1175_v34 = vpop.f32.mrb[14].mxu0  ;;  %v731_v35 = vsel %vm582_vm5, %v730_v30, -inf  ;;  %v1179_v39 = vsel %vm582_vm5, %v1178_v36, -inf }
 0x588   :  { %732 = vmax.xlane.f32.xlu1 %v731_v35  ;;  %v4867_v37 = vpop.f32.mrb[15].mxu1  ;;  %v4903_v38 = vpop.f32.mrb[15].mxu0 }
 0x58c   :  { %1180 = vmax.xlane.f32.xlu1 %v1179_v39 }
 0x58d   :  { %v1315_v40 = vpop.f32.mrb[16].mxu0 }
 0x58e   :  { %v1321_v41 = vsel %vm6071_vm4, %v1315_v40, -1e+30  ;;  %v4914_v42 = vpop.f32.mrb[17].mxu0 }
 0x58f   :  { %v1318_v47 = vpop.f32.mrb[18].mxu0  ;;  %v1322_v48 = vsel %vm582_vm5, %v1321_v41, -inf }
 0x590   :  { %1323 = vmax.xlane.f32.xlu0 %v1322_v48  ;;  %v4915_v51 = vpop.f32.mrb[19].mxu0 }
 0x5c9   :  { %v1460_v52 = vpop.f32.mrb[20].mxu0 }
 0x5ca   :  { %v1466_v56 = vsel %vm6071_vm4, %v1460_v52, -1e+30  ;;  %v4926_v57 = vpop.f32.mrb[21].mxu0 }
 0x5cb   :  { %v1463_v61 = vpop.f32.mrb[22].mxu0  ;;  %v1467_v62 = vsel %vm582_vm5, %v1466_v56, -inf }
 0x5cc   :  { %1468 = vmax.xlane.f32.xlu1 %v1467_v62  ;;  %v4927_v63 = vpop.f32.mrb[23].mxu0 }
 0x5d1   :  { %v1604_v1 = vpop.f32.mrb[24].mxu0 }
 0x5d2   :  { %v1610_v46 = vsel %vm6071_vm4, %v1604_v1, -1e+30  ;;  %v4938_v53 = vpop.f32.mrb[25].mxu0 }
 0x5d3   :  { %v1607_v58 = vpop.f32.mrb[26].mxu0  ;;  %v1611_v2 = vsel %vm582_vm5, %v1610_v46, -inf }
 0x5d4   :  { %1612 = vmax.xlane.f32.xlu0 %v1611_v2  ;;  %v4939_v3 = vpop.f32.mrb[27].mxu0 }
 0x5fd   :  { %v881_v49 = vpop.xlane.xlu0 %880 }
 0x5fe   :  { %v882_v59 = vsub.f32 %v878_v9, %v881_v49 }
 0x600   :  { %v883_v60 = vmul.f32 1.442695, %v882_v59 }
 0x602   :  { %5397 = vpow2.f32 %v883_v60 }
 0x60c   :  { %v6238_v20 = vpop.eup %5397 }
 0x60d   :  { %v1028_v4 = vpop.xlane.xlu0 %1027  ;;  %v885_v5 = vsel %vm582_vm5, %v6238_v20, 0.0 }
 0x60e   :  { %v1029_v6 = vsub.f32 %v1025_v16, %v1028_v4  ;;  %886 = vadd.xlane.f32.xlu0 %v885_v5 }
 0x610   :  { %v1030_v55 = vmul.f32 1.442695, %v1029_v6 }
 0x612   :  { %5399 = vpow2.f32 %v1030_v55 }
 0x615   :  { %v733_v7 = vpop.xlane.xlu1 %732 }
 0x616   :  { %v734_v44 = vsub.f32 %v730_v30, %v733_v7 }
 0x618   :  { %v735_v8 = vmul.f32 1.442695, %v734_v44 }
 0x619   :  { %v1181_v10 = vpop.xlane.xlu1 %1180 }
 0x61a   :  { %5401 = vpow2.f32 %v735_v8  ;;  %v1182_v54 = vsub.f32 %v1178_v36, %v1181_v10 }
 0x61c   :  { %v6242_v11 = vpop.eup %5399  ;;  %v1183_v9 = vmul.f32 1.442695, %v1182_v54 }
 0x61d   :  { %v1324_v12 = vpop.xlane.xlu0 %1323  ;;  %v1032_v14 = vsel %vm582_vm5, %v6242_v11, 0.0 }
 0x61e   :  { %5403 = vpow2.f32 %v1183_v9  ;;  %v1325_v17 = vsub.f32 %v1321_v41, %v1324_v12  ;;  %1033 = vadd.xlane.f32.xlu1 %v1032_v14 }
 0x620   :  { %v1326_v16 = vmul.f32 1.442695, %v1325_v17 }
 0x622   :  { %5405 = vpow2.f32 %v1326_v16 }
 0x624   :  { %v5402_v18 = vpop.eup %5401 }
 0x625   :  { %v737_v19 = vsel %vm582_vm5, %v5402_v18, 0.0 }
 0x626   :  { %738 = vadd.xlane.f32.xlu1 %v737_v19  ;;  %v5189_v19 = vld [vmem:[#allocation10] sm:$0xff]  }
 0x627   :  { %4947 = vmatpush3.bf16.msra.mxu0 %v5189_v19  ;;  %v5200_v19 = vld [vmem:[#allocation11 + $0x8] ss:$16 sps:$4 sm:$0xff]  }
 0x628   :  { %v6247_v21 = vpop.eup %5403  ;;  %4948 = vmatprep.subr.bf16.mxu0 %v5735_v0 }
 0x629   :  { %v1185_v22 = vsel %vm582_vm5, %v6247_v21, 0.0 }
 0x62a   :  { %1186 = vadd.xlane.f32.xlu0 %v1185_v22  ;;  %v5191_v22 = vld [vmem:[#allocation10 + $0x10] sm:$0xff]  }
 0x62c   :  { %v6251_v23 = vpop.eup %5405 }
 0x62d   :  { %v1328_v24 = vsel %vm582_vm5, %v6251_v23, 0.0 }
 0x62e   :  { %1329 = vadd.xlane.f32.xlu0 %v1328_v24 }
 0x637   :  { %744 = vrot.lane.b32.xlu1 %v6046_v15, %s5742_s23 }
 0x644   :  { %891 = vrot.lane.b32.xlu0 %v6046_v15, %s5731_s2 }
 0x648   :  { %1038 = vrot.lane.b32.xlu0 %v6046_v15, %s5741_s19  ;;  %v1191_v15 = vpack.c.bf16 %v5973_v50, %v5973_v50 }
 0x64a   :  { %v1196_v49 = vsel %vm599_vm3, %v1191_v15, 0 }
 0x659   :  { %v1469_v28 = vpop.xlane.xlu1 %1468 }
 0x65a   :  { %v1470_v29 = vsub.f32 %v1466_v56, %v1469_v28 }
 0x65c   :  { %v1471_v30 = vmul.f32 1.442695, %v1470_v29 }
 0x65e   :  { %5407 = vpow2.f32 %v1471_v30 }
 0x661   :  { %v1613_v31 = vpop.xlane.xlu0 %1612 }
 0x662   :  { %v1614_v32 = vsub.f32 %v1610_v46, %v1613_v31 }
 0x664   :  { %v1615_v33 = vmul.f32 1.442695, %v1614_v32 }
 0x666   :  { %5409 = vpow2.f32 %v1615_v33 }
 0x668   :  { %v6261_v34 = vpop.eup %5407 }
 0x669   :  { %v1473_v35 = vsel %vm582_vm5, %v6261_v34, 0.0 }
 0x66a   :  { %1474 = vadd.xlane.f32.xlu1 %v1473_v35 }
 0x670   :  { %v6265_v36 = vpop.eup %5409 }
 0x671   :  { %v1617_v37 = vsel %vm582_vm5, %v6265_v36, 0.0 }
 0x672   :  { %1618 = vadd.xlane.f32.xlu0 %v1617_v37 }
 0x67b   :  { %1335 = vrot.lane.b32.xlu1 %v1191_v15, %s5742_s23 }
 0x67f   :  { %1623 = vrot.lane.b32.xlu1 %v1191_v15, %s5741_s19 }
 0x688   :  { %1479 = vrot.lane.b32.xlu0 %v1191_v15, %s5731_s2 }
 0x69b   :  { %v887_v39 = vpop.xlane.xlu0 %886 }
 0x6ab   :  { %v1034_v38 = vpop.xlane.xlu1 %1033 }
 0x6b3   :  { %v739_v40 = vpop.xlane.xlu1 %738 }
 0x6b4   :  { %5411 = vrcp.f32 %v739_v40 }
 0x6b5   :  { %5413 = vrcp.f32 %v887_v39 }
 0x6b6   :  { %5415 = vrcp.f32 %v1034_v38 }
 0x6b7   :  { %v745_v41 = vpop.permute.xlu1 %744  ;;  %v1187_v42 = vpop.xlane.xlu0 %1186 }
 0x6b8   :  { %v750_v47 = vsel %vm599_vm3, %v745_v41, 0  ;;  %5417 = vrcp.f32 %v1187_v42  ;;  %v5192_v41 = vld [vmem:[#allocation10 + $0x18] sm:$0xff]   ;;  %v5193_v42 = vld [vmem:[#allocation10 + $0x20] sm:$0xff]  }
 0x6b9   :  { %4869 = vmatpush3.bf16.msra.mxu1 %v750_v47  ;;  %v5194_v47 = vld [vmem:[#allocation10 + $0x28] sm:$0xff]  }
 0x6ba   :  { %4880 = vmatprep.subr.bf16.mxu1 %v5735_v0 }
 0x6bb   :  { %v1330_v48 = vpop.xlane.xlu0 %1329 }
 0x6bc   :  { %5419 = vrcp.f32 %v1330_v48 }
 0x6be   :  { %v5412_v50 = vpop.eup %5411 }
 0x6bf   :  { %v741_v51 = vmul.f32 %v5412_v50, %v5402_v18  ;;  %v892_v52 = vpop.permute.xlu0 %891  ;;  %v5414_v57 = vpop.eup %5413 }
 0x6c0   :  { %v897_v61 = vsel %vm599_vm3, %v892_v52, 0  ;;  %v889_v62 = vmul.f32 %v5414_v57, %v6238_v20  ;;  %v5416_v46 = vpop.eup %5415  ;;  %v5195_v52 = vld [vmem:[#allocation10 + $0x30] sm:$0xff]  }
 0x6c1   :  { %v742_v56 = vpack.c.bf16 %v741_v51, %v741_v51  ;;  %v1036_v58 = vmul.f32 %v5416_v46, %v6242_v11 }
 0x6c2   :  { %v890_v1 = vpack.c.bf16 %v889_v62, %v889_v62  ;;  %v5418_v3 = vpop.eup %5417 }
 0x6c3   :  { %4871 = vmatmul.mubr.msk.bf16.vlgmr.msra.gmra.mrb[16].mxu1 %vm582_vm5, %v742_v56  ;;  %v1039_v63 = vpop.permute.xlu0 %1038  ;;  %v1037_v2 = vpack.c.bf16 %v1036_v58, %v1036_v58  ;;  %v1189_v59 = vmul.f32 %v5418_v3, %v6247_v21  ;;  %v5190_v21 = vld [vmem:[#allocation10 + $0x8] sm:$0xff]  }
 0x6c4   :  { %4881 = vmatpush3.bf16.msra.mxu1 %v897_v61  ;;  %4882 = vmatprep.mubr.msk.bf16.mxu1 %vm5737_vm0, %v5735_v0  ;;  %v1044_v53 = vsel %vm599_vm3, %v1039_v63, 0  ;;  %v5196_v61 = vld [vmem:[#allocation10 + $0x38] sm:$0xff]  }
 0x6c5   :  { %4892 = vmatprep.subr.bf16.mxu1 %v5735_v0  ;;  %v1190_v60 = vpack.c.bf16 %v1189_v59, %v1189_v59  ;;  %4949 = vmatpush3.bf16.msra.mxu0 %v5190_v21  ;;  %v5202_v21 = vld [vmem:[#allocation11 + $0xc] ss:$16 sps:$4 sm:$0xff]  }
 0x6c6   :  { %v5420_v20 = vpop.eup %5419  ;;  %4950 = vmatprep.subr.bf16.mxu0 %v5735_v0 }
 0x6c7   :  { %v1332_v5 = vmul.f32 %v5420_v20, %v6251_v23 }
 0x6c9   :  { %v1333_v7 = vpack.c.bf16 %v1332_v5, %v1332_v5  ;;  %4951 = vmatpush3.bf16.msra.mxu0 %v5191_v22  ;;  %v5205_v22 = vld [vmem:[#allocation11 + $0x24] ss:$16 sps:$4 sm:$0xff]  }
 0x6ca   :  { %4952 = vmatprep.subr.bf16.mxu0 %v5735_v0 }
 0x6cb   :  { %4883 = vmatmul.mubr.msk.bf16.vlgmr.msra.gmra.mrb[20].mxu1 %vm582_vm5, %v890_v1 }
 0x6cc   :  { %4893 = vmatpush3.bf16.msra.mxu1 %v1044_v53  ;;  %4894 = vmatprep.mubr.msk.bf16.mxu1 %vm5737_vm0, %v5735_v0 }
 0x6cd   :  { %4904 = vmatprep.subr.bf16.mxu1 %v5735_v0  ;;  %4953 = vmatpush3.bf16.msra.mxu0 %v5192_v41  ;;  %v5217_v41 = vld [vmem:[#allocation11 + $0x64] ss:$16 sps:$4 sm:$0xff]  }
 0x6ce   :  { %4954 = vmatprep.subr.bf16.mxu0 %v5735_v0 }
 0x6d1   :  { %4955 = vmatpush3.bf16.msra.mxu0 %v5193_v42  ;;  %v5220_v42 = vld [vmem:[#allocation11 + $0x6c] ss:$16 sps:$4 sm:$0xff]  }
 0x6d2   :  { %4956 = vmatprep.subr.bf16.mxu0 %v5735_v0 }
 0x6d3   :  { %4895 = vmatmul.mubr.msk.bf16.vlgmr.msra.gmra.mrb[24].mxu1 %vm582_vm5, %v1037_v2 }
 0x6d4   :  { %4905 = vmatpush3.bf16.msra.mxu1 %v1196_v49  ;;  %4906 = vmatprep.mubr.msk.bf16.mxu1 %vm5737_vm0, %v5735_v0 }
 0x6d5   :  { %4916 = vmatprep.subr.bf16.mxu1 %v5735_v0  ;;  %4957 = vmatpush3.bf16.msra.mxu0 %v5194_v47  ;;  %v5215_v47 = vld [vmem:[#allocation11 + $0x60] ss:$16 sps:$4 sm:$0xff]  }
 0x6d6   :  { %4958 = vmatprep.subr.bf16.mxu0 %v5735_v0 }
 0x6d9   :  { %4959 = vmatpush3.bf16.msra.mxu0 %v5195_v52  ;;  %v5224_v52 = vld [vmem:[#allocation11 + $0x88] ss:$16 sps:$4 sm:$0xff]  }
 0x6da   :  { %4960 = vmatprep.subr.bf16.mxu0 %v5735_v0 }
 0x6db   :  { %4907 = vmatmul.mubr.msk.bf16.vlgmr.msra.gmra.mrb[28].mxu1 %vm582_vm5, %v1190_v60 }
 0x6dc   :  { %4918 = vmatprep.mubr.msk.bf16.mxu1 %vm5737_vm0, %v5735_v0 }
 0x6dd   :  { %4961 = vmatpush3.bf16.msra.mxu0 %v5196_v61  ;;  %v5232_v61 = vld [vmem:[#allocation11 + $0xac] ss:$16 sps:$4 sm:$0xff]  }
 0x6de   :  { %2004 = vmatprep.subr.bf16.mxu0 %v5202_v21  ;;  %v5250_v21 = vld [vmem:[#allocation13 + $0x10] sm:$0xff]  }
 0x6f7   :  { %v1475_v4 = vpop.xlane.xlu1 %1474 }
 0x6f8   :  { %5421 = vrcp.f32 %v1475_v4 }
 0x6fb   :  { %v1336_v6 = vpop.permute.xlu1 %1335 }
 0x6fc   :  { %v1341_v55 = vsel %vm599_vm3, %v1336_v6, 0 }
 0x6fd   :  { %4917 = vmatpush3.bf16.msra.mxu1 %v1341_v55 }
 0x6fe   :  { %4928 = vmatprep.subr.bf16.mxu1 %v5735_v0 }
 0x6ff   :  { %v1619_v44 = vpop.xlane.xlu0 %1618  ;;  %v1624_v9 = vpop.permute.xlu1 %1623 }
 0x700   :  { %5423 = vrcp.f32 %v1619_v44  ;;  %4919 = vmatmul.mubr.msk.bf16.vlgmr.msra.gmra.mrb[32].mxu1 %vm582_vm5, %v1333_v7  ;;  %v1629_v14 = vsel %vm599_vm3, %v1624_v9, 0 }
 0x701   :  { %4930 = vmatprep.mubr.msk.bf16.mxu1 %vm5737_vm0, %v5735_v0 }
 0x702   :  { %v5422_v8 = vpop.eup %5421 }
 0x703   :  { %v1480_v10 = vpop.permute.xlu0 %1479  ;;  %v1477_v54 = vmul.f32 %v5422_v8, %v6261_v34 }
 0x704   :  { %v1485_v11 = vsel %vm599_vm3, %v1480_v10, 0 }
 0x705   :  { %4929 = vmatpush3.bf16.msra.mxu1 %v1485_v11  ;;  %v1478_v12 = vpack.c.bf16 %v1477_v54, %v1477_v54 }
 0x706   :  { %4940 = vmatprep.subr.bf16.mxu1 %v5735_v0 }
 0x708   :  { %4931 = vmatmul.mubr.msk.bf16.vlgmr.msra.gmra.mrb[36].mxu1 %vm582_vm5, %v1478_v12 }
 0x709   :  { %4941 = vmatpush3.bf16.msra.mxu1 %v1629_v14  ;;  %4942 = vmatprep.mubr.msk.bf16.mxu1 %vm5737_vm0, %v5735_v0 }
 0x70a   :  { %v5424_v17 = vpop.eup %5423 }
 0x70b   :  { %v1621_v16 = vmul.f32 %v5424_v17, %v6265_v36 }
 0x70d   :  { %v1622_v18 = vpack.c.bf16 %v1621_v16, %v1621_v16  ;;  %v5197_v16 = vld [vmem:[#allocation11] ss:$16 sps:$4 sm:$0xff]  }
 0x710   :  { %4943 = vmatmul.mubr.msk.bf16.vlgmr.msra.gmra.mrb[40].mxu1 %vm582_vm5, %v1622_v18  ;;  %v5199_v18 = vld [vmem:[#allocation11 + $0x4] ss:$16 sps:$4 sm:$0xff]  }
 0x711   :  { %1993 = vmatprep.mubr.bf16.mxu1 %v5736_v26  ;;  %1961 = vmatprep.subr.bf16.mxu1 %v5199_v18  ;;  %v5248_v18 = vld [vmem:[#allocation13 + $0x8] sm:$0xff]  }
 0x712   :  { %1962 = vmatpush1.bf16.msra.mxu1 %v5197_v16  ;;  %v5247_v16 = vld [vmem:[#allocation13 + $0x48] sm:$0xff]  }
 0x713   :  { %1963 = vmatprep.subr.bf16.mxu1 %v5205_v22  ;;  %v5251_v22 = vld [vmem:[#allocation13 + $0x58] sm:$0xff]  }
 0x796   :  { %v786_v23 = vpop.f32.mrb[16].mxu1 }
 0x797   :  { %v4872_v24 = vpop.f32.mrb[17].mxu1 }
 0x798   :  { %v789_v28 = vpop.f32.mrb[18].mxu1  ;;  %v5206_v24 = vld [vmem:[#allocation11 + $0x28] ss:$16 sps:$4 sm:$0xff]  }
 0x799   :  { %v4873_v29 = vpop.f32.mrb[19].mxu1  ;;  %v5211_v28 = vld [vmem:[#allocation11 + $0x44] ss:$16 sps:$4 sm:$0xff]  }
 0x79a   :  { %v5214_v29 = vld [vmem:[#allocation11 + $0x4c] ss:$16 sps:$4 sm:$0xff]  }
 0x79e   :  { %v933_v30 = vpop.f32.mrb[20].mxu1 }
 0x79f   :  { %v4884_v31 = vpop.f32.mrb[21].mxu1 }
 0x7a0   :  { %v936_v32 = vpop.f32.mrb[22].mxu1  ;;  %v5212_v31 = vld [vmem:[#allocation11 + $0x48] ss:$16 sps:$4 sm:$0xff]  }
 0x7a1   :  { %v4885_v33 = vpop.f32.mrb[23].mxu1 }
 0x7a2   :  { %v5505_v33 = vld [vmem:[#allocation2] sm:$0xff] }
 0x7a6   :  { %v1080_v34 = vpop.f32.mrb[24].mxu1 }
 0x7a7   :  { %v4896_v35 = vpop.f32.mrb[25].mxu1 }
 0x7a8   :  { %v1083_v36 = vpop.f32.mrb[26].mxu1 }
 0x7a9   :  { %v4897_v37 = vpop.f32.mrb[27].mxu1 }
 0x7aa   :  { %v5506_v37 = vld [vmem:[#allocation2 + $0x8] sm:$0xff] }
 0x7ae   :  { %v1232_v15 = vpop.f32.mrb[28].mxu1 }
 0x7af   :  { %v4908_v38 = vpop.f32.mrb[29].mxu1 }
 0x7b0   :  { %v1235_v39 = vpop.f32.mrb[30].mxu1 }
 0x7b1   :  { %v4909_v40 = vpop.f32.mrb[31].mxu1 }
 0x7d3   :  { %v1377_v48 = vpop.f32.mrb[32].mxu1 }
 0x7d4   :  { %v5127_v50 = vpack.i.bf16 %v1377_v48, %v786_v23  ;;  %v4920_v51 = vpop.f32.mrb[33].mxu1  ;;  %v5203_v23 = vld [vmem:[#allocation11 + $0x20] ss:$16 sps:$4 sm:$0xff]   ;;  %v5218_v48 = vld [vmem:[#allocation11 + $0x68] ss:$16 sps:$4 sm:$0xff]  }
 0x7d5   :  { %v1380_v56 = vpop.f32.mrb[34].mxu1  ;;  %1964 = vmatpush1.bf16.msra.mxu1 %v5203_v23  ;;  %v5223_v51 = vld [vmem:[#allocation11 + $0x84] ss:$16 sps:$4 sm:$0xff]  }
 0x7d6   :  { %5128 = vrot.lane.b32.xlu1 %v5127_v50, %s5741_s19  ;;  %v4921_v57 = vpop.f32.mrb[35].mxu1  ;;  %1965 = vmatprep.subr.bf16.mxu1 %v5211_v28  ;;  %v5221_v50 = vld [vmem:[#allocation11 + $0x80] ss:$16 sps:$4 sm:$0xff]   ;;  %v5226_v56 = vld [vmem:[#allocation11 + $0x8c] ss:$16 sps:$4 sm:$0xff]  }
 0x7d7   :  { %v5229_v57 = vld [vmem:[#allocation11 + $0xa4] ss:$16 sps:$4 sm:$0xff]   ;;  %v5255_v28 = vld [vmem:[#allocation13 + $0x68] sm:$0xff]  }
 0x7d8   :  { %v5253_v23 = vld [vmem:[#allocation13 + $0x60] sm:$0xff]  }
 0x7db   :  { %v1521_v62 = vpop.f32.mrb[36].mxu1 }
 0x7dc   :  { %v5132_v63 = vpack.i.bf16 %v1521_v62, %v933_v30  ;;  %v4932_v1 = vpop.f32.mrb[37].mxu1  ;;  %v5209_v30 = vld [vmem:[#allocation11 + $0x40] ss:$16 sps:$4 sm:$0xff]  }
 0x7dd   :  { %v1524_v46 = vpop.f32.mrb[38].mxu1  ;;  %1966 = vmatpush1.bf16.msra.mxu1 %v5209_v30  ;;  %v5227_v62 = vld [vmem:[#allocation11 + $0xa0] ss:$16 sps:$4 sm:$0xff]   ;;  %v5235_v1 = vld [vmem:[#allocation11 + $0xc4] ss:$16 sps:$4 sm:$0xff]  }
 0x7de   :  { %5133 = vrot.lane.b32.xlu1 %v5132_v63, %s5731_s2  ;;  %v4933_v53 = vpop.f32.mrb[39].mxu1  ;;  %1967 = vmatprep.subr.bf16.mxu1 %v5217_v41  ;;  %v5230_v63 = vld [vmem:[#allocation11 + $0xa8] ss:$16 sps:$4 sm:$0xff]   ;;  %v5238_v46 = vld [vmem:[#allocation11 + $0xcc] ss:$16 sps:$4 sm:$0xff]   ;;  %v5257_v30 = vld [vmem:[#allocation13 + $0x70] sm:$0xff]  }
 0x7df   :  { %v5233_v53 = vld [vmem:[#allocation11 + $0xc0] ss:$16 sps:$4 sm:$0xff]  }
 0x7e1   :  { %1968 = vmatpush1.bf16.msra.mxu1 %v5215_v47 }
 0x7e2   :  { %1969 = vmatprep.subr.bf16.mxu1 %v5223_v51 }
 0x7e3   :  { %v1665_v58 = vpop.f32.mrb[40].mxu1 }
 0x7e4   :  { %v5137_v2 = vpack.i.bf16 %v1665_v58, %v1080_v34  ;;  %v4944_v3 = vpop.f32.mrb[41].mxu1  ;;  %v5236_v58 = vld [vmem:[#allocation11 + $0xc8] ss:$16 sps:$4 sm:$0xff]  }
 0x7e5   :  { %v1668_v49 = vpop.f32.mrb[42].mxu1  ;;  %1970 = vmatpush1.bf16.msra.mxu1 %v5221_v50  ;;  %v5244_v3 = vld [vmem:[#allocation11 + $0xec] ss:$16 sps:$4 sm:$0xff]  }
 0x7e6   :  { %5138 = vrot.lane.b32.xlu1 %v5137_v2, %s5742_s23  ;;  %v4945_v59 = vpop.f32.mrb[43].mxu1  ;;  %1971 = vmatprep.subr.bf16.mxu1 %v5229_v57  ;;  %v5241_v2 = vld [vmem:[#allocation11 + $0xe4] ss:$16 sps:$4 sm:$0xff]   ;;  %v5239_v49 = vld [vmem:[#allocation11 + $0xe0] ss:$16 sps:$4 sm:$0xff]  }
 0x7e7   :  { %v5242_v59 = vld [vmem:[#allocation11 + $0xe8] ss:$16 sps:$4 sm:$0xff]  }
 0x7e9   :  { %1972 = vmatpush1.bf16.msra.mxu1 %v5227_v62 }
 0x7ea   :  { %1973 = vmatprep.subr.bf16.mxu1 %v5235_v1 }
 0x7ed   :  { %1974 = vmatpush1.bf16.msra.mxu1 %v5233_v53 }
 0x7ee   :  { %1975 = vmatprep.subr.bf16.mxu1 %v5241_v2 }
 0x7f1   :  { %1976 = vmatpush1.bf16.msra.mxu1 %v5239_v49 }
 0x848   :  { %v5129_v60 = vpop.permute.xlu1 %5128 }
 0x849   :  { %v5131_v4 = vunpack.i.h.bf16 %v5129_v60  ;;  %v5130_v5 = vunpack.i.l.bf16 %v5129_v60 }
 0x84b   :  { %v1683_v44 = vsel %vm534_vm2, %v1232_v15, %v5131_v4  ;;  %v1098_v8 = vsel %vm534_vm2, %v6218_v13, %v5130_v5  ;;  %v5208_v13 = vld [vmem:[#allocation11 + $0x2c] ss:$16 sps:$4 sm:$0xff]  }
 0x850   :  { %v5134_v20 = vpop.permute.xlu1 %5133 }
 0x851   :  { %v5136_v6 = vunpack.i.h.bf16 %v5134_v20  ;;  %v5135_v55 = vunpack.i.l.bf16 %v5134_v20 }
 0x853   :  { %v1684_v11 = vsel %vm1099_vm6, %v1683_v44, %v5136_v6  ;;  %v1100_v9 = vsel %vm1099_vm6, %v1098_v8, %v5135_v55 }
 0x858   :  { %v5139_v7 = vpop.permute.xlu1 %5138 }
 0x859   :  { %v5141_v10 = vunpack.i.h.bf16 %v5139_v7  ;;  %v5140_v54 = vunpack.i.l.bf16 %v5139_v7 }
 0x85b   :  { %v1685_v12 = vsel %vm1101_vm7, %v1684_v11, %v5141_v10  ;;  %v1102_v14 = vsel %vm1101_vm7, %v1100_v9, %v5140_v54  ;;  %v4512_v10 = vld [vmem:[%s6762_s6] ss:$0 sm:$0xff] }
 0x85c   :  { %v1686_v17 = vpack.c.bf16 %v1685_v12, %v1102_v14  ;;  %v5245_v14 = vld [vmem:[#allocation13 + $0x40] sm:$0xff]  }
 0x85d   :  { %4736 = vmatprep.subr.bf16.mxu1 %v5245_v14 }
 0x85e   :  { %4963 = vmatmul.mubr.bf16.vlgmr.msra.gmra.mrb[28].mxu0 %v1686_v17  ;;  %v5246_v17 = vld [vmem:[#allocation13] sm:$0xff]  }
 0x85f   :  { %2036 = vmatprep.mubr.bf16.mxu0 %v5736_v26  ;;  %2005 = vmatpush1.bf16.msra.mxu0 %v5200_v19  ;;  %v5249_v19 = vld [vmem:[#allocation13 + $0x50] sm:$0xff]  }
 0x860   :  { %2006 = vmatprep.subr.bf16.mxu0 %v5208_v13  ;;  %v5252_v13 = vld [vmem:[#allocation13 + $0x18] sm:$0xff]  }
 0x863   :  { %2007 = vmatpush1.bf16.msra.mxu0 %v5206_v24  ;;  %v5254_v24 = vld [vmem:[#allocation13 + $0x20] sm:$0xff]  }
 0x864   :  { %2008 = vmatprep.subr.bf16.mxu0 %v5214_v29  ;;  %v5256_v29 = vld [vmem:[#allocation13 + $0x28] sm:$0xff]  }
 0x867   :  { %2009 = vmatpush1.bf16.msra.mxu0 %v5212_v31  ;;  %v5258_v31 = vld [vmem:[#allocation13 + $0x30] sm:$0xff]  }
 0x868   :  { %2010 = vmatprep.subr.bf16.mxu0 %v5220_v42 }
 0x86b   :  { %2011 = vmatpush1.bf16.msra.mxu0 %v5218_v48 }
 0x86c   :  { %2012 = vmatprep.subr.bf16.mxu0 %v5226_v56 }
 0x86f   :  { %2013 = vmatpush1.bf16.msra.mxu0 %v5224_v52 }
 0x870   :  { %2014 = vmatprep.subr.bf16.mxu0 %v5232_v61 }
 0x873   :  { %2015 = vmatpush1.bf16.msra.mxu0 %v5230_v63 }
 0x874   :  { %2016 = vmatprep.subr.bf16.mxu0 %v5238_v46 }
 0x877   :  { %2017 = vmatpush1.bf16.msra.mxu0 %v5236_v58 }
 0x878   :  { %2018 = vmatprep.subr.bf16.mxu0 %v5244_v3 }
 0x87b   :  { %2019 = vmatpush1.bf16.msra.mxu0 %v5242_v59 }
 0x931   :  { %v1769_v32 = vpop.f32.mrb[28].mxu0 }
 0x932   :  { %v6331_v34 = vadd.f32 %v5505_v33, %v1769_v32  ;;  %v4964_v35 = vpop.f32.mrb[29].mxu0  ;;  %v5259_v32 = vld [vmem:[#allocation13 + $0x78] sm:$0xff]  }
 0x933   :  { %v1772_v36 = vpop.f32.mrb[30].mxu0  ;;  %v5260_v33 = vld [vmem:[#allocation13 + $0x38] sm:$0xff]  }
 0x934   :  { %v6333_v15 = vadd.f32 %v5506_v37, %v1772_v36  ;;  %v4965_v38 = vpop.f32.mrb[31].mxu0  ;;  %v1778_v39 = vmul.f32 %v6331_v34, %v6331_v34 }
 0x936   :  { %1780 = vadd.xlane.f32.xlu0 %v1778_v39  ;;  %v1779_v40 = vmul.f32 %v6333_v15, %v6333_v15 }
 0x938   :  { %1782 = vadd.xlane.f32.xlu1 %v1779_v40 }
 0x9c3   :  { %v1781_v60 = vpop.xlane.xlu0 %1780 }
 0x9c4   :  { %v1784_v20 = vmul.f32 0.0078125, %v1781_v60 }
 0x9c5   :  { %v1783_v4 = vpop.xlane.xlu1 %1782 }
 0x9c6   :  { %v1786_v5 = vadd.f32 1e-06, %v1784_v20  ;;  %v1785_v6 = vmul.f32 0.0078125, %v1783_v4 }
 0x9c8   :  { %5425 = vrsqrt.f32 %v1786_v5  ;;  %v1787_v55 = vadd.f32 1e-06, %v1785_v6 }
 0x9ca   :  { %5427 = vrsqrt.f32 %v1787_v55 }
 0x9d2   :  { %v5426_v7 = vpop.eup %5425 }
 0x9d3   :  { %v1790_v44 = vmul.f32 %v5426_v7, %v6331_v34 }
 0x9d4   :  { %v5428_v8 = vpop.eup %5427 }
 0x9d5   :  { %v1791_v54 = vmul.f32 %v5428_v8, %v6333_v15  ;;  %v1798_v11 = vmul.f32 %v4512_v10, %v1790_v44  ;;  %v5261_v8 = vld [vmem:[#allocation8 + $0xc0] ss:$12 sps:$4 sm:$0xff]  }
 0x9d7   :  { %v1799_v9 = vmul.f32 %v4512_v10, %v1791_v54  ;;  %v5263_v10 = vld [vmem:[#allocation8 + $0xc4] ss:$12 sps:$4 sm:$0xff]   ;;  %v5264_v54 = vld [vmem:[#allocation8 + $0xc8] ss:$12 sps:$4 sm:$0xff]  }
 0x9d8   :  { %2491 = vmatprep.subr.bf16.mxu0 %v5263_v10 }
 0x9d9   :  { %v1800_v12 = vpack.c.bf16 %v1799_v9, %v1798_v11  ;;  %v5267_v11 = vld [vmem:[#allocation8 + $0xdc] ss:$12 sps:$4 sm:$0xff]   ;;  %v5268_v9 = vld [vmem:[#allocation8 + $0xe0] ss:$12 sps:$4 sm:$0xff]  }
 0x9db   :  { %1994 = vmatmul.mubr.bf16.vlgmr.msra.gmra.mrb[44].mxu1 %v1800_v12  ;;  %2037 = vmatmul.mubr.bf16.vlgmr.msra.gmra.mrb[32].mxu0 %v1800_v12  ;;  %v5265_v12 = vld [vmem:[#allocation8 + $0xd8] ss:$12 sps:$4 sm:$0xff]  }
 0x9dc   :  { %2523 = vmatprep.mubr.bf16.mxu0 %v5736_v26  ;;  %4737 = vmatpush3.bf16.msra.mxu1 %v5246_v17 }
 0x9dd   :  { %4738 = vmatprep.subr.bf16.mxu1 %v5247_v16  ;;  %2492 = vmatpush1.bf16.msra.mxu0 %v5261_v8 }
 0x9de   :  { %2493 = vmatprep.subr.bf16.mxu0 %v5267_v11 }
 0x9e0   :  { %4739 = vmatpush3.bf16.msra.mxu1 %v5248_v18 }
 0x9e1   :  { %4740 = vmatprep.subr.bf16.mxu1 %v5249_v19  ;;  %2494 = vmatpush1.bf16.msra.mxu0 %v5265_v12 }
 0x9e4   :  { %4741 = vmatpush3.bf16.msra.mxu1 %v5250_v21 }
 0x9e5   :  { %4742 = vmatprep.subr.bf16.mxu1 %v5251_v22 }
 0x9e8   :  { %4743 = vmatpush3.bf16.msra.mxu1 %v5252_v13 }
 0x9e9   :  { %4744 = vmatprep.subr.bf16.mxu1 %v5253_v23 }
 0x9ec   :  { %4745 = vmatpush3.bf16.msra.mxu1 %v5254_v24 }
 0x9ed   :  { %4746 = vmatprep.subr.bf16.mxu1 %v5255_v28  ;;  %v5271_v28 = vld [vmem:[#allocation8 + $0xf4] ss:$12 sps:$4 sm:$0xff]  }
 0x9ee   :  { %2495 = vmatprep.subr.bf16.mxu0 %v5271_v28 }
 0x9f0   :  { %4747 = vmatpush3.bf16.msra.mxu1 %v5256_v29  ;;  %v5269_v29 = vld [vmem:[#allocation8 + $0xf0] ss:$12 sps:$4 sm:$0xff]  }
 0x9f1   :  { %4748 = vmatprep.subr.bf16.mxu1 %v5257_v30  ;;  %v5272_v30 = vld [vmem:[#allocation8 + $0xf8] ss:$12 sps:$4 sm:$0xff]   ;;  %2496 = vmatpush1.bf16.msra.mxu0 %v5269_v29 }
 0x9f4   :  { %4749 = vmatpush3.bf16.msra.mxu1 %v5258_v31  ;;  %v5273_v31 = vld [vmem:[#allocation8 + $0x108] ss:$12 sps:$4 sm:$0xff]  }
 0x9f5   :  { %4750 = vmatprep.subr.bf16.mxu1 %v5259_v32  ;;  %v5277_v32 = vld [vmem:[#allocation8 + $0x120] ss:$12 sps:$4 sm:$0xff]  }
 0x9f8   :  { %4751 = vmatpush3.bf16.msra.mxu1 %v5260_v33  ;;  %v5279_v33 = vld [vmem:[#allocation8 + $0x124] ss:$12 sps:$4 sm:$0xff]  }
 0x9f9   :  { %4966 = vmatprep.subr.bf16.mxu1 %v5735_v0 }
 0xaae   :  { %v1995_v35 = vpop.f32.mrb[44].mxu1  ;;  %v2038_v36 = vpop.f32.mrb[32].mxu0 }
 0xaaf   :  { %v4545_v37 = vmul.f32 -1.442695, %v1995_v35  ;;  %v1997_v38 = vpop.f32.mrb[45].mxu1  ;;  %v2040_v39 = vpop.f32.mrb[33].mxu0 }
 0xab0   :  { %v4546_v40 = vmul.f32 -1.442695, %v1997_v38  ;;  %v1999_v41 = vpop.f32.mrb[46].mxu1  ;;  %v2042_v42 = vpop.f32.mrb[34].mxu0 }
 0xab1   :  { %5429 = vpow2.f32 %v4545_v37  ;;  %v4547_v47 = vmul.f32 -1.442695, %v1999_v41  ;;  %v2001_v48 = vpop.f32.mrb[47].mxu1  ;;  %v2044_v50 = vpop.f32.mrb[35].mxu0  ;;  %v5281_v37 = vld [vmem:[#allocation8 + $0x138] ss:$12 sps:$4 sm:$0xff]  }
 0xab2   :  { %5431 = vpow2.f32 %v4546_v40  ;;  %v4548_v51 = vmul.f32 -1.442695, %v2001_v48  ;;  %v5285_v40 = vld [vmem:[#allocation8 + $0x150] ss:$12 sps:$4 sm:$0xff]  }
 0xab3   :  { %5433 = vpow2.f32 %v4547_v47  ;;  %v5289_v47 = vld [vmem:[#allocation8 + $0x168] ss:$12 sps:$4 sm:$0xff]  }
 0xab4   :  { %5435 = vpow2.f32 %v4548_v51 }
 0xabb   :  { %v5430_v52 = vpop.eup %5429 }
 0xabc   :  { %v5432_v56 = vpop.eup %5431  ;;  %v2059_v57 = vadd.f32 1.0, %v5430_v52 }
 0xabd   :  { %v5434_v61 = vpop.eup %5433  ;;  %v2060_v62 = vadd.f32 1.0, %v5432_v56 }
 0xabe   :  { %v5436_v63 = vpop.eup %5435  ;;  %5437 = vrcp.f32 %v2059_v57  ;;  %v2061_v1 = vadd.f32 1.0, %v5434_v61 }
 0xabf   :  { %5439 = vrcp.f32 %v2060_v62  ;;  %v2062_v46 = vadd.f32 1.0, %v5436_v63 }
 0xac0   :  { %5441 = vrcp.f32 %v2061_v1 }
 0xac1   :  { %5443 = vrcp.f32 %v2062_v46  ;;  %v4567_v46 = vld [vmem:[%s6759_s3 + $0x1] ss:$0 sm:$0xff] }
 0xac8   :  { %v5438_v53 = vpop.eup %5437 }
 0xac9   :  { %v5440_v58 = vpop.eup %5439  ;;  %v2071_v2 = vmul.f32 %v5438_v53, %v1995_v35  ;;  %v5280_v35 = vld [vmem:[#allocation8 + $0x128] ss:$12 sps:$4 sm:$0xff]  }
 0xaca   :  { %v5442_v3 = vpop.eup %5441  ;;  %v2072_v49 = vmul.f32 %v5440_v58, %v1997_v38  ;;  %v5284_v38 = vld [vmem:[#allocation8 + $0x140] ss:$12 sps:$4 sm:$0xff]  }
 0xacb   :  { %v5444_v59 = vpop.eup %5443  ;;  %v2075_v60 = vmul.f32 %v2071_v2, %v2038_v36  ;;  %v2073_v20 = vmul.f32 %v5442_v3, %v1999_v41  ;;  %v5283_v36 = vld [vmem:[#allocation8 + $0x13c] ss:$12 sps:$4 sm:$0xff]   ;;  %v5288_v41 = vld [vmem:[#allocation8 + $0x158] ss:$12 sps:$4 sm:$0xff]  }
 0xacc   :  { %v2076_v4 = vmul.f32 %v2072_v49, %v2040_v39  ;;  %v2074_v5 = vmul.f32 %v5444_v59, %v2001_v48  ;;  %v5287_v39 = vld [vmem:[#allocation8 + $0x154] ss:$12 sps:$4 sm:$0xff]   ;;  %v5292_v48 = vld [vmem:[#allocation8 + $0x170] ss:$12 sps:$4 sm:$0xff]  }
 0xacd   :  { %v2077_v6 = vmul.f32 %v2073_v20, %v2042_v42  ;;  %v5291_v42 = vld [vmem:[#allocation8 + $0x16c] ss:$12 sps:$4 sm:$0xff]  }
 0xace   :  { %v2078_v55 = vmul.f32 %v2074_v5, %v2044_v50 }
 0xacf   :  { %v2079_v7 = vpack.c.bf16 %v2077_v6, %v2075_v60 }
 0xad0   :  { %v2080_v44 = vpack.c.bf16 %v2078_v55, %v2076_v4 }
 0xad2   :  { %2209 = vmatprep.mubr.bf16.mxu1 %v2080_v44 }
 0xad3   :  { %2210 = vmatmul.mubr.bf16.vlgmr.msra.gmra.mrb[48].mxu1 %v2079_v7 }
 0xad4   :  { %4982 = vmatprep.mubr.msk.bf16.mxu1 %vm5737_vm0, %v5735_v0  ;;  %4967 = vmatpush3.bf16.msra.mxu1 %v5264_v54 }
 0xad5   :  { %4968 = vmatprep.subr.bf16.mxu1 %v5735_v0 }
 0xad8   :  { %4969 = vmatpush3.bf16.msra.mxu1 %v5268_v9 }
 0xad9   :  { %4970 = vmatprep.subr.bf16.mxu1 %v5735_v0 }
 0xadc   :  { %4971 = vmatpush3.bf16.msra.mxu1 %v5272_v30 }
 0xadd   :  { %4972 = vmatprep.subr.bf16.mxu1 %v5735_v0 }
 0xba6   :  { %v4752_v14 = vpop.f32.mrb[48].mxu1 }
 0xba7   :  { %v4753_v17 = vpop.f32.mrb[49].mxu1 }
 0xba8   :  { %v4754_v16 = vadd.f32 %v4753_v17, %v4752_v14  ;;  %v4755_v18 = vpop.f32.mrb[50].mxu1 }
 0xba9   :  { %v4756_v19 = vpop.f32.mrb[51].mxu1 }
 0xbaa   :  { %v6351_v21 = vadd.f32 %v4754_v16, %v6331_v34  ;;  %v4757_v22 = vadd.f32 %v4756_v19, %v4755_v18  ;;  %v5275_v34 = vld [vmem:[#allocation8 + $0x10c] ss:$12 sps:$4 sm:$0xff]  }
 0xbab   :  { %2497 = vmatprep.subr.bf16.mxu0 %v5275_v34  ;;  %v6452_v18 = vld [vmem:[#allocation7] sm:$0xff] }
 0xbac   :  { %v6354_v13 = vadd.f32 %v4757_v22, %v6333_v15  ;;  %v2340_v23 = vmul.f32 %v6351_v21, %v6351_v21  ;;  %v5276_v15 = vld [vmem:[#allocation8 + $0x110] ss:$12 sps:$4 sm:$0xff]   ;;  %2498 = vmatpush1.bf16.msra.mxu0 %v5273_v31 }
 0xbad   :  { %4973 = vmatpush3.bf16.msra.mxu1 %v5276_v15  ;;  %2499 = vmatprep.subr.bf16.mxu0 %v5279_v33 }
 0xbae   :  { %2342 = vadd.xlane.f32.xlu0 %v2340_v23  ;;  %v2341_v24 = vmul.f32 %v6354_v13, %v6354_v13  ;;  %4974 = vmatprep.subr.bf16.mxu1 %v5735_v0 }
 0xbb0   :  { %2500 = vmatpush1.bf16.msra.mxu0 %v5277_v32 }
 0xbb1   :  { %4975 = vmatpush3.bf16.msra.mxu1 %v5280_v35  ;;  %2501 = vmatprep.subr.bf16.mxu0 %v5283_v36 }
 0xbb2   :  { %2344 = vadd.xlane.f32.xlu0 %v2341_v24  ;;  %4976 = vmatprep.subr.bf16.mxu1 %v5735_v0 }
 0xbb4   :  { %2502 = vmatpush1.bf16.msra.mxu0 %v5281_v37 }
 0xbb5   :  { %4977 = vmatpush3.bf16.msra.mxu1 %v5284_v38  ;;  %2503 = vmatprep.subr.bf16.mxu0 %v5287_v39 }
 0xbb6   :  { %4978 = vmatprep.subr.bf16.mxu1 %v5735_v0 }
 0xbb8   :  { %2504 = vmatpush1.bf16.msra.mxu0 %v5285_v40 }
 0xbb9   :  { %4979 = vmatpush3.bf16.msra.mxu1 %v5288_v41  ;;  %2505 = vmatprep.subr.bf16.mxu0 %v5291_v42 }
 0xbba   :  { %4980 = vmatprep.subr.bf16.mxu1 %v5735_v0 }
 0xbbc   :  { %2506 = vmatpush1.bf16.msra.mxu0 %v5289_v47 }
 0xbbd   :  { %4981 = vmatpush3.bf16.msra.mxu1 %v5292_v48  ;;  %4986 = vmatprep.subr.bf16.mxu0 %v5735_v0 }
 0xbbe   :  { %4992 = vmatprep.subr.bf16.mxu1 %v5735_v0 }
 0xc3b   :  { %v2343_v50 = vpop.xlane.xlu0 %2342 }
 0xc3c   :  { %v2346_v51 = vmul.f32 0.0078125, %v2343_v50 }
 0xc3e   :  { %v2348_v52 = vadd.f32 1e-06, %v2346_v51 }
 0xc3f   :  { %v2345_v56 = vpop.xlane.xlu0 %2344 }
 0xc40   :  { %5445 = vrsqrt.f32 %v2348_v52  ;;  %v2347_v57 = vmul.f32 0.0078125, %v2345_v56 }
 0xc42   :  { %v2349_v61 = vadd.f32 1e-06, %v2347_v57 }
 0xc44   :  { %5447 = vrsqrt.f32 %v2349_v61 }
 0xc4a   :  { %v5446_v62 = vpop.eup %5445 }
 0xc4b   :  { %v2352_v63 = vmul.f32 %v5446_v62, %v6351_v21 }
 0xc4d   :  { %v2360_v58 = vmul.f32 %v4567_v46, %v2352_v63 }
 0xc4e   :  { %v5448_v1 = vpop.eup %5447 }
 0xc4f   :  { %v2353_v53 = vmul.f32 %v5448_v1, %v6354_v13 }
 0xc51   :  { %v2361_v2 = vmul.f32 %v4567_v46, %v2353_v53 }
 0xc53   :  { %v2362_v3 = vpack.c.bf16 %v2361_v2, %v2360_v58 }
 0xc55   :  { %2524 = vmatmul.mubr.bf16.vlgmr.msra.gmra.mrb[36].mxu0 %v2362_v3  ;;  %4983 = vmatmul.mubr.bf16.vlgmr.msra.gmra.mrb[52].mxu1 %v2362_v3 }
 0xc56   :  { %4988 = vmatprep.mubr.msk.bf16.mxu0 %vm5737_vm0, %v5735_v0  ;;  %4994 = vmatprep.mubr.msk.bf16.mxu1 %vm5737_vm0, %v5735_v0 }
 0xd28   :  { %v6376_v49 = vpop.f32.mrb[36].mxu0  ;;  %v2568_v59 = vpop.f32.mrb[52].mxu1 }
 0xd29   :  { %v6378_v60 = vpack.c.bf16 %v2568_v59, %v2568_v59  ;;  %v6380_v20 = vpop.f32.mrb[37].mxu0  ;;  %v4984_v4 = vpop.f32.mrb[53].mxu1  ;;  %v6383_v5 = vsub.f32 0.0, %v6376_v49 }
 0xd2a   :  { %v6385_v6 = vpop.f32.mrb[54].mxu1  ;;  %2728 = vrot.lane.b32.xlu0 %v6380_v20, %s5738_s25  ;;  %v6389_v55 = vpop.f32.mrb[38].mxu0  ;;  %v6398_v10 = vsub.f32 0.0, %v6380_v20 }
 0xd2b   :  { %v4985_v7 = vpop.f32.mrb[55].mxu1  ;;  %2710 = vrot.lane.b32.xlu1 %v6383_v5, %s5739_s1  ;;  %v6393_v44 = vpop.f32.mrb[39].mxu0  ;;  %v2668_v8 = vsel %vm599_vm3, %v6378_v60, 0  ;;  %v6425_v11 = vsub.f32 0.0, %v6389_v55 }
 0xd2c   :  { %4993 = vmatpush3.bf16.msra.mxu1 %v2668_v8  ;;  %v6418_v54 = vsub.f32 0.0, %v6393_v44 }
 0xd2d   :  { %5004 = vmatprep.subr.bf16.mxu1 %v5735_v0 }
 0xd2e   :  { %2870 = vrot.lane.b32.xlu0 %v6398_v10, %s5740_s22 }
 0xd2f   :  { %2725 = vrot.lane.b32.xlu1 %v6398_v10, %s5739_s1 }
 0xd32   :  { %2855 = vrot.lane.b32.xlu0 %v6383_v5, %s5740_s22 }
 0xd33   :  { %2713 = vrot.lane.b32.xlu1 %v6376_v49, %s5738_s25 }
 0xd36   :  { %3014 = vrot.lane.b32.xlu0 %v6398_v10, %s5725_s20 }
 0xd37   :  { %2873 = vrot.lane.b32.xlu1 %v6380_v20, %s5739_s1 }
 0xd3a   :  { %2999 = vrot.lane.b32.xlu0 %v6383_v5, %s5725_s20 }
 0xd3b   :  { %2858 = vrot.lane.b32.xlu1 %v6376_v49, %s5739_s1 }
 0xd3e   :  { %3308 = vrot.lane.b32.xlu0 %v6418_v54, %s5739_s1 }
 0xd3f   :  { %3017 = vrot.lane.b32.xlu1 %v6380_v20, %s5740_s22 }
 0xd42   :  { %3293 = vrot.lane.b32.xlu0 %v6425_v11, %s5739_s1 }
 0xd43   :  { %3002 = vrot.lane.b32.xlu1 %v6376_v49, %s5740_s22 }
 0xd46   :  { %3453 = vrot.lane.b32.xlu0 %v6418_v54, %s5740_s22 }
 0xd47   :  { %3311 = vrot.lane.b32.xlu1 %v6393_v44, %s5738_s25 }
 0xd4a   :  { %3438 = vrot.lane.b32.xlu0 %v6425_v11, %s5740_s22 }
 0xd4b   :  { %3296 = vrot.lane.b32.xlu1 %v6389_v55, %s5738_s25 }
 0xd4e   :  { %3597 = vrot.lane.b32.xlu0 %v6418_v54, %s5725_s20 }
 0xd4f   :  { %3456 = vrot.lane.b32.xlu1 %v6393_v44, %s5739_s1 }
 0xd52   :  { %3582 = vrot.lane.b32.xlu0 %v6425_v11, %s5725_s20 }
 0xd53   :  { %3441 = vrot.lane.b32.xlu1 %v6389_v55, %s5739_s1 }
 0xd57   :  { %3600 = vrot.lane.b32.xlu1 %v6393_v44, %s5740_s22 }
 0xd5b   :  { %3585 = vrot.lane.b32.xlu1 %v6389_v55, %s5740_s22 }
 0xd9c   :  { %v2729_v9 = vpop.permute.xlu0 %2728 }
 0xd9d   :  { %v2711_v12 = vpop.permute.xlu1 %2710 }
 0xda0   :  { %v2871_v14 = vpop.permute.xlu0 %2870 }
 0xda1   :  { %v2726_v17 = vpop.permute.xlu1 %2725 }
 0xda2   :  { %v2731_v16 = vsel %vm513_vm1, %v2726_v17, %v2729_v9 }
 0xda3   :  { %v2733_v19 = vmul.f32 %v6452_v18, %v2731_v16 }
 0xda4   :  { %v2856_v22 = vpop.permute.xlu0 %2855 }
 0xda5   :  { %v2714_v23 = vpop.permute.xlu1 %2713  ;;  %2735 = vrot.lane.b32.xlu0 %v2733_v19, %s5741_s19 }
 0xda6   :  { %v2716_v24 = vsel %vm513_vm1, %v2711_v12, %v2714_v23 }
 0xda7   :  { %v2718_v28 = vmul.f32 %v6452_v18, %v2716_v24 }
 0xda8   :  { %v3015_v29 = vpop.permute.xlu0 %3014 }
 0xda9   :  { %v2874_v30 = vpop.permute.xlu1 %2873  ;;  %2720 = vrot.lane.b32.xlu1 %v2718_v28, %s5741_s19  ;;  %v2877_v28 = vmul.f32 %v6380_v20, %v6117_v25 }
 0xdaa   :  { %v2876_v34 = vsel %vm513_vm1, %v2871_v14, %v2874_v30  ;;  %v2732_v14 = vmul.f32 %v6380_v20, %v6119_v27 }
 0xdab   :  { %v2878_v31 = vmul.f32 %v6452_v18, %v2876_v34 }
 0xdac   :  { %v3000_v15 = vpop.permute.xlu0 %2999 }
 0xdad   :  { %v2859_v32 = vpop.permute.xlu1 %2858  ;;  %2880 = vrot.lane.b32.xlu0 %v2878_v31, %s5731_s2 }
 0xdae   :  { %v2861_v33 = vsel %vm513_vm1, %v2856_v22, %v2859_v32  ;;  %v2717_v22 = vmul.f32 %v6376_v49, %v6119_v27 }
 0xdaf   :  { %v2863_v35 = vmul.f32 %v6452_v18, %v2861_v33 }
 0xdb0   :  { %v3309_v36 = vpop.permute.xlu0 %3308 }
 0xdb1   :  { %v3018_v37 = vpop.permute.xlu1 %3017  ;;  %2865 = vrot.lane.b32.xlu1 %v2863_v35, %s5731_s2 }
 0xdb2   :  { %v3020_v38 = vsel %vm513_vm1, %v3015_v29, %v3018_v37 }
 0xdb3   :  { %v3022_v39 = vmul.f32 %v6452_v18, %v3020_v38 }
 0xdb4   :  { %v3294_v42 = vpop.permute.xlu0 %3293 }
 0xdb5   :  { %v3003_v40 = vpop.permute.xlu1 %3002  ;;  %3024 = vrot.lane.b32.xlu0 %v3022_v39, %s5742_s23 }
 0xdb6   :  { %v3005_v41 = vsel %vm513_vm1, %v3000_v15, %v3003_v40  ;;  %v2862_v15 = vmul.f32 %v6376_v49, %v6117_v25 }
 0xdb7   :  { %v3007_v47 = vmul.f32 %v6452_v18, %v3005_v41  ;;  %v3006_v41 = vmul.f32 %v6376_v49, %v6132_v45 }
 0xdb8   :  { %v3454_v52 = vpop.permute.xlu0 %3453 }
 0xdb9   :  { %3009 = vrot.lane.b32.xlu1 %v3007_v47, %s5742_s23  ;;  %v3312_v48 = vpop.permute.xlu1 %3311 }
 0xdba   :  { %v3314_v50 = vsel %vm513_vm1, %v3309_v36, %v3312_v48  ;;  %v3021_v36 = vmul.f32 %v6380_v20, %v6132_v45 }
 0xdbb   :  { %v3316_v51 = vmul.f32 %v6452_v18, %v3314_v50 }
 0xdbc   :  { %v3439_v1 = vpop.permute.xlu0 %3438 }
 0xdbd   :  { %v3297_v56 = vpop.permute.xlu1 %3296  ;;  %3318 = vrot.lane.b32.xlu0 %v3316_v51, %s5741_s19  ;;  %v3315_v51 = vmul.f32 %v6393_v44, %v6119_v27 }
 0xdbe   :  { %v3299_v57 = vsel %vm513_vm1, %v3294_v42, %v3297_v56  ;;  %v3300_v56 = vmul.f32 %v6389_v55, %v6119_v27  ;;  %v3445_v27 = vmul.f32 %v6389_v55, %v6117_v25 }
 0xdbf   :  { %v3301_v61 = vmul.f32 %v6452_v18, %v3299_v57 }
 0xdc0   :  { %v3598_v3 = vpop.permute.xlu0 %3597 }
 0xdc1   :  { %v3457_v62 = vpop.permute.xlu1 %3456  ;;  %3303 = vrot.lane.b32.xlu1 %v3301_v61, %s5741_s19 }
 0xdc2   :  { %v3459_v63 = vsel %vm513_vm1, %v3454_v52, %v3457_v62 }
 0xdc3   :  { %v3461_v46 = vmul.f32 %v6452_v18, %v3459_v63  ;;  %v3460_v63 = vmul.f32 %v6393_v44, %v6117_v25 }
 0xdc4   :  { %v3583_v9 = vpop.permute.xlu0 %3582 }
 0xdc5   :  { %v3442_v53 = vpop.permute.xlu1 %3441  ;;  %3463 = vrot.lane.b32.xlu0 %v3461_v46, %s5731_s2 }
 0xdc6   :  { %v3444_v58 = vsel %vm513_vm1, %v3439_v1, %v3442_v53 }
 0xdc7   :  { %v3446_v2 = vmul.f32 %v6452_v18, %v3444_v58 }
 0xdc9   :  { %v3601_v59 = vpop.permute.xlu1 %3600  ;;  %2591 = vrot.lane.b32.xlu0 %v6398_v10, %s5738_s25  ;;  %3448 = vrot.lane.b32.xlu1 %v3446_v2, %s5731_s2 }
 0xdca   :  { %v3603_v4 = vsel %vm513_vm1, %v3598_v3, %v3601_v59 }
 0xdcb   :  { %v3605_v7 = vmul.f32 %v6452_v18, %v3603_v4 }
 0xdcd   :  { %v3586_v8 = vpop.permute.xlu1 %3585  ;;  %2595 = vrot.lane.b32.xlu1 %v6380_v20, %s5725_s20  ;;  %3607 = vrot.lane.b32.xlu0 %v3605_v7, %s5742_s23  ;;  %v3604_v7 = vmul.f32 %v6393_v44, %v6132_v45 }
 0xdce   :  { %v3588_v12 = vsel %vm513_vm1, %v3583_v9, %v3586_v8 }
 0xdcf   :  { %v3590_v10 = vmul.f32 %v6452_v18, %v3588_v12 }
 0xdd1   :  { %2577 = vrot.lane.b32.xlu1 %v6383_v5, %s5738_s25  ;;  %2581 = vrot.lane.b32.xlu0 %v6376_v49, %s5725_s20 }
 0xdd5   :  { %3592 = vrot.lane.b32.xlu1 %v3590_v10, %s5742_s23 }
 0xe17   :  { %v2736_v17 = vpop.permute.xlu0 %2735 }
 0xe18   :  { %v2738_v16 = vadd.f32 %v2736_v17, %v2732_v14  ;;  %v5508_v17 = vld [vmem:[#allocation5] sm:$0xff] }
 0xe1a   :  { %v2740_v19 = vpack.c.bf16 %v2738_v16, %v2738_v16  ;;  %v2599_v16 = vmul.f32 %v5508_v17, %v6380_v20  ;;  %v3589_v20 = vmul.f32 %v6389_v55, %v6132_v45 }
 0xe1b   :  { %v2721_v23 = vpop.permute.xlu1 %2720 }
 0xe1c   :  { %v2723_v24 = vadd.f32 %v2721_v23, %v2717_v22  ;;  %2745 = vrot.lane.b32.xlu0 %v2740_v19, %s5742_s23 }
 0xe1e   :  { %v2724_v5 = vmul.f32 0.17677669, %v2723_v24 }
 0xe1f   :  { %v2881_v29 = vpop.permute.xlu0 %2880 }
 0xe20   :  { %v2739_v30 = vpack.c.bf16 %v2724_v5, %v2724_v5  ;;  %v2883_v34 = vadd.f32 %v2881_v29, %v2877_v28  ;;  %v2585_v29 = vmul.f32 %v5508_v17, %v6376_v49 }
 0xe22   :  { %v2885_v31 = vpack.c.bf16 %v2883_v34, %v2883_v34  ;;  %2742 = vrot.lane.b32.xlu1 %v2739_v30, %s5742_s23 }
 0xe23   :  { %v2866_v32 = vpop.permute.xlu1 %2865 }
 0xe24   :  { %v2868_v33 = vadd.f32 %v2866_v32, %v2862_v15  ;;  %2890 = vrot.lane.b32.xlu0 %v2885_v31, %s5731_s2 }
 0xe26   :  { %v2869_v35 = vmul.f32 0.17677669, %v2868_v33  ;;  %3174 = vrot.lane.b32.xlu1 %v6418_v54, %s5738_s25 }
 0xe27   :  { %v3025_v37 = vpop.permute.xlu0 %3024 }
 0xe28   :  { %v2884_v38 = vpack.c.bf16 %v2869_v35, %v2869_v35  ;;  %v3027_v39 = vadd.f32 %v3025_v37, %v3021_v36 }
 0xe2a   :  { %v3029_v40 = vpack.c.bf16 %v3027_v39, %v3027_v39  ;;  %2887 = vrot.lane.b32.xlu1 %v2884_v38, %s5731_s2 }
 0xe2b   :  { %v3010_v42 = vpop.permute.xlu1 %3009 }
 0xe2c   :  { %v3012_v47 = vadd.f32 %v3010_v42, %v3006_v41  ;;  %3034 = vrot.lane.b32.xlu0 %v3029_v40, %s5741_s19 }
 0xe2e   :  { %v3013_v48 = vmul.f32 0.17677669, %v3012_v47  ;;  %3160 = vrot.lane.b32.xlu1 %v6425_v11, %s5738_s25 }
 0xe2f   :  { %v3319_v54 = vpop.permute.xlu0 %3318 }
 0xe30   :  { %v3028_v50 = vpack.c.bf16 %v3013_v48, %v3013_v48  ;;  %3178 = vrot.lane.b32.xlu0 %v6393_v44, %s5725_s20  ;;  %v3321_v52 = vadd.f32 %v3319_v54, %v3315_v51 }
 0xe32   :  { %3031 = vrot.lane.b32.xlu1 %v3028_v50, %s5741_s19  ;;  %v3323_v11 = vpack.c.bf16 %v3321_v52, %v3321_v52  ;;  %v3182_v52 = vmul.f32 %v5508_v17, %v6393_v44 }
 0xe33   :  { %v3304_v57 = vpop.permute.xlu1 %3303 }
 0xe34   :  { %v3306_v61 = vadd.f32 %v3304_v57, %v3300_v56  ;;  %3164 = vrot.lane.b32.xlu0 %v6389_v55, %s5725_s20 }
 0xe36   :  { %v3307_v62 = vmul.f32 0.17677669, %v3306_v61 }
 0xe37   :  { %v3464_v1 = vpop.permute.xlu0 %3463 }
 0xe38   :  { %v3322_v46 = vpack.c.bf16 %v3307_v62, %v3307_v62  ;;  %v3466_v53 = vadd.f32 %v3464_v1, %v3460_v63  ;;  %3328 = vrot.lane.b32.xlu0 %v3323_v11, %s5742_s23  ;;  %v3168_v1 = vmul.f32 %v5508_v17, %v6389_v55 }
 0xe3a   :  { %v3468_v58 = vpack.c.bf16 %v3466_v53, %v3466_v53  ;;  %3325 = vrot.lane.b32.xlu1 %v3322_v46, %s5742_s23 }
 0xe3b   :  { %v3449_v2 = vpop.permute.xlu1 %3448  ;;  %v2592_v3 = vpop.permute.xlu0 %2591 }
 0xe3c   :  { %v3451_v59 = vadd.f32 %v3449_v2, %v3445_v27  ;;  %3473 = vrot.lane.b32.xlu0 %v3468_v58, %s5731_s2 }
 0xe3e   :  { %v3452_v4 = vmul.f32 0.17677669, %v3451_v59 }
 0xe3f   :  { %v2596_v8 = vpop.permute.xlu1 %2595  ;;  %v3608_v9 = vpop.permute.xlu0 %3607 }
 0xe40   :  { %v3467_v12 = vpack.c.bf16 %v3452_v4, %v3452_v4  ;;  %v2598_v10 = vsel %vm513_vm1, %v2592_v3, %v2596_v8  ;;  %v3610_v14 = vadd.f32 %v3608_v9, %v3604_v7 }
 0xe41   :  { %v2600_v25 = vmul.f32 %v6452_v18, %v2598_v10 }
 0xe42   :  { %v3612_v19 = vpack.c.bf16 %v3610_v14, %v3610_v14  ;;  %3470 = vrot.lane.b32.xlu1 %v3467_v12, %s5731_s2 }
 0xe43   :  { %v2601_v22 = vadd.f32 %v2600_v25, %v2599_v16  ;;  %v2578_v23 = vpop.permute.xlu1 %2577  ;;  %v2582_v24 = vpop.permute.xlu0 %2581 }
 0xe44   :  { %v2584_v5 = vsel %vm513_vm1, %v2578_v23, %v2582_v24  ;;  %3617 = vrot.lane.b32.xlu0 %v3612_v19, %s5741_s19 }
 0xe45   :  { %v2603_v28 = vpack.c.bf16 %v2601_v22, %v2601_v22  ;;  %v2586_v30 = vmul.f32 %v6452_v18, %v2584_v5 }
 0xe47   :  { %v2587_v34 = vadd.f32 %v2586_v30, %v2585_v29  ;;  %v3593_v31 = vpop.permute.xlu1 %3592  ;;  %v2608_v15 = vsel %vm534_vm2, %v2603_v28, 0 }
 0xe48   :  { %v3595_v32 = vadd.f32 %v3593_v31, %v3589_v20  ;;  %4987 = vmatpush3.bf16.xpose.msra.mxu0 %v2608_v15 }
 0xe49   :  { %v2588_v33 = vmul.f32 0.17677669, %v2587_v34  ;;  %4998 = vmatprep.subr.bf16.mxu0 %v5735_v0 }
 0xe4a   :  { %v3596_v35 = vmul.f32 0.17677669, %v3595_v32 }
 0xe4b   :  { %v2602_v37 = vpack.c.bf16 %v2588_v33, %v2588_v33 }
 0xe4c   :  { %v3611_v36 = vpack.c.bf16 %v3596_v35, %v3596_v35 }
 0xe4e   :  { %3614 = vrot.lane.b32.xlu1 %v3611_v36, %s5741_s19 }
 0xe4f   :  { %4989 = vmatmul.mubr.msk.bf16.vlgmr.msra.gmra.mrb[40].mxu0 %vm534_vm2, %v2602_v37 }
 0xe50   :  { %5000 = vmatprep.mubr.msk.bf16.mxu0 %vm5737_vm0, %v5735_v0 }
 0xe8e   :  { %v2746_v45 = vpop.permute.xlu0 %2745 }
 0xe8f   :  { %v2751_v49 = vsel %vm534_vm2, %v2746_v45, 0 }
 0xe90   :  { %4999 = vmatpush3.bf16.xpose.msra.mxu0 %v2751_v49 }
 0xe91   :  { %5010 = vmatprep.subr.bf16.mxu0 %v5735_v0 }
 0xe94   :  { %v2743_v38 = vpop.permute.xlu1 %2742 }
 0xe96   :  { %v2891_v39 = vpop.permute.xlu0 %2890 }
 0xe97   :  { %v2896_v40 = vsel %vm534_vm2, %v2891_v39, 0  ;;  %5001 = vmatmul.mubr.msk.bf16.vlgmr.msra.gmra.mrb[44].mxu0 %vm534_vm2, %v2743_v38 }
 0xe98   :  { %v3175_v41 = vpop.permute.xlu1 %3174  ;;  %5011 = vmatpush3.bf16.xpose.msra.mxu0 %v2896_v40  ;;  %5012 = vmatprep.mubr.msk.bf16.mxu0 %vm5737_vm0, %v5735_v0 }
 0xe99   :  { %5022 = vmatprep.subr.bf16.mxu0 %v5735_v0 }
 0xe9c   :  { %v2888_v42 = vpop.permute.xlu1 %2887 }
 0xe9e   :  { %v3035_v47 = vpop.permute.xlu0 %3034 }
 0xe9f   :  { %v3040_v48 = vsel %vm534_vm2, %v3035_v47, 0  ;;  %5013 = vmatmul.mubr.msk.bf16.vlgmr.msra.gmra.mrb[48].mxu0 %vm534_vm2, %v2888_v42 }
 0xea0   :  { %v3161_v54 = vpop.permute.xlu1 %3160  ;;  %5023 = vmatpush3.bf16.xpose.msra.mxu0 %v3040_v48  ;;  %5024 = vmatprep.mubr.msk.bf16.mxu0 %vm5737_vm0, %v5735_v0 }
 0xea1   :  { %5034 = vmatprep.subr.bf16.mxu0 %v5735_v0 }
 0xea2   :  { %v3179_v50 = vpop.permute.xlu0 %3178 }
 0xea3   :  { %v3181_v51 = vsel %vm513_vm1, %v3175_v41, %v3179_v50 }
 0xea4   :  { %v3183_v56 = vmul.f32 %v6452_v18, %v3181_v51  ;;  %v3032_v61 = vpop.permute.xlu1 %3031 }
 0xea6   :  { %v3184_v57 = vadd.f32 %v3183_v56, %v3182_v52  ;;  %v3165_v11 = vpop.permute.xlu0 %3164 }
 0xea7   :  { %v3167_v62 = vsel %vm513_vm1, %v3161_v54, %v3165_v11  ;;  %5025 = vmatmul.mubr.msk.bf16.vlgmr.msra.gmra.mrb[52].mxu0 %vm534_vm2, %v3032_v61 }
 0xea8   :  { %v3186_v63 = vpack.c.bf16 %v3184_v57, %v3184_v57  ;;  %v3169_v46 = vmul.f32 %v6452_v18, %v3167_v62  ;;  %5036 = vmatprep.mubr.msk.bf16.mxu0 %vm5737_vm0, %v5735_v0 }
 0xeaa   :  { %v3170_v53 = vadd.f32 %v3169_v46, %v3168_v1  ;;  %v3191_v44 = vsel %vm534_vm2, %v3186_v63, 0  ;;  %v3329_v27 = vpop.permute.xlu0 %3328 }
 0xeab   :  { %5035 = vmatpush3.bf16.xpose.msra.mxu0 %v3191_v44  ;;  %v3334_v3 = vsel %vm534_vm2, %v3329_v27, 0 }
 0xeac   :  { %v3171_v58 = vmul.f32 0.17677669, %v3170_v53  ;;  %5046 = vmatprep.subr.bf16.mxu0 %v5735_v0  ;;  %v3326_v18 = vpop.permute.xlu1 %3325 }
 0xeae   :  { %v3185_v2 = vpack.c.bf16 %v3171_v58, %v3171_v58  ;;  %v3474_v55 = vpop.permute.xlu0 %3473 }
 0xeaf   :  { %v3479_v59 = vsel %vm534_vm2, %v3474_v55, 0 }
 0xeb2   :  { %5037 = vmatmul.mubr.msk.bf16.vlgmr.msra.gmra.mrb[56].mxu0 %vm534_vm2, %v3185_v2 }
 0xeb3   :  { %5047 = vmatpush3.bf16.xpose.msra.mxu0 %v3334_v3  ;;  %5048 = vmatprep.mubr.msk.bf16.mxu0 %vm5737_vm0, %v5735_v0 }
 0xeb4   :  { %5058 = vmatprep.subr.bf16.mxu0 %v5735_v0  ;;  %v3471_v7 = vpop.permute.xlu1 %3470 }
 0xeb6   :  { %v3618_v4 = vpop.permute.xlu0 %3617 }
 0xeb7   :  { %v3623_v8 = vsel %vm534_vm2, %v3618_v4, 0 }
 0xeba   :  { %5049 = vmatmul.mubr.msk.bf16.vlgmr.msra.gmra.mrb[60].mxu0 %vm534_vm2, %v3326_v18 }
 0xebb   :  { %5059 = vmatpush3.bf16.xpose.msra.mxu0 %v3479_v59  ;;  %5060 = vmatprep.mubr.msk.bf16.mxu0 %vm5737_vm0, %v5735_v0 }
 0xebc   :  { %5070 = vmatprep.subr.bf16.mxu0 %v5735_v0 }
 0xec0   :  { %v3615_v9 = vpop.permute.xlu1 %3614 }
 0xec2   :  { %5061 = vmatmul.mubr.msk.bf16.vlgmr.msra.gmra.mrb[64].mxu0 %vm534_vm2, %v3471_v7 }
 0xec3   :  { %5071 = vmatpush3.bf16.xpose.msra.mxu0 %v3623_v8  ;;  %5072 = vmatprep.mubr.msk.bf16.mxu0 %vm5737_vm0, %v5735_v0 }
 0xec4   :  { %5082 = vmatprep.subr.bf16.mxu0 %v5735_v0 }
 0xeca   :  { %5073 = vmatmul.mubr.msk.bf16.vlgmr.msra.gmra.mrb[68].mxu0 %vm534_vm2, %v3615_v9 }
 0xecb   :  { %5098 = vmatprep.mubr.msk.bf16.mxu0 %vm5737_vm0, %v5735_v0 }
 0xf22   :  { %v2644_v12 = vpop.f32.mrb[40].mxu0 }
 0xf23   :  { %v2650_v10 = vsel %vm6071_vm4, %v2644_v12, -1e+30  ;;  %v4990_v14 = vpop.f32.mrb[41].mxu0 }
 0xf24   :  { %v2651_v17 = vsel %vm582_vm5, %v2650_v10, -inf  ;;  %v2647_v16 = vpop.f32.mrb[42].mxu0 }
 0xf25   :  { %2652 = vmax.xlane.f32.xlu0 %v2651_v17  ;;  %v4991_v25 = vpop.f32.mrb[43].mxu0 }
 0xf6a   :  { %v2787_v19 = vpop.f32.mrb[44].mxu0 }
 0xf6b   :  { %v2793_v22 = vsel %vm6071_vm4, %v2787_v19, -1e+30  ;;  %v5002_v23 = vpop.f32.mrb[45].mxu0 }
 0xf6c   :  { %v2794_v24 = vsel %vm582_vm5, %v2793_v22, -inf  ;;  %v2790_v5 = vpop.f32.mrb[46].mxu0 }
 0xf6d   :  { %2795 = vmax.xlane.f32.xlu1 %v2794_v24  ;;  %v5003_v28 = vpop.f32.mrb[47].mxu0 }
 0xf72   :  { %v2932_v29 = vpop.f32.mrb[48].mxu0 }
 0xf73   :  { %v2938_v30 = vsel %vm6071_vm4, %v2932_v29, -1e+30  ;;  %v5014_v20 = vpop.f32.mrb[49].mxu0 }
 0xf74   :  { %v2939_v34 = vsel %vm582_vm5, %v2938_v30, -inf  ;;  %v2935_v31 = vpop.f32.mrb[50].mxu0 }
 0xf75   :  { %2940 = vmax.xlane.f32.xlu0 %v2939_v34  ;;  %v5015_v15 = vpop.f32.mrb[51].mxu0 }
 0xf7a   :  { %v3076_v32 = vpop.f32.mrb[52].mxu0 }
 0xf7b   :  { %v3082_v33 = vsel %vm6071_vm4, %v3076_v32, -1e+30  ;;  %v5026_v35 = vpop.f32.mrb[53].mxu0 }
 0xf7c   :  { %v3083_v36 = vsel %vm582_vm5, %v3082_v33, -inf  ;;  %v3079_v37 = vpop.f32.mrb[54].mxu0 }
 0xf7d   :  { %3084 = vmax.xlane.f32.xlu0 %v3083_v36  ;;  %v5027_v45 = vpop.f32.mrb[55].mxu0 }
 0xf85   :  { %v3227_v49 = vpop.f32.mrb[56].mxu0 }
 0xf86   :  { %v6607_v38 = vsel %vm6071_vm4, %v3227_v49, -1e+30  ;;  %v5038_v39 = vpop.f32.mrb[57].mxu0 }
 0xf87   :  { %v3234_v40 = vsel %vm582_vm5, %v6607_v38, -inf  ;;  %v3230_v41 = vpop.f32.mrb[58].mxu0 }
 0xf88   :  { %3235 = vmax.xlane.f32.xlu1 %v3234_v40  ;;  %v5039_v42 = vpop.f32.mrb[59].mxu0 }
 0xf8d   :  { %v3370_v47 = vpop.f32.mrb[60].mxu0 }
 0xf8e   :  { %v3376_v48 = vsel %vm6071_vm4, %v3370_v47, -1e+30  ;;  %v5050_v54 = vpop.f32.mrb[61].mxu0 }
 0xf8f   :  { %v3377_v50 = vsel %vm582_vm5, %v3376_v48, -inf  ;;  %v3373_v51 = vpop.f32.mrb[62].mxu0 }
 0xf90   :  { %3378 = vmax.xlane.f32.xlu0 %v3377_v50  ;;  %v5051_v52 = vpop.f32.mrb[63].mxu0  ;;  %v3246_v50 = vpack.c.bf16 %v6385_v6, %v6385_v6 }
 0xf95   :  { %v3515_v56 = vpop.f32.mrb[64].mxu0 }
 0xf96   :  { %v3521_v57 = vsel %vm6071_vm4, %v3515_v56, -1e+30  ;;  %v5062_v61 = vpop.f32.mrb[65].mxu0 }
 0xf97   :  { %v3522_v11 = vsel %vm582_vm5, %v3521_v57, -inf  ;;  %v3518_v62 = vpop.f32.mrb[66].mxu0 }
 0xf98   :  { %3523 = vmax.xlane.f32.xlu1 %v3522_v11  ;;  %v5063_v63 = vpop.f32.mrb[67].mxu0 }
 0xf9d   :  { %v3659_v1 = vpop.f32.mrb[68].mxu0 }
 0xf9e   :  { %v3665_v46 = vsel %vm6071_vm4, %v3659_v1, -1e+30  ;;  %v5074_v53 = vpop.f32.mrb[69].mxu0 }
 0xf9f   :  { %v3666_v44 = vsel %vm582_vm5, %v3665_v46, -inf  ;;  %v3662_v58 = vpop.f32.mrb[70].mxu0 }
 0xfa0   :  { %3667 = vmax.xlane.f32.xlu0 %v3666_v44  ;;  %v5075_v27 = vpop.f32.mrb[71].mxu0 }
 0xfb2   :  { %v2653_v2 = vpop.xlane.xlu0 %2652 }
 0xfb3   :  { %v2654_v3 = vsub.f32 %v2650_v10, %v2653_v2 }
 0xfb5   :  { %v2655_v55 = vmul.f32 1.442695, %v2654_v3 }
 0xfb7   :  { %5449 = vpow2.f32 %v2655_v55 }
 0xfc1   :  { %v5450_v18 = vpop.eup %5449 }
 0xfc2   :  { %v2657_v59 = vsel %vm582_vm5, %v5450_v18, 0.0 }
 0xfc3   :  { %2658 = vadd.xlane.f32.xlu1 %v2657_v59 }
 0xffa   :  { %v2796_v4 = vpop.xlane.xlu1 %2795 }
 0xffb   :  { %v2797_v7 = vsub.f32 %v2793_v22, %v2796_v4 }
 0xffd   :  { %v2798_v8 = vmul.f32 1.442695, %v2797_v7 }
 0xfff   :  { %5451 = vpow2.f32 %v2798_v8 }
0x1002   :  { %v2941_v43 = vpop.xlane.xlu0 %2940 }
0x1003   :  { %v2942_v9 = vsub.f32 %v2938_v30, %v2941_v43 }
0x1005   :  { %v2943_v12 = vmul.f32 1.442695, %v2942_v9 }
0x1007   :  { %5453 = vpow2.f32 %v2943_v12 }
0x1009   :  { %v5452_v14 = vpop.eup %5451 }
0x100a   :  { %v3085_v17 = vpop.xlane.xlu0 %3084  ;;  %v2800_v16 = vsel %vm582_vm5, %v5452_v14, 0.0 }
0x100b   :  { %v3086_v25 = vsub.f32 %v3082_v33, %v3085_v17  ;;  %2801 = vadd.xlane.f32.xlu0 %v2800_v16 }
0x100d   :  { %v3087_v10 = vmul.f32 1.442695, %v3086_v25 }
0x100f   :  { %5455 = vpow2.f32 %v3087_v10 }
0x1011   :  { %v6622_v19 = vpop.eup %5453 }
0x1012   :  { %v2945_v23 = vsel %vm582_vm5, %v6622_v19, 0.0 }
0x1013   :  { %2946 = vadd.xlane.f32.xlu1 %v2945_v23 }
0x1015   :  { %v3236_v5 = vpop.xlane.xlu1 %3235 }
0x1016   :  { %v3237_v28 = vsub.f32 %v6607_v38, %v3236_v5 }
0x1018   :  { %v3238_v34 = vmul.f32 1.442695, %v3237_v28 }
0x1019   :  { %v6626_v22 = vpop.eup %5455 }
0x101a   :  { %v3089_v24 = vsel %vm582_vm5, %v6626_v22, 0.0  ;;  %5457 = vpow2.f32 %v3238_v34 }
0x101b   :  { %3090 = vadd.xlane.f32.xlu0 %v3089_v24 }
0x101d   :  { %v3379_v29 = vpop.xlane.xlu0 %3378 }
0x101e   :  { %v3380_v20 = vsub.f32 %v3376_v48, %v3379_v29 }
0x1020   :  { %v3381_v32 = vmul.f32 1.442695, %v3380_v20 }
0x1022   :  { %5459 = vpow2.f32 %v3381_v32 }
0x1024   :  { %2951 = vrot.lane.b32.xlu1 %v6378_v60, %s5731_s2  ;;  %v6637_v37 = vpop.eup %5457 }
0x1025   :  { %v3524_v30 = vpop.xlane.xlu1 %3523  ;;  %v3240_v45 = vsel %vm582_vm5, %v6637_v37, 0.0 }
0x1026   :  { %v3525_v31 = vsub.f32 %v3521_v57, %v3524_v30 }
0x1028   :  { %3095 = vrot.lane.b32.xlu1 %v6378_v60, %s5741_s19  ;;  %v3526_v33 = vmul.f32 1.442695, %v3525_v31 }
0x102a   :  { %5461 = vpow2.f32 %v3526_v33 }
0x102d   :  { %v3668_v15 = vpop.xlane.xlu0 %3667 }
0x102e   :  { %v3669_v35 = vsub.f32 %v3665_v46, %v3668_v15 }
0x1030   :  { %v3670_v36 = vmul.f32 1.442695, %v3669_v35  ;;  %v5293_v35 = vld [vmem:[#allocation10 + $0x40] sm:$0xff]  }
0x1031   :  { %2807 = vrot.lane.b32.xlu0 %v6378_v60, %s5742_s23  ;;  %v6639_v60 = vpop.eup %5459  ;;  %5083 = vmatpush3.bf16.msra.mxu0 %v5293_v35  ;;  %v5307_v35 = vld [vmem:[#allocation11 + $0x120] ss:$16 sps:$4 sm:$0xff]  }
0x1032   :  { %5463 = vpow2.f32 %v3670_v36  ;;  %v3383_v39 = vsel %vm582_vm5, %v6639_v60, 0.0  ;;  %v5294_v36 = vld [vmem:[#allocation10 + $0x48] sm:$0xff]   ;;  %5084 = vmatprep.subr.bf16.mxu0 %v5735_v0 }
0x1034   :  { %v6643_v49 = vpop.eup %5461 }
0x1035   :  { %v3528_v38 = vsel %vm582_vm5, %v6643_v49, 0.0  ;;  %5085 = vmatpush3.bf16.msra.mxu0 %v5294_v36  ;;  %v5310_v36 = vld [vmem:[#allocation11 + $0x128] ss:$16 sps:$4 sm:$0xff]  }
0x1036   :  { %5086 = vmatprep.subr.bf16.mxu0 %v5735_v0 }
0x103c   :  { %v6649_v40 = vpop.eup %5463 }
0x103d   :  { %v3672_v42 = vsel %vm582_vm5, %v6649_v40, 0.0 }
0x104c   :  { %3241 = vadd.xlane.f32.xlu1 %v3240_v45 }
0x1050   :  { %v2659_v41 = vpop.xlane.xlu1 %2658  ;;  %3529 = vadd.xlane.f32.xlu0 %v3528_v38  ;;  %3384 = vadd.xlane.f32.xlu1 %v3383_v39 }
0x1051   :  { %5465 = vrcp.f32 %v2659_v41 }
0x1054   :  { %3673 = vadd.xlane.f32.xlu1 %v3672_v42 }
0x105b   :  { %v5466_v47 = vpop.eup %5465 }
0x105c   :  { %v2661_v48 = vmul.f32 %v5466_v47, %v5450_v18  ;;  %v3251_v18 = vsel %vm599_vm3, %v3246_v50, 0 }
0x105e   :  { %v2662_v54 = vpack.c.bf16 %v2661_v48, %v2661_v48 }
0x1060   :  { %4995 = vmatmul.mubr.msk.bf16.vlgmr.msra.gmra.mrb[56].mxu1 %vm582_vm5, %v2662_v54 }
0x1061   :  { %5006 = vmatprep.mubr.msk.bf16.mxu1 %vm5737_vm0, %v5735_v0 }
0x1065   :  { %3534 = vrot.lane.b32.xlu1 %v3246_v50, %s5731_s2 }
0x1066   :  { %3390 = vrot.lane.b32.xlu0 %v3246_v50, %s5742_s23 }
0x106a   :  { %3678 = vrot.lane.b32.xlu0 %v3246_v50, %s5741_s19 }
0x1098   :  { %v2802_v51 = vpop.xlane.xlu0 %2801 }
0x1099   :  { %5467 = vrcp.f32 %v2802_v51 }
0x10a0   :  { %v2947_v52 = vpop.xlane.xlu1 %2946 }
0x10a1   :  { %5469 = vrcp.f32 %v2947_v52  ;;  %v5296_v52 = vld [vmem:[#allocation10 + $0x58] sm:$0xff]  }
0x10a3   :  { %v5468_v56 = vpop.eup %5467 }
0x10a4   :  { %v2804_v61 = vmul.f32 %v5468_v56, %v5452_v14  ;;  %v2952_v63 = vpop.permute.xlu1 %2951 }
0x10a5   :  { %v2957_v46 = vsel %vm599_vm3, %v2952_v63, 0  ;;  %v5298_v63 = vld [vmem:[#allocation10 + $0x68] sm:$0xff]  }
0x10a6   :  { %v2805_v6 = vpack.c.bf16 %v2804_v61, %v2804_v61  ;;  %v5297_v61 = vld [vmem:[#allocation10 + $0x60] sm:$0xff]  }
0x10a8   :  { %v3091_v57 = vpop.xlane.xlu0 %3090  ;;  %v3096_v44 = vpop.permute.xlu1 %3095 }
0x10a9   :  { %5471 = vrcp.f32 %v3091_v57  ;;  %v3101_v2 = vsel %vm599_vm3, %v3096_v44, 0 }
0x10ab   :  { %v5470_v1 = vpop.eup %5469 }
0x10ac   :  { %v2808_v11 = vpop.permute.xlu0 %2807  ;;  %v2949_v53 = vmul.f32 %v5470_v1, %v6622_v19 }
0x10ad   :  { %v2813_v62 = vsel %vm599_vm3, %v2808_v11, 0 }
0x10ae   :  { %5005 = vmatpush3.bf16.msra.mxu1 %v2813_v62  ;;  %v2950_v58 = vpack.c.bf16 %v2949_v53, %v2949_v53  ;;  %v5299_v53 = vld [vmem:[#allocation10 + $0x70] sm:$0xff]  }
0x10af   :  { %5016 = vmatprep.subr.bf16.mxu1 %v5735_v0 }
0x10b1   :  { %5007 = vmatmul.mubr.msk.bf16.vlgmr.msra.gmra.mrb[60].mxu1 %vm582_vm5, %v2805_v6 }
0x10b2   :  { %5017 = vmatpush3.bf16.msra.mxu1 %v2957_v46  ;;  %5018 = vmatprep.mubr.msk.bf16.mxu1 %vm5737_vm0, %v5735_v0 }
0x10b3   :  { %5028 = vmatprep.subr.bf16.mxu1 %v5735_v0  ;;  %v5472_v27 = vpop.eup %5471 }
0x10b4   :  { %v3093_v3 = vmul.f32 %v5472_v27, %v6626_v22 }
0x10b6   :  { %v3094_v55 = vpack.c.bf16 %v3093_v3, %v3093_v3  ;;  %v5300_v3 = vld [vmem:[#allocation10 + $0x78] sm:$0xff]  }
0x10b9   :  { %5019 = vmatmul.mubr.msk.bf16.vlgmr.msra.gmra.mrb[64].mxu1 %vm582_vm5, %v2950_v58 }
0x10ba   :  { %5029 = vmatpush3.bf16.msra.mxu1 %v3101_v2  ;;  %5030 = vmatprep.mubr.msk.bf16.mxu1 %vm5737_vm0, %v5735_v0 }
0x10bb   :  { %5040 = vmatprep.subr.bf16.mxu1 %v5735_v0 }
0x10c1   :  { %5031 = vmatmul.mubr.msk.bf16.vlgmr.msra.gmra.mrb[68].mxu1 %vm582_vm5, %v3094_v55 }
0x10c2   :  { %5041 = vmatpush3.bf16.msra.mxu1 %v3251_v18  ;;  %5042 = vmatprep.mubr.msk.bf16.mxu1 %vm5737_vm0, %v5735_v0 }
0x10c3   :  { %5052 = vmatprep.subr.bf16.mxu1 %v5735_v0 }
0x10d9   :  { %v3242_v59 = vpop.xlane.xlu1 %3241 }
0x10da   :  { %5473 = vrcp.f32 %v3242_v59 }
0x10dd   :  { %v3385_v4 = vpop.xlane.xlu1 %3384  ;;  %v3530_v7 = vpop.xlane.xlu0 %3529 }
0x10de   :  { %5475 = vrcp.f32 %v3385_v4 }
0x10df   :  { %5477 = vrcp.f32 %v3530_v7 }
0x10e1   :  { %v3391_v9 = vpop.permute.xlu0 %3390  ;;  %v3674_v17 = vpop.xlane.xlu1 %3673 }
0x10e2   :  { %v3396_v16 = vsel %vm599_vm3, %v3391_v9, 0  ;;  %5479 = vrcp.f32 %v3674_v17 }
0x10e4   :  { %v5474_v8 = vpop.eup %5473 }
0x10e5   :  { %v3244_v43 = vmul.f32 %v5474_v8, %v6637_v37  ;;  %v3535_v10 = vpop.permute.xlu1 %3534  ;;  %v3679_v5 = vpop.permute.xlu0 %3678  ;;  %v5295_v37 = vld [vmem:[#allocation10 + $0x50] sm:$0xff]  }
0x10e6   :  { %v3540_v22 = vsel %vm599_vm3, %v3535_v10, 0  ;;  %v3684_v30 = vsel %vm599_vm3, %v3679_v5, 0  ;;  %5087 = vmatpush3.bf16.msra.mxu0 %v5295_v37  ;;  %v5315_v37 = vld [vmem:[#allocation11 + $0x144] ss:$16 sps:$4 sm:$0xff]  }
0x10e7   :  { %v3245_v12 = vpack.c.bf16 %v3244_v43, %v3244_v43  ;;  %5088 = vmatprep.subr.bf16.mxu0 %v5735_v0 }
0x10e8   :  { %v5476_v14 = vpop.eup %5475 }
0x10e9   :  { %5043 = vmatmul.mubr.msk.bf16.vlgmr.msra.gmra.mrb[72].mxu1 %vm582_vm5, %v3245_v12  ;;  %v3387_v25 = vmul.f32 %v5476_v14, %v6639_v60  ;;  %v5478_v23 = vpop.eup %5477 }
0x10ea   :  { %5053 = vmatpush3.bf16.msra.mxu1 %v3396_v16  ;;  %5054 = vmatprep.mubr.msk.bf16.mxu1 %vm5737_vm0, %v5735_v0  ;;  %v3532_v24 = vmul.f32 %v5478_v23, %v6643_v49 }
0x10eb   :  { %5064 = vmatprep.subr.bf16.mxu1 %v5735_v0  ;;  %v3388_v19 = vpack.c.bf16 %v3387_v25, %v3387_v25  ;;  %5089 = vmatpush3.bf16.msra.mxu0 %v5296_v52  ;;  %v5319_v52 = vld [vmem:[#allocation11 + $0x160] ss:$16 sps:$4 sm:$0xff]  }
0x10ec   :  { %v3533_v28 = vpack.c.bf16 %v3532_v24, %v3532_v24  ;;  %v5480_v29 = vpop.eup %5479  ;;  %5090 = vmatprep.subr.bf16.mxu0 %v5735_v0 }
0x10ed   :  { %v3676_v20 = vmul.f32 %v5480_v29, %v6649_v40 }
0x10ef   :  { %v3677_v34 = vpack.c.bf16 %v3676_v20, %v3676_v20  ;;  %5091 = vmatpush3.bf16.msra.mxu0 %v5297_v61  ;;  %v5301_v20 = vld [vmem:[#allocation11 + $0x100] ss:$16 sps:$4 sm:$0xff]   ;;  %v5328_v61 = vld [vmem:[#allocation11 + $0x188] ss:$16 sps:$4 sm:$0xff]  }
0x10f0   :  { %5092 = vmatprep.subr.bf16.mxu0 %v5735_v0 }
0x10f1   :  { %5055 = vmatmul.mubr.msk.bf16.vlgmr.msra.gmra.mrb[76].mxu1 %vm582_vm5, %v3388_v19 }
0x10f2   :  { %5065 = vmatpush3.bf16.msra.mxu1 %v3540_v22  ;;  %5066 = vmatprep.mubr.msk.bf16.mxu1 %vm5737_vm0, %v5735_v0 }
0x10f3   :  { %5076 = vmatprep.subr.bf16.mxu1 %v5735_v0  ;;  %5093 = vmatpush3.bf16.msra.mxu0 %v5298_v63  ;;  %v5331_v63 = vld [vmem:[#allocation11 + $0x1a0] ss:$16 sps:$4 sm:$0xff]  }
0x10f4   :  { %5094 = vmatprep.subr.bf16.mxu0 %v5735_v0 }
0x10f7   :  { %5095 = vmatpush3.bf16.msra.mxu0 %v5299_v53  ;;  %v5337_v53 = vld [vmem:[#allocation11 + $0x1c0] ss:$16 sps:$4 sm:$0xff]  }
0x10f8   :  { %5096 = vmatprep.subr.bf16.mxu0 %v5735_v0 }
0x10f9   :  { %5067 = vmatmul.mubr.msk.bf16.vlgmr.msra.gmra.mrb[80].mxu1 %vm582_vm5, %v3533_v28 }
0x10fa   :  { %5077 = vmatpush3.bf16.msra.mxu1 %v3684_v30  ;;  %5078 = vmatprep.mubr.msk.bf16.mxu1 %vm5737_vm0, %v5735_v0 }
0x10fb   :  { %5097 = vmatpush3.bf16.msra.mxu0 %v5300_v3  ;;  %v5346_v3 = vld [vmem:[#allocation11 + $0x1e8] ss:$16 sps:$4 sm:$0xff]  }
0x1101   :  { %5079 = vmatmul.mubr.msk.bf16.vlgmr.msra.gmra.mrb[84].mxu1 %vm582_vm5, %v3677_v34  ;;  %v5303_v34 = vld [vmem:[#allocation11 + $0x104] ss:$16 sps:$4 sm:$0xff]  }
0x1102   :  { %4048 = vmatprep.mubr.bf16.mxu1 %v5736_v26  ;;  %4016 = vmatprep.subr.bf16.mxu1 %v5303_v34  ;;  %v5360_v34 = vld [vmem:[#allocation13 + $0xa8] sm:$0xff]  }
0x1103   :  { %4017 = vmatpush1.bf16.msra.mxu1 %v5301_v20  ;;  %v5358_v20 = vld [vmem:[#allocation13 + $0xa0] sm:$0xff]  }
0x1133   :  { %v6700_v31 = vpop.f32.mrb[56].mxu1 }
0x1134   :  { %v4996_v15 = vpop.f32.mrb[57].mxu1 }
0x1135   :  { %v2707_v32 = vpop.f32.mrb[58].mxu1  ;;  %v5304_v15 = vld [vmem:[#allocation11 + $0x108] ss:$16 sps:$4 sm:$0xff]  }
0x1136   :  { %v4997_v33 = vpop.f32.mrb[59].mxu1  ;;  %v5306_v32 = vld [vmem:[#allocation11 + $0x10c] ss:$16 sps:$4 sm:$0xff]  }
0x1137   :  { %v5309_v33 = vld [vmem:[#allocation11 + $0x124] ss:$16 sps:$4 sm:$0xff]   ;;  %4059 = vmatprep.subr.bf16.mxu0 %v5306_v32 }
0x1138   :  { %4018 = vmatprep.subr.bf16.mxu1 %v5309_v33  ;;  %v5362_v32 = vld [vmem:[#allocation13 + $0xb0] sm:$0xff]   ;;  %v5363_v33 = vld [vmem:[#allocation13 + $0xf8] sm:$0xff]  }
0x1139   :  { %4019 = vmatpush1.bf16.msra.mxu1 %v5307_v35 }
0x113a   :  { %4020 = vmatprep.subr.bf16.mxu1 %v5315_v37 }
0x1184   :  { %v2849_v60 = vpop.f32.mrb[60].mxu1 }
0x1185   :  { %v5008_v45 = vpop.f32.mrb[61].mxu1 }
0x1186   :  { %v2852_v49 = vpop.f32.mrb[62].mxu1  ;;  %v5313_v45 = vld [vmem:[#allocation11 + $0x140] ss:$16 sps:$4 sm:$0xff]  }
0x1187   :  { %v5009_v38 = vpop.f32.mrb[63].mxu1  ;;  %v5316_v49 = vld [vmem:[#allocation11 + $0x148] ss:$16 sps:$4 sm:$0xff]   ;;  %4021 = vmatpush1.bf16.msra.mxu1 %v5313_v45 }
0x118c   :  { %v2993_v39 = vpop.f32.mrb[64].mxu1 }
0x118d   :  { %v5020_v40 = vpop.f32.mrb[65].mxu1 }
0x118e   :  { %v2996_v41 = vpop.f32.mrb[66].mxu1 }
0x118f   :  { %v5021_v42 = vpop.f32.mrb[67].mxu1 }
0x1194   :  { %v3137_v47 = vpop.f32.mrb[68].mxu1 }
0x1195   :  { %v5032_v48 = vpop.f32.mrb[69].mxu1 }
0x1196   :  { %v3140_v54 = vpop.f32.mrb[70].mxu1 }
0x1197   :  { %v5033_v50 = vpop.f32.mrb[71].mxu1 }
0x1198   :  { %v5321_v50 = vld [vmem:[#allocation11 + $0x164] ss:$16 sps:$4 sm:$0xff]  }
0x1199   :  { %4022 = vmatprep.subr.bf16.mxu1 %v5321_v50 }
0x119a   :  { %4023 = vmatpush1.bf16.msra.mxu1 %v5319_v52 }
0x11bc   :  { %v3287_v51 = vpop.f32.mrb[72].mxu1 }
0x11bd   :  { %v5044_v56 = vpop.f32.mrb[73].mxu1 }
0x11be   :  { %v3290_v57 = vpop.f32.mrb[74].mxu1  ;;  %v5322_v56 = vld [vmem:[#allocation11 + $0x168] ss:$16 sps:$4 sm:$0xff]  }
0x11bf   :  { %v5045_v11 = vpop.f32.mrb[75].mxu1  ;;  %v5330_v57 = vld [vmem:[#allocation11 + $0x18c] ss:$16 sps:$4 sm:$0xff]  }
0x11c0   :  { %v5333_v11 = vld [vmem:[#allocation11 + $0x1a4] ss:$16 sps:$4 sm:$0xff]  }
0x11c4   :  { %v3432_v62 = vpop.f32.mrb[76].mxu1 }
0x11c5   :  { %v5142_v6 = vpack.i.bf16 %v3432_v62, %v2849_v60  ;;  %v5056_v1 = vpop.f32.mrb[77].mxu1  ;;  %v5318_v60 = vld [vmem:[#allocation11 + $0x14c] ss:$16 sps:$4 sm:$0xff]  }
0x11c6   :  { %v3435_v46 = vpop.f32.mrb[78].mxu1  ;;  %v5336_v62 = vld [vmem:[#allocation11 + $0x1ac] ss:$16 sps:$4 sm:$0xff]   ;;  %v5339_v1 = vld [vmem:[#allocation11 + $0x1c4] ss:$16 sps:$4 sm:$0xff]  }
0x11c7   :  { %5143 = vrot.lane.b32.xlu0 %v5142_v6, %s5741_s19  ;;  %v5057_v44 = vpop.f32.mrb[79].mxu1  ;;  %v5334_v6 = vld [vmem:[#allocation11 + $0x1a8] ss:$16 sps:$4 sm:$0xff]   ;;  %v5342_v46 = vld [vmem:[#allocation11 + $0x1cc] ss:$16 sps:$4 sm:$0xff]  }
0x11c8   :  { %v5340_v44 = vld [vmem:[#allocation11 + $0x1c8] ss:$16 sps:$4 sm:$0xff]  }
0x11cc   :  { %v3576_v58 = vpop.f32.mrb[80].mxu1 }
0x11cd   :  { %v5147_v27 = vpack.i.bf16 %v3576_v58, %v2993_v39  ;;  %v5068_v2 = vpop.f32.mrb[81].mxu1  ;;  %v5345_v58 = vld [vmem:[#allocation11 + $0x1e4] ss:$16 sps:$4 sm:$0xff]  }
0x11ce   :  { %v3579_v55 = vpop.f32.mrb[82].mxu1  ;;  %v5343_v2 = vld [vmem:[#allocation11 + $0x1e0] ss:$16 sps:$4 sm:$0xff]  }
0x11cf   :  { %5148 = vrot.lane.b32.xlu1 %v5147_v27, %s5731_s2  ;;  %v5069_v18 = vpop.f32.mrb[83].mxu1  ;;  %v5348_v27 = vld [vmem:[#allocation11 + $0x1ec] ss:$16 sps:$4 sm:$0xff]  }
0x11d4   :  { %v3720_v59 = vpop.f32.mrb[84].mxu1 }
0x11d5   :  { %v5152_v4 = vpack.i.bf16 %v3720_v59, %v3137_v47  ;;  %v5080_v7 = vpop.f32.mrb[85].mxu1 }
0x11d6   :  { %v3723_v8 = vpop.f32.mrb[86].mxu1 }
0x11d7   :  { %5153 = vrot.lane.b32.xlu0 %v5152_v4, %s5742_s23  ;;  %v5081_v43 = vpop.f32.mrb[87].mxu1 }
0x1239   :  { %v5144_v9 = vpop.permute.xlu0 %5143 }
0x123a   :  { %v5146_v14 = vunpack.i.h.bf16 %v5144_v9  ;;  %v5145_v0 = vunpack.i.l.bf16 %v5144_v9 }
0x123c   :  { %v3738_v10 = vsel %vm534_vm2, %v3287_v51, %v5146_v14  ;;  %v3155_v19 = vsel %vm534_vm2, %v6700_v31, %v5145_v0  ;;  %v5312_v31 = vld [vmem:[#allocation11 + $0x12c] ss:$16 sps:$4 sm:$0xff]   ;;  %v4616_v14 = vld [vmem:[%s6762_s6 + $0x1] ss:$0 sm:$0xff] }
0x123d   :  { %v5324_v51 = vld [vmem:[#allocation11 + $0x16c] ss:$16 sps:$4 sm:$0xff]  }
0x1241   :  { %v5149_v12 = vpop.permute.xlu1 %5148 }
0x1242   :  { %v5151_v17 = vunpack.i.h.bf16 %v5149_v12  ;;  %v5150_v16 = vunpack.i.l.bf16 %v5149_v12 }
0x1244   :  { %v3156_v24 = vsel %vm1099_vm6, %v3155_v19, %v5150_v16  ;;  %v3739_v5 = vsel %vm1099_vm6, %v3738_v10, %v5151_v17  ;;  %v5349_v10 = vld [vmem:[#allocation13 + $0xc0] sm:$0xff]  }
0x1245   :  { %v5350_v19 = vld [vmem:[#allocation13 + $0x80] sm:$0xff]  }
0x1249   :  { %v5154_v25 = vpop.permute.xlu0 %5153 }
0x124a   :  { %v5156_v23 = vunpack.i.h.bf16 %v5154_v25  ;;  %v5155_v22 = vunpack.i.l.bf16 %v5154_v25 }
0x124c   :  { %v3157_v28 = vsel %vm1101_vm7, %v3156_v24, %v5155_v22  ;;  %v3740_v29 = vsel %vm1101_vm7, %v3739_v5, %v5156_v23  ;;  %v5351_v23 = vld [vmem:[#allocation13 + $0xc8] sm:$0xff]   ;;  %v5353_v24 = vld [vmem:[#allocation13 + $0xd0] sm:$0xff]  }
0x124d   :  { %v3741_v30 = vpack.c.bf16 %v3740_v29, %v3157_v28  ;;  %v5352_v22 = vld [vmem:[#allocation13 + $0x88] sm:$0xff]   ;;  %v5354_v5 = vld [vmem:[#allocation13 + $0x90] sm:$0xff]   ;;  %v5355_v28 = vld [vmem:[#allocation13 + $0xd8] sm:$0xff]  }
0x124e   :  { %v5356_v29 = vld [vmem:[#allocation13 + $0x98] sm:$0xff]  }
0x124f   :  { %5099 = vmatmul.mubr.bf16.vlgmr.msra.gmra.mrb[72].mxu0 %v3741_v30  ;;  %v5357_v30 = vld [vmem:[#allocation13 + $0xe0] sm:$0xff]  }
0x1250   :  { %4091 = vmatprep.mubr.bf16.mxu0 %v5736_v26  ;;  %4060 = vmatpush1.bf16.msra.mxu0 %v5304_v15  ;;  %v5361_v15 = vld [vmem:[#allocation13 + $0xf0] sm:$0xff]  }
0x1251   :  { %4061 = vmatprep.subr.bf16.mxu0 %v5312_v31  ;;  %v5364_v31 = vld [vmem:[#allocation13 + $0xb8] sm:$0xff]  }
0x1254   :  { %4062 = vmatpush1.bf16.msra.mxu0 %v5310_v36 }
0x1255   :  { %4063 = vmatprep.subr.bf16.mxu0 %v5318_v60 }
0x1258   :  { %4064 = vmatpush1.bf16.msra.mxu0 %v5316_v49 }
0x1259   :  { %4065 = vmatprep.subr.bf16.mxu0 %v5324_v51 }
0x125c   :  { %4066 = vmatpush1.bf16.msra.mxu0 %v5322_v56 }
0x125d   :  { %4067 = vmatprep.subr.bf16.mxu0 %v5330_v57 }
0x1260   :  { %4068 = vmatpush1.bf16.msra.mxu0 %v5328_v61 }
0x1261   :  { %4069 = vmatprep.subr.bf16.mxu0 %v5336_v62 }
0x1264   :  { %4070 = vmatpush1.bf16.msra.mxu0 %v5334_v6 }
0x1265   :  { %4071 = vmatprep.subr.bf16.mxu0 %v5342_v46 }
0x1268   :  { %4072 = vmatpush1.bf16.msra.mxu0 %v5340_v44 }
0x1269   :  { %4073 = vmatprep.subr.bf16.mxu0 %v5348_v27 }
0x126c   :  { %4074 = vmatpush1.bf16.msra.mxu0 %v5346_v3 }
0x1322   :  { %v3824_v38 = vpop.f32.mrb[72].mxu0 }
0x1323   :  { %v6721_v39 = vadd.f32 %v3824_v38, %v6351_v21  ;;  %v5100_v40 = vpop.f32.mrb[73].mxu0  ;;  %v5327_v21 = vld [vmem:[#allocation11 + $0x184] ss:$16 sps:$4 sm:$0xff]  }
0x1324   :  { %v3827_v41 = vpop.f32.mrb[74].mxu0  ;;  %4024 = vmatprep.subr.bf16.mxu1 %v5327_v21 }
0x1325   :  { %v6724_v42 = vadd.f32 %v3827_v41, %v6354_v13  ;;  %v5101_v47 = vpop.f32.mrb[75].mxu0  ;;  %v3833_v48 = vmul.f32 %v6721_v39, %v6721_v39  ;;  %v5325_v13 = vld [vmem:[#allocation11 + $0x180] ss:$16 sps:$4 sm:$0xff]  }
0x1326   :  { %4025 = vmatpush1.bf16.msra.mxu1 %v5325_v13 }
0x1327   :  { %3835 = vadd.xlane.f32.xlu1 %v3833_v48  ;;  %v3834_v54 = vmul.f32 %v6724_v42, %v6724_v42  ;;  %4026 = vmatprep.subr.bf16.mxu1 %v5333_v11 }
0x1329   :  { %3837 = vadd.xlane.f32.xlu0 %v3834_v54 }
0x132a   :  { %4027 = vmatpush1.bf16.msra.mxu1 %v5331_v63 }
0x132b   :  { %4028 = vmatprep.subr.bf16.mxu1 %v5339_v1 }
0x132e   :  { %4029 = vmatpush1.bf16.msra.mxu1 %v5337_v53 }
0x132f   :  { %4030 = vmatprep.subr.bf16.mxu1 %v5345_v58 }
0x1332   :  { %4031 = vmatpush1.bf16.msra.mxu1 %v5343_v2 }
0x1333   :  { %4808 = vmatprep.subr.bf16.mxu1 %v5349_v10 }
0x13b4   :  { %v3836_v55 = vpop.xlane.xlu1 %3835 }
0x13b5   :  { %v3839_v18 = vmul.f32 0.0078125, %v3836_v55 }
0x13b6   :  { %v3838_v59 = vpop.xlane.xlu0 %3837 }
0x13b7   :  { %v3841_v4 = vadd.f32 1e-06, %v3839_v18  ;;  %v3840_v7 = vmul.f32 0.0078125, %v3838_v59  ;;  %v5365_v59 = vld [vmem:[#allocation14] ss:$8 sps:$4 sm:$0xff]  }
0x13b9   :  { %5481 = vrsqrt.f32 %v3841_v4  ;;  %v3842_v8 = vadd.f32 1e-06, %v3840_v7  ;;  %v5367_v4 = vld [vmem:[#allocation14 + $0x4] ss:$8 sps:$4 sm:$0xff]   ;;  %v5370_v7 = vld [vmem:[#allocation14 + $0x14] ss:$8 sps:$4 sm:$0xff]  }
0x13ba   :  { %4395 = vmatprep.subr.bf16.mxu0 %v5367_v4 }
0x13bb   :  { %5483 = vrsqrt.f32 %v3842_v8  ;;  %v5368_v8 = vld [vmem:[#allocation14 + $0x10] ss:$8 sps:$4 sm:$0xff]  }
0x13c3   :  { %v5482_v43 = vpop.eup %5481 }
0x13c4   :  { %v3845_v9 = vmul.f32 %v5482_v43, %v6721_v39  ;;  %v5373_v43 = vld [vmem:[#allocation14 + $0x24] ss:$8 sps:$4 sm:$0xff]  }
0x13c5   :  { %v5484_v12 = vpop.eup %5483 }
0x13c6   :  { %v3846_v0 = vmul.f32 %v5484_v12, %v6724_v42  ;;  %v3853_v17 = vmul.f32 %v4616_v14, %v3845_v9  ;;  %v5371_v9 = vld [vmem:[#allocation14 + $0x20] ss:$8 sps:$4 sm:$0xff]  }
0x13c8   :  { %v3854_v16 = vmul.f32 %v4616_v14, %v3846_v0 }
0x13ca   :  { %v3855_v25 = vpack.c.bf16 %v3854_v16, %v3853_v17 }
0x13cc   :  { %4049 = vmatmul.mubr.bf16.vlgmr.msra.gmra.mrb[88].mxu1 %v3855_v25  ;;  %4092 = vmatmul.mubr.bf16.vlgmr.msra.gmra.mrb[76].mxu0 %v3855_v25 }
0x13cd   :  { %4427 = vmatprep.mubr.bf16.mxu0 %v5736_v26  ;;  %4809 = vmatpush3.bf16.msra.mxu1 %v5350_v19  ;;  %v5359_v26 = vld [vmem:[#allocation13 + $0xe8] sm:$0xff]  }
0x13ce   :  { %4810 = vmatprep.subr.bf16.mxu1 %v5351_v23  ;;  %4396 = vmatpush1.bf16.msra.mxu0 %v5365_v59 }
0x13cf   :  { %4397 = vmatprep.subr.bf16.mxu0 %v5370_v7 }
0x13d1   :  { %4811 = vmatpush3.bf16.msra.mxu1 %v5352_v22 }
0x13d2   :  { %4812 = vmatprep.subr.bf16.mxu1 %v5353_v24  ;;  %4398 = vmatpush1.bf16.msra.mxu0 %v5368_v8  ;;  %v5376_v24 = vld [vmem:[#allocation14 + $0x34] ss:$8 sps:$4 sm:$0xff]  }
0x13d3   :  { %4399 = vmatprep.subr.bf16.mxu0 %v5373_v43 }
0x13d5   :  { %4813 = vmatpush3.bf16.msra.mxu1 %v5354_v5  ;;  %v5374_v5 = vld [vmem:[#allocation14 + $0x30] ss:$8 sps:$4 sm:$0xff]  }
0x13d6   :  { %4814 = vmatprep.subr.bf16.mxu1 %v5355_v28  ;;  %4400 = vmatpush1.bf16.msra.mxu0 %v5371_v9  ;;  %v5379_v28 = vld [vmem:[#allocation14 + $0x44] ss:$8 sps:$4 sm:$0xff]  }
0x13d7   :  { %4401 = vmatprep.subr.bf16.mxu0 %v5376_v24 }
0x13d9   :  { %4815 = vmatpush3.bf16.msra.mxu1 %v5356_v29  ;;  %v5377_v29 = vld [vmem:[#allocation14 + $0x40] ss:$8 sps:$4 sm:$0xff]  }
0x13da   :  { %4816 = vmatprep.subr.bf16.mxu1 %v5357_v30  ;;  %4402 = vmatpush1.bf16.msra.mxu0 %v5374_v5  ;;  %v5382_v30 = vld [vmem:[#allocation14 + $0x54] ss:$8 sps:$4 sm:$0xff]  }
0x13db   :  { %4403 = vmatprep.subr.bf16.mxu0 %v5379_v28 }
0x13dd   :  { %4817 = vmatpush3.bf16.msra.mxu1 %v5358_v20  ;;  %v5380_v20 = vld [vmem:[#allocation14 + $0x50] ss:$8 sps:$4 sm:$0xff]  }
0x13de   :  { %4818 = vmatprep.subr.bf16.mxu1 %v5359_v26  ;;  %4404 = vmatpush1.bf16.msra.mxu0 %v5377_v29  ;;  %v5385_v26 = vld [vmem:[#allocation14 + $0x64] ss:$8 sps:$4 sm:$0xff]  }
0x13df   :  { %4405 = vmatprep.subr.bf16.mxu0 %v5382_v30 }
0x13e1   :  { %4819 = vmatpush3.bf16.msra.mxu1 %v5360_v34  ;;  %v5386_v34 = vld [vmem:[#allocation14 + $0x70] ss:$8 sps:$4 sm:$0xff]  }
0x13e2   :  { %4820 = vmatprep.subr.bf16.mxu1 %v5361_v15  ;;  %4406 = vmatpush1.bf16.msra.mxu0 %v5380_v20 }
0x13e3   :  { %4407 = vmatprep.subr.bf16.mxu0 %v5385_v26 }
0x13e5   :  { %4821 = vmatpush3.bf16.msra.mxu1 %v5362_v32 }
0x13e6   :  { %4822 = vmatprep.subr.bf16.mxu1 %v5363_v33 }
0x13e9   :  { %4823 = vmatpush3.bf16.msra.mxu1 %v5364_v31 }
0x149f   :  { %v4050_v35 = vpop.f32.mrb[88].mxu1  ;;  %v4093_v36 = vpop.f32.mrb[76].mxu0 }
0x14a0   :  { %v4649_v37 = vmul.f32 -1.442695, %v4050_v35  ;;  %v4052_v60 = vpop.f32.mrb[89].mxu1  ;;  %v4095_v45 = vpop.f32.mrb[77].mxu0 }
0x14a1   :  { %v4650_v49 = vmul.f32 -1.442695, %v4052_v60  ;;  %v4054_v38 = vpop.f32.mrb[90].mxu1  ;;  %v4097_v40 = vpop.f32.mrb[78].mxu0 }
0x14a2   :  { %5485 = vpow2.f32 %v4649_v37  ;;  %v4651_v41 = vmul.f32 -1.442695, %v4054_v38  ;;  %v4056_v47 = vpop.f32.mrb[91].mxu1  ;;  %v4099_v48 = vpop.f32.mrb[79].mxu0 }
0x14a3   :  { %5487 = vpow2.f32 %v4650_v49  ;;  %v4652_v54 = vmul.f32 -1.442695, %v4056_v47  ;;  %v4669_v49 = vld [vmem:[%s6765_s9] ss:$0 sm:$0xff] }
0x14a4   :  { %5489 = vpow2.f32 %v4651_v41 }
0x14a5   :  { %5491 = vpow2.f32 %v4652_v54 }
0x14ac   :  { %v5486_v50 = vpop.eup %5485 }
0x14ad   :  { %v5488_v51 = vpop.eup %5487  ;;  %v4114_v52 = vadd.f32 1.0, %v5486_v50 }
0x14ae   :  { %v5490_v56 = vpop.eup %5489  ;;  %v4115_v21 = vadd.f32 1.0, %v5488_v51 }
0x14af   :  { %v5492_v57 = vpop.eup %5491  ;;  %5493 = vrcp.f32 %v4114_v52  ;;  %v4116_v13 = vadd.f32 1.0, %v5490_v56 }
0x14b0   :  { %5495 = vrcp.f32 %v4115_v21  ;;  %v4117_v61 = vadd.f32 1.0, %v5492_v57 }
0x14b1   :  { %5497 = vrcp.f32 %v4116_v13 }
0x14b2   :  { %5499 = vrcp.f32 %v4117_v61 }
0x14b9   :  { %v5494_v11 = vpop.eup %5493 }
0x14ba   :  { %v5496_v62 = vpop.eup %5495  ;;  %v4126_v63 = vmul.f32 %v5494_v11, %v4050_v35 }
0x14bb   :  { %v5498_v6 = vpop.eup %5497  ;;  %v4127_v1 = vmul.f32 %v5496_v62, %v4052_v60 }
0x14bc   :  { %v5500_v46 = vpop.eup %5499  ;;  %v4130_v53 = vmul.f32 %v4126_v63, %v4093_v36  ;;  %v4128_v44 = vmul.f32 %v5498_v6, %v4054_v38 }
0x14bd   :  { %v4131_v58 = vmul.f32 %v4127_v1, %v4095_v45  ;;  %v4129_v27 = vmul.f32 %v5500_v46, %v4056_v47 }
0x14be   :  { %v4132_v2 = vmul.f32 %v4128_v44, %v4097_v40 }
0x14bf   :  { %v4133_v3 = vmul.f32 %v4129_v27, %v4099_v48 }
0x14c0   :  { %v4134_v55 = vpack.c.bf16 %v4132_v2, %v4130_v53 }
0x14c1   :  { %v4135_v18 = vpack.c.bf16 %v4133_v3, %v4131_v58 }
0x14c3   :  { %4264 = vmatprep.mubr.bf16.mxu1 %v4135_v18 }
0x14c4   :  { %4265 = vmatmul.mubr.bf16.vlgmr.msra.gmra.mrb[92].mxu1 %v4134_v55 }
0x1597   :  { %v4824_v12 = vpop.f32.mrb[92].mxu1 }
0x1598   :  { %v4825_v14 = vpop.f32.mrb[93].mxu1 }
0x1599   :  { %v4826_v0 = vadd.f32 %v4825_v14, %v4824_v12  ;;  %v4827_v17 = vpop.f32.mrb[94].mxu1 }
0x159a   :  { %v4828_v16 = vpop.f32.mrb[95].mxu1 }
0x159b   :  { %v4273_v25 = vadd.f32 %v4826_v0, %v6721_v39  ;;  %v4829_v10 = vadd.f32 %v4828_v16, %v4827_v17  ;;  %v5383_v39 = vld [vmem:[#allocation14 + $0x60] ss:$8 sps:$4 sm:$0xff]  }
0x159c   :  { %4408 = vmatpush1.bf16.msra.mxu0 %v5383_v39 }
0x159d   :  { %v4274_v19 = vadd.f32 %v4829_v10, %v6724_v42  ;;  %v4276_v23 = vmul.f32 %v4273_v25, %v4273_v25  ;;  %v5388_v42 = vld [vmem:[#allocation14 + $0x74] ss:$8 sps:$4 sm:$0xff]  }
0x159e   :  { %4409 = vmatprep.subr.bf16.mxu0 %v5388_v42 }
0x159f   :  { %4278 = vadd.xlane.f32.xlu0 %v4276_v23  ;;  %v4277_v22 = vmul.f32 %v4274_v19, %v4274_v19 }
0x15a0   :  { %4410 = vmatpush1.bf16.msra.mxu0 %v5386_v34 }
0x15a1   :  { %4280 = vadd.xlane.f32.xlu1 %v4277_v22 }
0x162c   :  { %v4279_v15 = vpop.xlane.xlu0 %4278 }
0x162d   :  { %v4282_v32 = vmul.f32 0.0078125, %v4279_v15 }
0x162e   :  { %v4281_v33 = vpop.xlane.xlu1 %4280 }
0x162f   :  { %v4284_v31 = vadd.f32 1e-06, %v4282_v32  ;;  %v4283_v35 = vmul.f32 0.0078125, %v4281_v33 }
0x1631   :  { %5501 = vrsqrt.f32 %v4284_v31  ;;  %v4285_v36 = vadd.f32 1e-06, %v4283_v35 }
0x1633   :  { %5503 = vrsqrt.f32 %v4285_v36 }
0x163b   :  { %v5502_v37 = vpop.eup %5501 }
0x163c   :  { %v4288_v60 = vmul.f32 %v5502_v37, %v4273_v25 }
0x163d   :  { %v5504_v45 = vpop.eup %5503 }
0x163e   :  { %v4289_v38 = vmul.f32 %v5504_v45, %v4274_v19  ;;  %v4296_v40 = vmul.f32 %v4669_v49, %v4288_v60 }
0x1640   :  { %v4297_v41 = vmul.f32 %v4669_v49, %v4289_v38 }
0x1642   :  { %v4298_v47 = vpack.c.bf16 %v4297_v41, %v4296_v40 }
0x1644   :  { %4428 = vmatmul.mubr.bf16.vlgmr.msra.gmra.mrb[80].mxu0 %v4298_v47 }
0x1717   :  { %v4429_v48 = vpop.f32.mrb[80].mxu0 }
0x1718   :  { %4438 = vst [vmem:[#allocation16] sm:$0xff] %v4429_v48  ;;  %v4431_v54 = vpop.f32.mrb[81].mxu0 }
0x1719   :  { %4439 = vst [vmem:[#allocation16 + $0x8] sm:$0xff] %v4431_v54  ;;  %v4433_v50 = vpop.f32.mrb[82].mxu0 }
0x171a   :  { %4440 = vst [vmem:[#allocation16 + $0x10] sm:$0xff] %v4433_v50  ;;  %v4435_v51 = vpop.f32.mrb[83].mxu0 }
0x171b   :  { %4441 = vst [vmem:[#allocation16 + $0x18] sm:$0xff] %v4435_v51 }
0x171c   :  { %5696 = shalt.err (!%p5693_p12)
}
0x171d   :  { %s5697_s15 = scalar_lea.hbm %s6767_s11, 512 }
0x171e   :  { %p5698_p13 = scmp.ne.s32.totalorder %s6767_s11, %s5697_s15  ;;  %p5701_p0 = scmp.lt.u32.totalorder %s5697_s15, %s6767_s11 }
0x1720   :  { %p5703_p1 = pnand %p5701_p0, %p5698_p13 }
0x1722   :  { %5706 = shalt.err (!%p5703_p1)
}
0x1723   :  { %4453 = dma.vmem_to_hbm [thread:$0]  %s4448_s29, 512, %s6767_s11, [#allocation4], %s5724_s4, %s5724_s4, %s5725_s20  }
0x1724   :  { %5717 = dma.done.wait [#allocation4], 512  }
0x1725   :  { %5718 = vsyncadd [#allocation4], 4294966784 }
0x1726   :  { %4457 = vsyncpa [#allocation3], 1 }
0x1727   :  { %4458 = vsyncpa [#allocation6], 1 }
0x1728   :  { %4459 = vsyncpa [#allocation9], 1 }
0x1729   :  { %4460 = vsyncpa [#allocation12], 1 }
0x172a   :  { %4461 = vsyncpa [#allocation15], 1 }
0x172b   :  { %4462 = vsyncpa [#allocation4], 1 }

</bundles_post_ra>
